<compile_context>
chip_gen: v6e
topology: v6e:2x2x1
jax: 0.10.0
libtpu: 0.0.40
codegen_flags: <defaults>
</compile_context>

<pallas_src>
import numpy as np

import jax
import jax.numpy as jnp
from jax import lax
from jax.experimental import pallas as pl
from jax.experimental.pallas import tpu as pltpu

NEG_SLOPE = 0.01   # nn.LeakyReLU default negative_slope
BN_EPS = 1e-5      # nn.BatchNorm3d default eps


# ---------------------------------------------------------------------------
# Host-side parameter preparation (runs once per module instance).
# ---------------------------------------------------------------------------
def _fold_bn(weight_oidhw, bias, bn, norm):
    """Fold (conv bias | eval-mode BatchNorm) into the weights + a per-channel shift.

    Returns (w, shift) with w in (kd, kh, kw, ci, co) layout, BN scale already folded.
    """
    w = jnp.transpose(weight_oidhw, (2, 3, 4, 1, 0)).astype(jnp.float32)
    cout = w.shape[-1]
    if norm:
        gamma, beta, mean, var = bn
        scale = gamma / jnp.sqrt(var + BN_EPS)
        shift = beta - mean * scale
    else:
        scale = jnp.ones((cout,), jnp.float32)
        shift = bias if bias is not None else jnp.zeros((cout,), jnp.float32)
    return w * scale, shift


def _build_planes(w_folded, shift, H, W, cpk):
    """Precompute per-lane weight planes for the roll-based conv.

    Lane layout: L = h*(W*cpk) + w*cpk + c.
    For every depth tap kd and every static lane shift s, row (kd*S + si) of `wplanes`
    multiplies roll(x_kd, -s); it already contains the conv weight, the BN scale, and the
    h/w/channel boundary masks.

    Returns: wplanes (3*S, H*W*cpk) f32, shift_plane (1, H*W*cpk) f32, shifts (len S).
    """
    w = np.asarray(w_folded, np.float32)            # (3, 3, 3, cpk, cpk)
    lanes = H * W * cpk
    L = np.arange(lanes)
    h = L // (W * cpk)
    wcol = (L // cpk) % W
    co = L % cpk

    planes = {}
    for dh in (-1, 0, 1):
        for dw in (-1, 0, 1):
            for dc in range(-(cpk - 1), cpk):       # dc = ci - co
                s = dh * W * cpk + dw * cpk + dc
                ci = co + dc
                valid = ((h + dh >= 0) & (h + dh < H) &
                         (wcol + dw >= 0) & (wcol + dw < W) &
                         (ci >= 0) & (ci < cpk)).astype(np.float32)
                ci_c = np.clip(ci, 0, cpk - 1)
                for kd in range(3):
                    plane = w[kd, dh + 1, dw + 1][ci_c, co] * valid
                    key = (kd, s)
                    planes[key] = plane if key not in planes else planes[key] + plane

    shifts = tuple(sorted({s for (_, s) in planes}))
    rows = np.stack([planes[(kd, s)] for kd in range(3) for s in shifts], axis=0)
    shift_plane = np.tile(np.asarray(shift, np.float32), H * W)[None, :]
    return jnp.asarray(rows), jnp.asarray(shift_plane), shifts


def prepare_convblock3d(weight_oidhw, bias, bn, norm, H, W):
    cout, cin = int(weight_oidhw.shape[0]), int(weight_oidhw.shape[1])
    cpk = max(cin, cout)                            # packed channel width (lane stride)
    w, shift = _fold_bn(weight_oidhw, bias, bn, norm)
    w = jnp.pad(w, ((0, 0),) * 3 + ((0, cpk - cin), (0, cpk - cout)))
    shift = jnp.pad(shift, (0, cpk - cout))
    wplanes, shift_plane, shifts = _build_planes(w, shift, H, W, cpk)
    return dict(wplanes=wplanes, shift_plane=shift_plane, shifts=shifts,
                cin=cin, cout=cout, cpk=cpk)


# ---------------------------------------------------------------------------
# Pallas kernel: fused conv3x3x3 + (bias | folded BN) + optional LeakyReLU.
# ---------------------------------------------------------------------------
def _make_kernel(D, lanes, S, shifts, relu):
    def kernel(x_ref, wpl_ref, shift_ref, o_ref):
        x = x_ref[0].astype(jnp.float32)                          # (D, lanes)
        zrow = jnp.zeros((1, lanes), jnp.float32)
        # In-kernel zero padding along depth: x_by_kd[kd][d] = x[d + kd - 1].
        x_by_kd = (jnp.concatenate([zrow, x[:D - 1]], axis=0),    # kd = 0
                   x,                                             # kd = 1
                   jnp.concatenate([x[1:], zrow], axis=0))        # kd = 2

        acc = jnp.zeros((D, lanes), jnp.float32)
        for kd in range(3):                                       # static (3)
            xd = x_by_kd[kd]
            part = jnp.zeros((D, lanes), jnp.float32)
            for si, s in enumerate(shifts):                       # static unroll (S <= 45)
                amt = (-s) % lanes
                rolled = xd if amt == 0 else pltpu.roll(xd, amt, axis=1)
                row = kd * S + si
                part = part + rolled * wpl_ref[row:row + 1, :]    # (D,lanes)*(1,lanes)
            acc = acc + part

        y = acc + shift_ref[...]                                  # per-channel shift/bias
        if relu:
            y = jnp.where(y >= 0, y, NEG_SLOPE * y)
        o_ref[0] = y.astype(o_ref.dtype)
    return kernel


def _conv_pallas(x2d, wplanes, shift_plane, shifts, relu):
    N, D, lanes = x2d.shape
    S = len(shifts)
    kernel = _make_kernel(D, lanes, S, shifts, relu)
    return pl.pallas_call(
        kernel,
        out_shape=jax.ShapeDtypeStruct((N, D, lanes), jnp.float32),
        grid=(N,),
        in_specs=[
            pl.BlockSpec((1, D, lanes), lambda n: (n, 0, 0)),
            pl.BlockSpec(wplanes.shape, lambda n: (0, 0)),
            pl.BlockSpec(shift_plane.shape, lambda n: (0, 0)),
        ],
        out_specs=pl.BlockSpec((1, D, lanes), lambda n: (n, 0, 0)),
        # "parallel" lets v7x split the batch across its 2 TensorCores; on v5e/v6e the
        # grid is a serial loop with negligible per-step overhead at this size.
        compiler_params=pltpu.CompilerParams(dimension_semantics=("parallel",)),
    )(x2d, wplanes, shift_plane)


def convblock3d_forward(x_ncdhw, prep, relu):
    """x: (N, Cin, D, H, W) PyTorch layout; returns (N, Cout, D, H, W)."""
    cout, cpk = prep["cout"], prep["cpk"]
    N, C, D, H, W = x_ncdhw.shape
    x = jnp.transpose(x_ncdhw, (0, 2, 3, 4, 1)).astype(jnp.float32)   # NDHWC
    if cpk != C:
        x = jnp.pad(x, ((0, 0),) * 4 + ((0, cpk - C),))               # pack channels
    x2d = x.reshape(N, D, H * W * cpk)                                # lane-dense layout
    out2d = _conv_pallas(x2d, prep["wplanes"], prep["shift_plane"], prep["shifts"], relu)
    out = out2d.reshape(N, D, H, W, cpk)[..., :cout]
    return jnp.transpose(out, (0, 4, 1, 2, 3))                        # back to NCDHW


def build_convblock3d(weight_oidhw, bias, bn, *, norm, relu, H, W):
    prep = prepare_convblock3d(weight_oidhw, bias, bn, norm, H, W)

    def fwd(x):
        return convblock3d_forward(x, prep, relu)

    return jax.jit(fwd)


# ---------------------------------------------------------------------------
# Pure-JAX (XLA) reference of the same forward pass.
# ---------------------------------------------------------------------------
def reference_forward(x, weight_oidhw, bias, bn, norm, relu):
    out = lax.conv_general_dilated(
        x, weight_oidhw, (1, 1, 1), [(1, 1)] * 3,
        dimension_numbers=("NCDHW", "OIDHW", "NCDHW"))
    r = lambda v: v.reshape(1, -1, 1, 1, 1)
    if norm:
        gamma, beta, mean, var = bn
        out = (out - r(mean)) / jnp.sqrt(r(var) + BN_EPS) * r(gamma) + r(beta)
    else:
        out = out + r(bias)
    if relu:
        out = jnp.where(out >= 0, out, NEG_SLOPE * out)
    return out


if __name__ == "__main__":
    N, D, H, W = 2, 8, 8, 8
    key = jax.random.PRNGKey(0)

    configs = [
        dict(inplanes=4, planes=4, norm=True,  relu=True),    # conv + BN + LeakyReLU
        dict(inplanes=4, planes=4, norm=False, relu=False),   # module defaults: conv + bias
        dict(inplanes=2, planes=4, norm=True,  relu=True),    # differing in/out channels
    ]

    for cfg in configs:
        key, kx, kwt, kb, kg, kbt, km, kv = jax.random.split(key, 8)
        cin, cout = cfg["inplanes"], cfg["planes"]

        x = jax.random.normal(kx, (N, cin, D, H, W), jnp.float32)       # PyTorch NCDHW
        weight = 0.1 * jax.random.normal(kwt, (cout, cin, 3, 3, 3), jnp.float32)
        bias = 0.1 * jax.random.normal(kb, (cout,), jnp.float32)
        bn = (1.0 + 0.1 * jax.random.normal(kg, (cout,), jnp.float32),        # gamma
              0.1 * jax.random.normal(kbt, (cout,), jnp.float32),             # beta
              0.1 * jax.random.normal(km, (cout,), jnp.float32),              # running_mean
              jnp.abs(jax.random.normal(kv, (cout,), jnp.float32)) + 0.5)     # running_var

        fwd = build_convblock3d(weight, None if cfg["norm"] else bias, bn,
                                norm=cfg["norm"], relu=cfg["relu"], H=H, W=W)
        out = jax.block_until_ready(fwd(x))

        ref = reference_forward(x, weight, bias, bn, cfg["norm"], cfg["relu"])
        assert out.shape == (N, cout, D, H, W), (out.shape, cfg)
        max_err = float(jnp.max(jnp.abs(out - ref)))
        assert jnp.allclose(out, ref, atol=1e-4, rtol=1e-4), \
            f"config {cfg}: max abs err {max_err}"

    print("KERNEL_OK")
</pallas_src>

<mosaic_0001>
module attributes {stable_mosaic.version = 11 : i64} {
  func.func @kernel(%arg0: i32, %arg1: memref<1x8x256xf32, #tpu.memory_space<vmem>>, %arg2: memref<135x256xf32, #tpu.memory_space<vmem>>, %arg3: memref<1x256xf32, #tpu.memory_space<vmem>>, %arg4: memref<1x8x256xf32, #tpu.memory_space<vmem>>) attributes {dimension_semantics = [#tpu.dimension_semantics<parallel>], iteration_bounds = array<i64: 2>, scalar_prefetch = 0 : i64, scratch_operands = 0 : i64, tpu.core_type = #tpu.core_type<tc>, window_params = [{transform_indices = @transform_0, window_bounds = array<i64: 1, 8, 256>}, {pipeline_mode = #tpu.pipeline_mode<synchronous>, transform_indices = @transform_1, window_bounds = array<i64: 135, 256>}, {pipeline_mode = #tpu.pipeline_mode<synchronous>, transform_indices = @transform_2, window_bounds = array<i64: 1, 256>}, {transform_indices = @transform_3, window_bounds = array<i64: 1, 8, 256>}]} {
    %c0 = arith.constant 0 : index
    %c0_0 = arith.constant 0 : index
    %c0_1 = arith.constant 0 : index
    %0 = vector.load %arg1[%c0, %c0_0, %c0_1] : memref<1x8x256xf32, #tpu.memory_space<vmem>>, vector<1x8x256xf32>
    %1 = vector.shape_cast %0 : vector<1x8x256xf32> to vector<8x256xf32>
    %cst = arith.constant 0.000000e+00 : f32
    %2 = vector.broadcast %cst : f32 to vector<1x256xf32>
    %3 = vector.extract_strided_slice %1 {offsets = [0, 0], sizes = [7, 256], strides = [1, 1]} : vector<8x256xf32> to vector<7x256xf32>
    %4 = tpu.concatenate %2, %3 in 0 : vector<1x256xf32>, vector<7x256xf32> -> vector<8x256xf32>
    %5 = vector.extract_strided_slice %1 {offsets = [1, 0], sizes = [7, 256], strides = [1, 1]} : vector<8x256xf32> to vector<7x256xf32>
    %6 = tpu.concatenate %5, %2 in 0 : vector<7x256xf32>, vector<1x256xf32> -> vector<8x256xf32>
    %cst_2 = arith.constant 0.000000e+00 : f32
    %7 = vector.broadcast %cst_2 : f32 to vector<8x256xf32>
    %cst_3 = arith.constant 0.000000e+00 : f32
    %8 = vector.broadcast %cst_3 : f32 to vector<8x256xf32>
    %c39_i32 = arith.constant 39 : i32
    %9 = tpu.dynamic_rotate %4 by %c39_i32 dim 1 : vector<8x256xf32>, i32 -> vector<8x256xf32>
    %c0_4 = arith.constant 0 : index
    %c0_5 = arith.constant 0 : index
    %10 = vector.load %arg2[%c0_4, %c0_5] : memref<135x256xf32, #tpu.memory_space<vmem>>, vector<1x256xf32>
    %11 = vector.broadcast %10 : vector<1x256xf32> to vector<8x256xf32>
    %12 = arith.mulf %9, %11 : vector<8x256xf32>
    %13 = arith.addf %8, %12 : vector<8x256xf32>
    %c38_i32 = arith.constant 38 : i32
    %14 = tpu.dynamic_rotate %4 by %c38_i32 dim 1 : vector<8x256xf32>, i32 -> vector<8x256xf32>
    %c1 = arith.constant 1 : index
    %c0_6 = arith.constant 0 : index
    %15 = vector.load %arg2[%c1, %c0_6] : memref<135x256xf32, #tpu.memory_space<vmem>>, vector<1x256xf32>
    %16 = vector.broadcast %15 : vector<1x256xf32> to vector<8x256xf32>
    %17 = arith.mulf %14, %16 : vector<8x256xf32>
    %18 = arith.addf %13, %17 : vector<8x256xf32>
    %c37_i32 = arith.constant 37 : i32
    %19 = tpu.dynamic_rotate %4 by %c37_i32 dim 1 : vector<8x256xf32>, i32 -> vector<8x256xf32>
    %c2 = arith.constant 2 : index
    %c0_7 = arith.constant 0 : index
    %20 = vector.load %arg2[%c2, %c0_7] : memref<135x256xf32, #tpu.memory_space<vmem>>, vector<1x256xf32>
    %21 = vector.broadcast %20 : vector<1x256xf32> to vector<8x256xf32>
    %22 = arith.mulf %19, %21 : vector<8x256xf32>
    %23 = arith.addf %18, %22 : vector<8x256xf32>
    %c36_i32 = arith.constant 36 : i32
    %24 = tpu.dynamic_rotate %4 by %c36_i32 dim 1 : vector<8x256xf32>, i32 -> vector<8x256xf32>
    %c3 = arith.constant 3 : index
    %c0_8 = arith.constant 0 : index
    %25 = vector.load %arg2[%c3, %c0_8] : memref<135x256xf32, #tpu.memory_space<vmem>>, vector<1x256xf32>
    %26 = vector.broadcast %25 : vector<1x256xf32> to vector<8x256xf32>
    %27 = arith.mulf %24, %26 : vector<8x256xf32>
    %28 = arith.addf %23, %27 : vector<8x256xf32>
    %c35_i32 = arith.constant 35 : i32
    %29 = tpu.dynamic_rotate %4 by %c35_i32 dim 1 : vector<8x256xf32>, i32 -> vector<8x256xf32>
    %c4 = arith.constant 4 : index
    %c0_9 = arith.constant 0 : index
    %30 = vector.load %arg2[%c4, %c0_9] : memref<135x256xf32, #tpu.memory_space<vmem>>, vector<1x256xf32>
    %31 = vector.broadcast %30 : vector<1x256xf32> to vector<8x256xf32>
    %32 = arith.mulf %29, %31 : vector<8x256xf32>
    %33 = arith.addf %28, %32 : vector<8x256xf32>
    %c34_i32 = arith.constant 34 : i32
    %34 = tpu.dynamic_rotate %4 by %c34_i32 dim 1 : vector<8x256xf32>, i32 -> vector<8x256xf32>
    %c5 = arith.constant 5 : index
    %c0_10 = arith.constant 0 : index
    %35 = vector.load %arg2[%c5, %c0_10] : memref<135x256xf32, #tpu.memory_space<vmem>>, vector<1x256xf32>
    %36 = vector.broadcast %35 : vector<1x256xf32> to vector<8x256xf32>
    %37 = arith.mulf %34, %36 : vector<8x256xf32>
    %38 = arith.addf %33, %37 : vector<8x256xf32>
    %c33_i32 = arith.constant 33 : i32
    %39 = tpu.dynamic_rotate %4 by %c33_i32 dim 1 : vector<8x256xf32>, i32 -> vector<8x256xf32>
    %c6 = arith.constant 6 : index
    %c0_11 = arith.constant 0 : index
    %40 = vector.load %arg2[%c6, %c0_11] : memref<135x256xf32, #tpu.memory_space<vmem>>, vector<1x256xf32>
    %41 = vector.broadcast %40 : vector<1x256xf32> to vector<8x256xf32>
    %42 = arith.mulf %39, %41 : vector<8x256xf32>
    %43 = arith.addf %38, %42 : vector<8x256xf32>
    %c32_i32 = arith.constant 32 : i32
    %44 = tpu.dynamic_rotate %4 by %c32_i32 dim 1 : vector<8x256xf32>, i32 -> vector<8x256xf32>
    %c7 = arith.constant 7 : index
    %c0_12 = arith.constant 0 : index
    %45 = vector.load %arg2[%c7, %c0_12] : memref<135x256xf32, #tpu.memory_space<vmem>>, vector<1x256xf32>
    %46 = vector.broadcast %45 : vector<1x256xf32> to vector<8x256xf32>
    %47 = arith.mulf %44, %46 : vector<8x256xf32>
    %48 = arith.addf %43, %47 : vector<8x256xf32>
    %c31_i32 = arith.constant 31 : i32
    %49 = tpu.dynamic_rotate %4 by %c31_i32 dim 1 : vector<8x256xf32>, i32 -> vector<8x256xf32>
    %c8 = arith.constant 8 : index
    %c0_13 = arith.constant 0 : index
    %50 = vector.load %arg2[%c8, %c0_13] : memref<135x256xf32, #tpu.memory_space<vmem>>, vector<1x256xf32>
    %51 = vector.broadcast %50 : vector<1x256xf32> to vector<8x256xf32>
    %52 = arith.mulf %49, %51 : vector<8x256xf32>
    %53 = arith.addf %48, %52 : vector<8x256xf32>
    %c30_i32 = arith.constant 30 : i32
    %54 = tpu.dynamic_rotate %4 by %c30_i32 dim 1 : vector<8x256xf32>, i32 -> vector<8x256xf32>
    %c9 = arith.constant 9 : index
    %c0_14 = arith.constant 0 : index
    %55 = vector.load %arg2[%c9, %c0_14] : memref<135x256xf32, #tpu.memory_space<vmem>>, vector<1x256xf32>
    %56 = vector.broadcast %55 : vector<1x256xf32> to vector<8x256xf32>
    %57 = arith.mulf %54, %56 : vector<8x256xf32>
    %58 = arith.addf %53, %57 : vector<8x256xf32>
    %c29_i32 = arith.constant 29 : i32
    %59 = tpu.dynamic_rotate %4 by %c29_i32 dim 1 : vector<8x256xf32>, i32 -> vector<8x256xf32>
    %c10 = arith.constant 10 : index
    %c0_15 = arith.constant 0 : index
    %60 = vector.load %arg2[%c10, %c0_15] : memref<135x256xf32, #tpu.memory_space<vmem>>, vector<1x256xf32>
    %61 = vector.broadcast %60 : vector<1x256xf32> to vector<8x256xf32>
    %62 = arith.mulf %59, %61 : vector<8x256xf32>
    %63 = arith.addf %58, %62 : vector<8x256xf32>
    %c28_i32 = arith.constant 28 : i32
    %64 = tpu.dynamic_rotate %4 by %c28_i32 dim 1 : vector<8x256xf32>, i32 -> vector<8x256xf32>
    %c11 = arith.constant 11 : index
    %c0_16 = arith.constant 0 : index
    %65 = vector.load %arg2[%c11, %c0_16] : memref<135x256xf32, #tpu.memory_space<vmem>>, vector<1x256xf32>
    %66 = vector.broadcast %65 : vector<1x256xf32> to vector<8x256xf32>
    %67 = arith.mulf %64, %66 : vector<8x256xf32>
    %68 = arith.addf %63, %67 : vector<8x256xf32>
    %c27_i32 = arith.constant 27 : i32
    %69 = tpu.dynamic_rotate %4 by %c27_i32 dim 1 : vector<8x256xf32>, i32 -> vector<8x256xf32>
    %c12 = arith.constant 12 : index
    %c0_17 = arith.constant 0 : index
    %70 = vector.load %arg2[%c12, %c0_17] : memref<135x256xf32, #tpu.memory_space<vmem>>, vector<1x256xf32>
    %71 = vector.broadcast %70 : vector<1x256xf32> to vector<8x256xf32>
    %72 = arith.mulf %69, %71 : vector<8x256xf32>
    %73 = arith.addf %68, %72 : vector<8x256xf32>
    %c26_i32 = arith.constant 26 : i32
    %74 = tpu.dynamic_rotate %4 by %c26_i32 dim 1 : vector<8x256xf32>, i32 -> vector<8x256xf32>
    %c13 = arith.constant 13 : index
    %c0_18 = arith.constant 0 : index
    %75 = vector.load %arg2[%c13, %c0_18] : memref<135x256xf32, #tpu.memory_space<vmem>>, vector<1x256xf32>
    %76 = vector.broadcast %75 : vector<1x256xf32> to vector<8x256xf32>
    %77 = arith.mulf %74, %76 : vector<8x256xf32>
    %78 = arith.addf %73, %77 : vector<8x256xf32>
    %c25_i32 = arith.constant 25 : i32
    %79 = tpu.dynamic_rotate %4 by %c25_i32 dim 1 : vector<8x256xf32>, i32 -> vector<8x256xf32>
    %c14 = arith.constant 14 : index
    %c0_19 = arith.constant 0 : index
    %80 = vector.load %arg2[%c14, %c0_19] : memref<135x256xf32, #tpu.memory_space<vmem>>, vector<1x256xf32>
    %81 = vector.broadcast %80 : vector<1x256xf32> to vector<8x256xf32>
    %82 = arith.mulf %79, %81 : vector<8x256xf32>
    %83 = arith.addf %78, %82 : vector<8x256xf32>
    %c7_i32 = arith.constant 7 : i32
    %84 = tpu.dynamic_rotate %4 by %c7_i32 dim 1 : vector<8x256xf32>, i32 -> vector<8x256xf32>
    %c15 = arith.constant 15 : index
    %c0_20 = arith.constant 0 : index
    %85 = vector.load %arg2[%c15, %c0_20] : memref<135x256xf32, #tpu.memory_space<vmem>>, vector<1x256xf32>
    %86 = vector.broadcast %85 : vector<1x256xf32> to vector<8x256xf32>
    %87 = arith.mulf %84, %86 : vector<8x256xf32>
    %88 = arith.addf %83, %87 : vector<8x256xf32>
    %c6_i32 = arith.constant 6 : i32
    %89 = tpu.dynamic_rotate %4 by %c6_i32 dim 1 : vector<8x256xf32>, i32 -> vector<8x256xf32>
    %c16 = arith.constant 16 : index
    %c0_21 = arith.constant 0 : index
    %90 = vector.load %arg2[%c16, %c0_21] : memref<135x256xf32, #tpu.memory_space<vmem>>, vector<1x256xf32>
    %91 = vector.broadcast %90 : vector<1x256xf32> to vector<8x256xf32>
    %92 = arith.mulf %89, %91 : vector<8x256xf32>
    %93 = arith.addf %88, %92 : vector<8x256xf32>
    %c5_i32 = arith.constant 5 : i32
    %94 = tpu.dynamic_rotate %4 by %c5_i32 dim 1 : vector<8x256xf32>, i32 -> vector<8x256xf32>
    %c17 = arith.constant 17 : index
    %c0_22 = arith.constant 0 : index
    %95 = vector.load %arg2[%c17, %c0_22] : memref<135x256xf32, #tpu.memory_space<vmem>>, vector<1x256xf32>
    %96 = vector.broadcast %95 : vector<1x256xf32> to vector<8x256xf32>
    %97 = arith.mulf %94, %96 : vector<8x256xf32>
    %98 = arith.addf %93, %97 : vector<8x256xf32>
    %c4_i32 = arith.constant 4 : i32
    %99 = tpu.dynamic_rotate %4 by %c4_i32 dim 1 : vector<8x256xf32>, i32 -> vector<8x256xf32>
    %c18 = arith.constant 18 : index
    %c0_23 = arith.constant 0 : index
    %100 = vector.load %arg2[%c18, %c0_23] : memref<135x256xf32, #tpu.memory_space<vmem>>, vector<1x256xf32>
    %101 = vector.broadcast %100 : vector<1x256xf32> to vector<8x256xf32>
    %102 = arith.mulf %99, %101 : vector<8x256xf32>
    %103 = arith.addf %98, %102 : vector<8x256xf32>
    %c3_i32 = arith.constant 3 : i32
    %104 = tpu.dynamic_rotate %4 by %c3_i32 dim 1 : vector<8x256xf32>, i32 -> vector<8x256xf32>
    %c19 = arith.constant 19 : index
    %c0_24 = arith.constant 0 : index
    %105 = vector.load %arg2[%c19, %c0_24] : memref<135x256xf32, #tpu.memory_space<vmem>>, vector<1x256xf32>
    %106 = vector.broadcast %105 : vector<1x256xf32> to vector<8x256xf32>
    %107 = arith.mulf %104, %106 : vector<8x256xf32>
    %108 = arith.addf %103, %107 : vector<8x256xf32>
    %c2_i32 = arith.constant 2 : i32
    %109 = tpu.dynamic_rotate %4 by %c2_i32 dim 1 : vector<8x256xf32>, i32 -> vector<8x256xf32>
    %c20 = arith.constant 20 : index
    %c0_25 = arith.constant 0 : index
    %110 = vector.load %arg2[%c20, %c0_25] : memref<135x256xf32, #tpu.memory_space<vmem>>, vector<1x256xf32>
    %111 = vector.broadcast %110 : vector<1x256xf32> to vector<8x256xf32>
    %112 = arith.mulf %109, %111 : vector<8x256xf32>
    %113 = arith.addf %108, %112 : vector<8x256xf32>
    %c1_i32 = arith.constant 1 : i32
    %114 = tpu.dynamic_rotate %4 by %c1_i32 dim 1 : vector<8x256xf32>, i32 -> vector<8x256xf32>
    %c21 = arith.constant 21 : index
    %c0_26 = arith.constant 0 : index
    %115 = vector.load %arg2[%c21, %c0_26] : memref<135x256xf32, #tpu.memory_space<vmem>>, vector<1x256xf32>
    %116 = vector.broadcast %115 : vector<1x256xf32> to vector<8x256xf32>
    %117 = arith.mulf %114, %116 : vector<8x256xf32>
    %118 = arith.addf %113, %117 : vector<8x256xf32>
    %c22 = arith.constant 22 : index
    %c0_27 = arith.constant 0 : index
    %119 = vector.load %arg2[%c22, %c0_27] : memref<135x256xf32, #tpu.memory_space<vmem>>, vector<1x256xf32>
    %120 = vector.broadcast %119 : vector<1x256xf32> to vector<8x256xf32>
    %121 = arith.mulf %4, %120 : vector<8x256xf32>
    %122 = arith.addf %118, %121 : vector<8x256xf32>
    %c255_i32 = arith.constant 255 : i32
    %123 = tpu.dynamic_rotate %4 by %c255_i32 dim 1 : vector<8x256xf32>, i32 -> vector<8x256xf32>
    %c23 = arith.constant 23 : index
    %c0_28 = arith.constant 0 : index
    %124 = vector.load %arg2[%c23, %c0_28] : memref<135x256xf32, #tpu.memory_space<vmem>>, vector<1x256xf32>
    %125 = vector.broadcast %124 : vector<1x256xf32> to vector<8x256xf32>
    %126 = arith.mulf %123, %125 : vector<8x256xf32>
    %127 = arith.addf %122, %126 : vector<8x256xf32>
    %c254_i32 = arith.constant 254 : i32
    %128 = tpu.dynamic_rotate %4 by %c254_i32 dim 1 : vector<8x256xf32>, i32 -> vector<8x256xf32>
    %c24 = arith.constant 24 : index
    %c0_29 = arith.constant 0 : index
    %129 = vector.load %arg2[%c24, %c0_29] : memref<135x256xf32, #tpu.memory_space<vmem>>, vector<1x256xf32>
    %130 = vector.broadcast %129 : vector<1x256xf32> to vector<8x256xf32>
    %131 = arith.mulf %128, %130 : vector<8x256xf32>
    %132 = arith.addf %127, %131 : vector<8x256xf32>
    %c253_i32 = arith.constant 253 : i32
    %133 = tpu.dynamic_rotate %4 by %c253_i32 dim 1 : vector<8x256xf32>, i32 -> vector<8x256xf32>
    %c25 = arith.constant 25 : index
    %c0_30 = arith.constant 0 : index
    %134 = vector.load %arg2[%c25, %c0_30] : memref<135x256xf32, #tpu.memory_space<vmem>>, vector<1x256xf32>
    %135 = vector.broadcast %134 : vector<1x256xf32> to vector<8x256xf32>
    %136 = arith.mulf %133, %135 : vector<8x256xf32>
    %137 = arith.addf %132, %136 : vector<8x256xf32>
    %c252_i32 = arith.constant 252 : i32
    %138 = tpu.dynamic_rotate %4 by %c252_i32 dim 1 : vector<8x256xf32>, i32 -> vector<8x256xf32>
    %c26 = arith.constant 26 : index
    %c0_31 = arith.constant 0 : index
    %139 = vector.load %arg2[%c26, %c0_31] : memref<135x256xf32, #tpu.memory_space<vmem>>, vector<1x256xf32>
    %140 = vector.broadcast %139 : vector<1x256xf32> to vector<8x256xf32>
    %141 = arith.mulf %138, %140 : vector<8x256xf32>
    %142 = arith.addf %137, %141 : vector<8x256xf32>
    %c251_i32 = arith.constant 251 : i32
    %143 = tpu.dynamic_rotate %4 by %c251_i32 dim 1 : vector<8x256xf32>, i32 -> vector<8x256xf32>
    %c27 = arith.constant 27 : index
    %c0_32 = arith.constant 0 : index
    %144 = vector.load %arg2[%c27, %c0_32] : memref<135x256xf32, #tpu.memory_space<vmem>>, vector<1x256xf32>
    %145 = vector.broadcast %144 : vector<1x256xf32> to vector<8x256xf32>
    %146 = arith.mulf %143, %145 : vector<8x256xf32>
    %147 = arith.addf %142, %146 : vector<8x256xf32>
    %c250_i32 = arith.constant 250 : i32
    %148 = tpu.dynamic_rotate %4 by %c250_i32 dim 1 : vector<8x256xf32>, i32 -> vector<8x256xf32>
    %c28 = arith.constant 28 : index
    %c0_33 = arith.constant 0 : index
    %149 = vector.load %arg2[%c28, %c0_33] : memref<135x256xf32, #tpu.memory_space<vmem>>, vector<1x256xf32>
    %150 = vector.broadcast %149 : vector<1x256xf32> to vector<8x256xf32>
    %151 = arith.mulf %148, %150 : vector<8x256xf32>
    %152 = arith.addf %147, %151 : vector<8x256xf32>
    %c249_i32 = arith.constant 249 : i32
    %153 = tpu.dynamic_rotate %4 by %c249_i32 dim 1 : vector<8x256xf32>, i32 -> vector<8x256xf32>
    %c29 = arith.constant 29 : index
    %c0_34 = arith.constant 0 : index
    %154 = vector.load %arg2[%c29, %c0_34] : memref<135x256xf32, #tpu.memory_space<vmem>>, vector<1x256xf32>
    %155 = vector.broadcast %154 : vector<1x256xf32> to vector<8x256xf32>
    %156 = arith.mulf %153, %155 : vector<8x256xf32>
    %157 = arith.addf %152, %156 : vector<8x256xf32>
    %c231_i32 = arith.constant 231 : i32
    %158 = tpu.dynamic_rotate %4 by %c231_i32 dim 1 : vector<8x256xf32>, i32 -> vector<8x256xf32>
    %c30 = arith.constant 30 : index
    %c0_35 = arith.constant 0 : index
    %159 = vector.load %arg2[%c30, %c0_35] : memref<135x256xf32, #tpu.memory_space<vmem>>, vector<1x256xf32>
    %160 = vector.broadcast %159 : vector<1x256xf32> to vector<8x256xf32>
    %161 = arith.mulf %158, %160 : vector<8x256xf32>
    %162 = arith.addf %157, %161 : vector<8x256xf32>
    %c230_i32 = arith.constant 230 : i32
    %163 = tpu.dynamic_rotate %4 by %c230_i32 dim 1 : vector<8x256xf32>, i32 -> vector<8x256xf32>
    %c31 = arith.constant 31 : index
    %c0_36 = arith.constant 0 : index
    %164 = vector.load %arg2[%c31, %c0_36] : memref<135x256xf32, #tpu.memory_space<vmem>>, vector<1x256xf32>
    %165 = vector.broadcast %164 : vector<1x256xf32> to vector<8x256xf32>
    %166 = arith.mulf %163, %165 : vector<8x256xf32>
    %167 = arith.addf %162, %166 : vector<8x256xf32>
    %c229_i32 = arith.constant 229 : i32
    %168 = tpu.dynamic_rotate %4 by %c229_i32 dim 1 : vector<8x256xf32>, i32 -> vector<8x256xf32>
    %c32 = arith.constant 32 : index
    %c0_37 = arith.constant 0 : index
    %169 = vector.load %arg2[%c32, %c0_37] : memref<135x256xf32, #tpu.memory_space<vmem>>, vector<1x256xf32>
    %170 = vector.broadcast %169 : vector<1x256xf32> to vector<8x256xf32>
    %171 = arith.mulf %168, %170 : vector<8x256xf32>
    %172 = arith.addf %167, %171 : vector<8x256xf32>
    %c228_i32 = arith.constant 228 : i32
    %173 = tpu.dynamic_rotate %4 by %c228_i32 dim 1 : vector<8x256xf32>, i32 -> vector<8x256xf32>
    %c33 = arith.constant 33 : index
    %c0_38 = arith.constant 0 : index
    %174 = vector.load %arg2[%c33, %c0_38] : memref<135x256xf32, #tpu.memory_space<vmem>>, vector<1x256xf32>
    %175 = vector.broadcast %174 : vector<1x256xf32> to vector<8x256xf32>
    %176 = arith.mulf %173, %175 : vector<8x256xf32>
    %177 = arith.addf %172, %176 : vector<8x256xf32>
    %c227_i32 = arith.constant 227 : i32
    %178 = tpu.dynamic_rotate %4 by %c227_i32 dim 1 : vector<8x256xf32>, i32 -> vector<8x256xf32>
    %c34 = arith.constant 34 : index
    %c0_39 = arith.constant 0 : index
    %179 = vector.load %arg2[%c34, %c0_39] : memref<135x256xf32, #tpu.memory_space<vmem>>, vector<1x256xf32>
    %180 = vector.broadcast %179 : vector<1x256xf32> to vector<8x256xf32>
    %181 = arith.mulf %178, %180 : vector<8x256xf32>
    %182 = arith.addf %177, %181 : vector<8x256xf32>
    %c226_i32 = arith.constant 226 : i32
    %183 = tpu.dynamic_rotate %4 by %c226_i32 dim 1 : vector<8x256xf32>, i32 -> vector<8x256xf32>
    %c35 = arith.constant 35 : index
    %c0_40 = arith.constant 0 : index
    %184 = vector.load %arg2[%c35, %c0_40] : memref<135x256xf32, #tpu.memory_space<vmem>>, vector<1x256xf32>
    %185 = vector.broadcast %184 : vector<1x256xf32> to vector<8x256xf32>
    %186 = arith.mulf %183, %185 : vector<8x256xf32>
    %187 = arith.addf %182, %186 : vector<8x256xf32>
    %c225_i32 = arith.constant 225 : i32
    %188 = tpu.dynamic_rotate %4 by %c225_i32 dim 1 : vector<8x256xf32>, i32 -> vector<8x256xf32>
    %c36 = arith.constant 36 : index
    %c0_41 = arith.constant 0 : index
    %189 = vector.load %arg2[%c36, %c0_41] : memref<135x256xf32, #tpu.memory_space<vmem>>, vector<1x256xf32>
    %190 = vector.broadcast %189 : vector<1x256xf32> to vector<8x256xf32>
    %191 = arith.mulf %188, %190 : vector<8x256xf32>
    %192 = arith.addf %187, %191 : vector<8x256xf32>
    %c224_i32 = arith.constant 224 : i32
    %193 = tpu.dynamic_rotate %4 by %c224_i32 dim 1 : vector<8x256xf32>, i32 -> vector<8x256xf32>
    %c37 = arith.constant 37 : index
    %c0_42 = arith.constant 0 : index
    %194 = vector.load %arg2[%c37, %c0_42] : memref<135x256xf32, #tpu.memory_space<vmem>>, vector<1x256xf32>
    %195 = vector.broadcast %194 : vector<1x256xf32> to vector<8x256xf32>
    %196 = arith.mulf %193, %195 : vector<8x256xf32>
    %197 = arith.addf %192, %196 : vector<8x256xf32>
    %c223_i32 = arith.constant 223 : i32
    %198 = tpu.dynamic_rotate %4 by %c223_i32 dim 1 : vector<8x256xf32>, i32 -> vector<8x256xf32>
    %c38 = arith.constant 38 : index
    %c0_43 = arith.constant 0 : index
    %199 = vector.load %arg2[%c38, %c0_43] : memref<135x256xf32, #tpu.memory_space<vmem>>, vector<1x256xf32>
    %200 = vector.broadcast %199 : vector<1x256xf32> to vector<8x256xf32>
    %201 = arith.mulf %198, %200 : vector<8x256xf32>
    %202 = arith.addf %197, %201 : vector<8x256xf32>
    %c222_i32 = arith.constant 222 : i32
    %203 = tpu.dynamic_rotate %4 by %c222_i32 dim 1 : vector<8x256xf32>, i32 -> vector<8x256xf32>
    %c39 = arith.constant 39 : index
    %c0_44 = arith.constant 0 : index
    %204 = vector.load %arg2[%c39, %c0_44] : memref<135x256xf32, #tpu.memory_space<vmem>>, vector<1x256xf32>
    %205 = vector.broadcast %204 : vector<1x256xf32> to vector<8x256xf32>
    %206 = arith.mulf %203, %205 : vector<8x256xf32>
    %207 = arith.addf %202, %206 : vector<8x256xf32>
    %c221_i32 = arith.constant 221 : i32
    %208 = tpu.dynamic_rotate %4 by %c221_i32 dim 1 : vector<8x256xf32>, i32 -> vector<8x256xf32>
    %c40 = arith.constant 40 : index
    %c0_45 = arith.constant 0 : index
    %209 = vector.load %arg2[%c40, %c0_45] : memref<135x256xf32, #tpu.memory_space<vmem>>, vector<1x256xf32>
    %210 = vector.broadcast %209 : vector<1x256xf32> to vector<8x256xf32>
    %211 = arith.mulf %208, %210 : vector<8x256xf32>
    %212 = arith.addf %207, %211 : vector<8x256xf32>
    %c220_i32 = arith.constant 220 : i32
    %213 = tpu.dynamic_rotate %4 by %c220_i32 dim 1 : vector<8x256xf32>, i32 -> vector<8x256xf32>
    %c41 = arith.constant 41 : index
    %c0_46 = arith.constant 0 : index
    %214 = vector.load %arg2[%c41, %c0_46] : memref<135x256xf32, #tpu.memory_space<vmem>>, vector<1x256xf32>
    %215 = vector.broadcast %214 : vector<1x256xf32> to vector<8x256xf32>
    %216 = arith.mulf %213, %215 : vector<8x256xf32>
    %217 = arith.addf %212, %216 : vector<8x256xf32>
    %c219_i32 = arith.constant 219 : i32
    %218 = tpu.dynamic_rotate %4 by %c219_i32 dim 1 : vector<8x256xf32>, i32 -> vector<8x256xf32>
    %c42 = arith.constant 42 : index
    %c0_47 = arith.constant 0 : index
    %219 = vector.load %arg2[%c42, %c0_47] : memref<135x256xf32, #tpu.memory_space<vmem>>, vector<1x256xf32>
    %220 = vector.broadcast %219 : vector<1x256xf32> to vector<8x256xf32>
    %221 = arith.mulf %218, %220 : vector<8x256xf32>
    %222 = arith.addf %217, %221 : vector<8x256xf32>
    %c218_i32 = arith.constant 218 : i32
    %223 = tpu.dynamic_rotate %4 by %c218_i32 dim 1 : vector<8x256xf32>, i32 -> vector<8x256xf32>
    %c43 = arith.constant 43 : index
    %c0_48 = arith.constant 0 : index
    %224 = vector.load %arg2[%c43, %c0_48] : memref<135x256xf32, #tpu.memory_space<vmem>>, vector<1x256xf32>
    %225 = vector.broadcast %224 : vector<1x256xf32> to vector<8x256xf32>
    %226 = arith.mulf %223, %225 : vector<8x256xf32>
    %227 = arith.addf %222, %226 : vector<8x256xf32>
    %c217_i32 = arith.constant 217 : i32
    %228 = tpu.dynamic_rotate %4 by %c217_i32 dim 1 : vector<8x256xf32>, i32 -> vector<8x256xf32>
    %c44 = arith.constant 44 : index
    %c0_49 = arith.constant 0 : index
    %229 = vector.load %arg2[%c44, %c0_49] : memref<135x256xf32, #tpu.memory_space<vmem>>, vector<1x256xf32>
    %230 = vector.broadcast %229 : vector<1x256xf32> to vector<8x256xf32>
    %231 = arith.mulf %228, %230 : vector<8x256xf32>
    %232 = arith.addf %227, %231 : vector<8x256xf32>
    %233 = arith.addf %7, %232 : vector<8x256xf32>
    %cst_50 = arith.constant 0.000000e+00 : f32
    %234 = vector.broadcast %cst_50 : f32 to vector<8x256xf32>
    %c39_i32_51 = arith.constant 39 : i32
    %235 = tpu.dynamic_rotate %1 by %c39_i32_51 dim 1 : vector<8x256xf32>, i32 -> vector<8x256xf32>
    %c45 = arith.constant 45 : index
    %c0_52 = arith.constant 0 : index
    %236 = vector.load %arg2[%c45, %c0_52] : memref<135x256xf32, #tpu.memory_space<vmem>>, vector<1x256xf32>
    %237 = vector.broadcast %236 : vector<1x256xf32> to vector<8x256xf32>
    %238 = arith.mulf %235, %237 : vector<8x256xf32>
    %239 = arith.addf %234, %238 : vector<8x256xf32>
    %c38_i32_53 = arith.constant 38 : i32
    %240 = tpu.dynamic_rotate %1 by %c38_i32_53 dim 1 : vector<8x256xf32>, i32 -> vector<8x256xf32>
    %c46 = arith.constant 46 : index
    %c0_54 = arith.constant 0 : index
    %241 = vector.load %arg2[%c46, %c0_54] : memref<135x256xf32, #tpu.memory_space<vmem>>, vector<1x256xf32>
    %242 = vector.broadcast %241 : vector<1x256xf32> to vector<8x256xf32>
    %243 = arith.mulf %240, %242 : vector<8x256xf32>
    %244 = arith.addf %239, %243 : vector<8x256xf32>
    %c37_i32_55 = arith.constant 37 : i32
    %245 = tpu.dynamic_rotate %1 by %c37_i32_55 dim 1 : vector<8x256xf32>, i32 -> vector<8x256xf32>
    %c47 = arith.constant 47 : index
    %c0_56 = arith.constant 0 : index
    %246 = vector.load %arg2[%c47, %c0_56] : memref<135x256xf32, #tpu.memory_space<vmem>>, vector<1x256xf32>
    %247 = vector.broadcast %246 : vector<1x256xf32> to vector<8x256xf32>
    %248 = arith.mulf %245, %247 : vector<8x256xf32>
    %249 = arith.addf %244, %248 : vector<8x256xf32>
    %c36_i32_57 = arith.constant 36 : i32
    %250 = tpu.dynamic_rotate %1 by %c36_i32_57 dim 1 : vector<8x256xf32>, i32 -> vector<8x256xf32>
    %c48 = arith.constant 48 : index
    %c0_58 = arith.constant 0 : index
    %251 = vector.load %arg2[%c48, %c0_58] : memref<135x256xf32, #tpu.memory_space<vmem>>, vector<1x256xf32>
    %252 = vector.broadcast %251 : vector<1x256xf32> to vector<8x256xf32>
    %253 = arith.mulf %250, %252 : vector<8x256xf32>
    %254 = arith.addf %249, %253 : vector<8x256xf32>
    %c35_i32_59 = arith.constant 35 : i32
    %255 = tpu.dynamic_rotate %1 by %c35_i32_59 dim 1 : vector<8x256xf32>, i32 -> vector<8x256xf32>
    %c49 = arith.constant 49 : index
    %c0_60 = arith.constant 0 : index
    %256 = vector.load %arg2[%c49, %c0_60] : memref<135x256xf32, #tpu.memory_space<vmem>>, vector<1x256xf32>
    %257 = vector.broadcast %256 : vector<1x256xf32> to vector<8x256xf32>
    %258 = arith.mulf %255, %257 : vector<8x256xf32>
    %259 = arith.addf %254, %258 : vector<8x256xf32>
    %c34_i32_61 = arith.constant 34 : i32
    %260 = tpu.dynamic_rotate %1 by %c34_i32_61 dim 1 : vector<8x256xf32>, i32 -> vector<8x256xf32>
    %c50 = arith.constant 50 : index
    %c0_62 = arith.constant 0 : index
    %261 = vector.load %arg2[%c50, %c0_62] : memref<135x256xf32, #tpu.memory_space<vmem>>, vector<1x256xf32>
    %262 = vector.broadcast %261 : vector<1x256xf32> to vector<8x256xf32>
    %263 = arith.mulf %260, %262 : vector<8x256xf32>
    %264 = arith.addf %259, %263 : vector<8x256xf32>
    %c33_i32_63 = arith.constant 33 : i32
    %265 = tpu.dynamic_rotate %1 by %c33_i32_63 dim 1 : vector<8x256xf32>, i32 -> vector<8x256xf32>
    %c51 = arith.constant 51 : index
    %c0_64 = arith.constant 0 : index
    %266 = vector.load %arg2[%c51, %c0_64] : memref<135x256xf32, #tpu.memory_space<vmem>>, vector<1x256xf32>
    %267 = vector.broadcast %266 : vector<1x256xf32> to vector<8x256xf32>
    %268 = arith.mulf %265, %267 : vector<8x256xf32>
    %269 = arith.addf %264, %268 : vector<8x256xf32>
    %c32_i32_65 = arith.constant 32 : i32
    %270 = tpu.dynamic_rotate %1 by %c32_i32_65 dim 1 : vector<8x256xf32>, i32 -> vector<8x256xf32>
    %c52 = arith.constant 52 : index
    %c0_66 = arith.constant 0 : index
    %271 = vector.load %arg2[%c52, %c0_66] : memref<135x256xf32, #tpu.memory_space<vmem>>, vector<1x256xf32>
    %272 = vector.broadcast %271 : vector<1x256xf32> to vector<8x256xf32>
    %273 = arith.mulf %270, %272 : vector<8x256xf32>
    %274 = arith.addf %269, %273 : vector<8x256xf32>
    %c31_i32_67 = arith.constant 31 : i32
    %275 = tpu.dynamic_rotate %1 by %c31_i32_67 dim 1 : vector<8x256xf32>, i32 -> vector<8x256xf32>
    %c53 = arith.constant 53 : index
    %c0_68 = arith.constant 0 : index
    %276 = vector.load %arg2[%c53, %c0_68] : memref<135x256xf32, #tpu.memory_space<vmem>>, vector<1x256xf32>
    %277 = vector.broadcast %276 : vector<1x256xf32> to vector<8x256xf32>
    %278 = arith.mulf %275, %277 : vector<8x256xf32>
    %279 = arith.addf %274, %278 : vector<8x256xf32>
    %c30_i32_69 = arith.constant 30 : i32
    %280 = tpu.dynamic_rotate %1 by %c30_i32_69 dim 1 : vector<8x256xf32>, i32 -> vector<8x256xf32>
    %c54 = arith.constant 54 : index
    %c0_70 = arith.constant 0 : index
    %281 = vector.load %arg2[%c54, %c0_70] : memref<135x256xf32, #tpu.memory_space<vmem>>, vector<1x256xf32>
    %282 = vector.broadcast %281 : vector<1x256xf32> to vector<8x256xf32>
    %283 = arith.mulf %280, %282 : vector<8x256xf32>
    %284 = arith.addf %279, %283 : vector<8x256xf32>
    %c29_i32_71 = arith.constant 29 : i32
    %285 = tpu.dynamic_rotate %1 by %c29_i32_71 dim 1 : vector<8x256xf32>, i32 -> vector<8x256xf32>
    %c55 = arith.constant 55 : index
    %c0_72 = arith.constant 0 : index
    %286 = vector.load %arg2[%c55, %c0_72] : memref<135x256xf32, #tpu.memory_space<vmem>>, vector<1x256xf32>
    %287 = vector.broadcast %286 : vector<1x256xf32> to vector<8x256xf32>
    %288 = arith.mulf %285, %287 : vector<8x256xf32>
    %289 = arith.addf %284, %288 : vector<8x256xf32>
    %c28_i32_73 = arith.constant 28 : i32
    %290 = tpu.dynamic_rotate %1 by %c28_i32_73 dim 1 : vector<8x256xf32>, i32 -> vector<8x256xf32>
    %c56 = arith.constant 56 : index
    %c0_74 = arith.constant 0 : index
    %291 = vector.load %arg2[%c56, %c0_74] : memref<135x256xf32, #tpu.memory_space<vmem>>, vector<1x256xf32>
    %292 = vector.broadcast %291 : vector<1x256xf32> to vector<8x256xf32>
    %293 = arith.mulf %290, %292 : vector<8x256xf32>
    %294 = arith.addf %289, %293 : vector<8x256xf32>
    %c27_i32_75 = arith.constant 27 : i32
    %295 = tpu.dynamic_rotate %1 by %c27_i32_75 dim 1 : vector<8x256xf32>, i32 -> vector<8x256xf32>
    %c57 = arith.constant 57 : index
    %c0_76 = arith.constant 0 : index
    %296 = vector.load %arg2[%c57, %c0_76] : memref<135x256xf32, #tpu.memory_space<vmem>>, vector<1x256xf32>
    %297 = vector.broadcast %296 : vector<1x256xf32> to vector<8x256xf32>
    %298 = arith.mulf %295, %297 : vector<8x256xf32>
    %299 = arith.addf %294, %298 : vector<8x256xf32>
    %c26_i32_77 = arith.constant 26 : i32
    %300 = tpu.dynamic_rotate %1 by %c26_i32_77 dim 1 : vector<8x256xf32>, i32 -> vector<8x256xf32>
    %c58 = arith.constant 58 : index
    %c0_78 = arith.constant 0 : index
    %301 = vector.load %arg2[%c58, %c0_78] : memref<135x256xf32, #tpu.memory_space<vmem>>, vector<1x256xf32>
    %302 = vector.broadcast %301 : vector<1x256xf32> to vector<8x256xf32>
    %303 = arith.mulf %300, %302 : vector<8x256xf32>
    %304 = arith.addf %299, %303 : vector<8x256xf32>
    %c25_i32_79 = arith.constant 25 : i32
    %305 = tpu.dynamic_rotate %1 by %c25_i32_79 dim 1 : vector<8x256xf32>, i32 -> vector<8x256xf32>
    %c59 = arith.constant 59 : index
    %c0_80 = arith.constant 0 : index
    %306 = vector.load %arg2[%c59, %c0_80] : memref<135x256xf32, #tpu.memory_space<vmem>>, vector<1x256xf32>
    %307 = vector.broadcast %306 : vector<1x256xf32> to vector<8x256xf32>
    %308 = arith.mulf %305, %307 : vector<8x256xf32>
    %309 = arith.addf %304, %308 : vector<8x256xf32>
    %c7_i32_81 = arith.constant 7 : i32
    %310 = tpu.dynamic_rotate %1 by %c7_i32_81 dim 1 : vector<8x256xf32>, i32 -> vector<8x256xf32>
    %c60 = arith.constant 60 : index
    %c0_82 = arith.constant 0 : index
    %311 = vector.load %arg2[%c60, %c0_82] : memref<135x256xf32, #tpu.memory_space<vmem>>, vector<1x256xf32>
    %312 = vector.broadcast %311 : vector<1x256xf32> to vector<8x256xf32>
    %313 = arith.mulf %310, %312 : vector<8x256xf32>
    %314 = arith.addf %309, %313 : vector<8x256xf32>
    %c6_i32_83 = arith.constant 6 : i32
    %315 = tpu.dynamic_rotate %1 by %c6_i32_83 dim 1 : vector<8x256xf32>, i32 -> vector<8x256xf32>
    %c61 = arith.constant 61 : index
    %c0_84 = arith.constant 0 : index
    %316 = vector.load %arg2[%c61, %c0_84] : memref<135x256xf32, #tpu.memory_space<vmem>>, vector<1x256xf32>
    %317 = vector.broadcast %316 : vector<1x256xf32> to vector<8x256xf32>
    %318 = arith.mulf %315, %317 : vector<8x256xf32>
    %319 = arith.addf %314, %318 : vector<8x256xf32>
    %c5_i32_85 = arith.constant 5 : i32
    %320 = tpu.dynamic_rotate %1 by %c5_i32_85 dim 1 : vector<8x256xf32>, i32 -> vector<8x256xf32>
    %c62 = arith.constant 62 : index
    %c0_86 = arith.constant 0 : index
    %321 = vector.load %arg2[%c62, %c0_86] : memref<135x256xf32, #tpu.memory_space<vmem>>, vector<1x256xf32>
    %322 = vector.broadcast %321 : vector<1x256xf32> to vector<8x256xf32>
    %323 = arith.mulf %320, %322 : vector<8x256xf32>
    %324 = arith.addf %319, %323 : vector<8x256xf32>
    %c4_i32_87 = arith.constant 4 : i32
    %325 = tpu.dynamic_rotate %1 by %c4_i32_87 dim 1 : vector<8x256xf32>, i32 -> vector<8x256xf32>
    %c63 = arith.constant 63 : index
    %c0_88 = arith.constant 0 : index
    %326 = vector.load %arg2[%c63, %c0_88] : memref<135x256xf32, #tpu.memory_space<vmem>>, vector<1x256xf32>
    %327 = vector.broadcast %326 : vector<1x256xf32> to vector<8x256xf32>
    %328 = arith.mulf %325, %327 : vector<8x256xf32>
    %329 = arith.addf %324, %328 : vector<8x256xf32>
    %c3_i32_89 = arith.constant 3 : i32
    %330 = tpu.dynamic_rotate %1 by %c3_i32_89 dim 1 : vector<8x256xf32>, i32 -> vector<8x256xf32>
    %c64 = arith.constant 64 : index
    %c0_90 = arith.constant 0 : index
    %331 = vector.load %arg2[%c64, %c0_90] : memref<135x256xf32, #tpu.memory_space<vmem>>, vector<1x256xf32>
    %332 = vector.broadcast %331 : vector<1x256xf32> to vector<8x256xf32>
    %333 = arith.mulf %330, %332 : vector<8x256xf32>
    %334 = arith.addf %329, %333 : vector<8x256xf32>
    %c2_i32_91 = arith.constant 2 : i32
    %335 = tpu.dynamic_rotate %1 by %c2_i32_91 dim 1 : vector<8x256xf32>, i32 -> vector<8x256xf32>
    %c65 = arith.constant 65 : index
    %c0_92 = arith.constant 0 : index
    %336 = vector.load %arg2[%c65, %c0_92] : memref<135x256xf32, #tpu.memory_space<vmem>>, vector<1x256xf32>
    %337 = vector.broadcast %336 : vector<1x256xf32> to vector<8x256xf32>
    %338 = arith.mulf %335, %337 : vector<8x256xf32>
    %339 = arith.addf %334, %338 : vector<8x256xf32>
    %c1_i32_93 = arith.constant 1 : i32
    %340 = tpu.dynamic_rotate %1 by %c1_i32_93 dim 1 : vector<8x256xf32>, i32 -> vector<8x256xf32>
    %c66 = arith.constant 66 : index
    %c0_94 = arith.constant 0 : index
    %341 = vector.load %arg2[%c66, %c0_94] : memref<135x256xf32, #tpu.memory_space<vmem>>, vector<1x256xf32>
    %342 = vector.broadcast %341 : vector<1x256xf32> to vector<8x256xf32>
    %343 = arith.mulf %340, %342 : vector<8x256xf32>
    %344 = arith.addf %339, %343 : vector<8x256xf32>
    %c67 = arith.constant 67 : index
    %c0_95 = arith.constant 0 : index
    %345 = vector.load %arg2[%c67, %c0_95] : memref<135x256xf32, #tpu.memory_space<vmem>>, vector<1x256xf32>
    %346 = vector.broadcast %345 : vector<1x256xf32> to vector<8x256xf32>
    %347 = arith.mulf %1, %346 : vector<8x256xf32>
    %348 = arith.addf %344, %347 : vector<8x256xf32>
    %c255_i32_96 = arith.constant 255 : i32
    %349 = tpu.dynamic_rotate %1 by %c255_i32_96 dim 1 : vector<8x256xf32>, i32 -> vector<8x256xf32>
    %c68 = arith.constant 68 : index
    %c0_97 = arith.constant 0 : index
    %350 = vector.load %arg2[%c68, %c0_97] : memref<135x256xf32, #tpu.memory_space<vmem>>, vector<1x256xf32>
    %351 = vector.broadcast %350 : vector<1x256xf32> to vector<8x256xf32>
    %352 = arith.mulf %349, %351 : vector<8x256xf32>
    %353 = arith.addf %348, %352 : vector<8x256xf32>
    %c254_i32_98 = arith.constant 254 : i32
    %354 = tpu.dynamic_rotate %1 by %c254_i32_98 dim 1 : vector<8x256xf32>, i32 -> vector<8x256xf32>
    %c69 = arith.constant 69 : index
    %c0_99 = arith.constant 0 : index
    %355 = vector.load %arg2[%c69, %c0_99] : memref<135x256xf32, #tpu.memory_space<vmem>>, vector<1x256xf32>
    %356 = vector.broadcast %355 : vector<1x256xf32> to vector<8x256xf32>
    %357 = arith.mulf %354, %356 : vector<8x256xf32>
    %358 = arith.addf %353, %357 : vector<8x256xf32>
    %c253_i32_100 = arith.constant 253 : i32
    %359 = tpu.dynamic_rotate %1 by %c253_i32_100 dim 1 : vector<8x256xf32>, i32 -> vector<8x256xf32>
    %c70 = arith.constant 70 : index
    %c0_101 = arith.constant 0 : index
    %360 = vector.load %arg2[%c70, %c0_101] : memref<135x256xf32, #tpu.memory_space<vmem>>, vector<1x256xf32>
    %361 = vector.broadcast %360 : vector<1x256xf32> to vector<8x256xf32>
    %362 = arith.mulf %359, %361 : vector<8x256xf32>
    %363 = arith.addf %358, %362 : vector<8x256xf32>
    %c252_i32_102 = arith.constant 252 : i32
    %364 = tpu.dynamic_rotate %1 by %c252_i32_102 dim 1 : vector<8x256xf32>, i32 -> vector<8x256xf32>
    %c71 = arith.constant 71 : index
    %c0_103 = arith.constant 0 : index
    %365 = vector.load %arg2[%c71, %c0_103] : memref<135x256xf32, #tpu.memory_space<vmem>>, vector<1x256xf32>
    %366 = vector.broadcast %365 : vector<1x256xf32> to vector<8x256xf32>
    %367 = arith.mulf %364, %366 : vector<8x256xf32>
    %368 = arith.addf %363, %367 : vector<8x256xf32>
    %c251_i32_104 = arith.constant 251 : i32
    %369 = tpu.dynamic_rotate %1 by %c251_i32_104 dim 1 : vector<8x256xf32>, i32 -> vector<8x256xf32>
    %c72 = arith.constant 72 : index
    %c0_105 = arith.constant 0 : index
    %370 = vector.load %arg2[%c72, %c0_105] : memref<135x256xf32, #tpu.memory_space<vmem>>, vector<1x256xf32>
    %371 = vector.broadcast %370 : vector<1x256xf32> to vector<8x256xf32>
    %372 = arith.mulf %369, %371 : vector<8x256xf32>
    %373 = arith.addf %368, %372 : vector<8x256xf32>
    %c250_i32_106 = arith.constant 250 : i32
    %374 = tpu.dynamic_rotate %1 by %c250_i32_106 dim 1 : vector<8x256xf32>, i32 -> vector<8x256xf32>
    %c73 = arith.constant 73 : index
    %c0_107 = arith.constant 0 : index
    %375 = vector.load %arg2[%c73, %c0_107] : memref<135x256xf32, #tpu.memory_space<vmem>>, vector<1x256xf32>
    %376 = vector.broadcast %375 : vector<1x256xf32> to vector<8x256xf32>
    %377 = arith.mulf %374, %376 : vector<8x256xf32>
    %378 = arith.addf %373, %377 : vector<8x256xf32>
    %c249_i32_108 = arith.constant 249 : i32
    %379 = tpu.dynamic_rotate %1 by %c249_i32_108 dim 1 : vector<8x256xf32>, i32 -> vector<8x256xf32>
    %c74 = arith.constant 74 : index
    %c0_109 = arith.constant 0 : index
    %380 = vector.load %arg2[%c74, %c0_109] : memref<135x256xf32, #tpu.memory_space<vmem>>, vector<1x256xf32>
    %381 = vector.broadcast %380 : vector<1x256xf32> to vector<8x256xf32>
    %382 = arith.mulf %379, %381 : vector<8x256xf32>
    %383 = arith.addf %378, %382 : vector<8x256xf32>
    %c231_i32_110 = arith.constant 231 : i32
    %384 = tpu.dynamic_rotate %1 by %c231_i32_110 dim 1 : vector<8x256xf32>, i32 -> vector<8x256xf32>
    %c75 = arith.constant 75 : index
    %c0_111 = arith.constant 0 : index
    %385 = vector.load %arg2[%c75, %c0_111] : memref<135x256xf32, #tpu.memory_space<vmem>>, vector<1x256xf32>
    %386 = vector.broadcast %385 : vector<1x256xf32> to vector<8x256xf32>
    %387 = arith.mulf %384, %386 : vector<8x256xf32>
    %388 = arith.addf %383, %387 : vector<8x256xf32>
    %c230_i32_112 = arith.constant 230 : i32
    %389 = tpu.dynamic_rotate %1 by %c230_i32_112 dim 1 : vector<8x256xf32>, i32 -> vector<8x256xf32>
    %c76 = arith.constant 76 : index
    %c0_113 = arith.constant 0 : index
    %390 = vector.load %arg2[%c76, %c0_113] : memref<135x256xf32, #tpu.memory_space<vmem>>, vector<1x256xf32>
    %391 = vector.broadcast %390 : vector<1x256xf32> to vector<8x256xf32>
    %392 = arith.mulf %389, %391 : vector<8x256xf32>
    %393 = arith.addf %388, %392 : vector<8x256xf32>
    %c229_i32_114 = arith.constant 229 : i32
    %394 = tpu.dynamic_rotate %1 by %c229_i32_114 dim 1 : vector<8x256xf32>, i32 -> vector<8x256xf32>
    %c77 = arith.constant 77 : index
    %c0_115 = arith.constant 0 : index
    %395 = vector.load %arg2[%c77, %c0_115] : memref<135x256xf32, #tpu.memory_space<vmem>>, vector<1x256xf32>
    %396 = vector.broadcast %395 : vector<1x256xf32> to vector<8x256xf32>
    %397 = arith.mulf %394, %396 : vector<8x256xf32>
    %398 = arith.addf %393, %397 : vector<8x256xf32>
    %c228_i32_116 = arith.constant 228 : i32
    %399 = tpu.dynamic_rotate %1 by %c228_i32_116 dim 1 : vector<8x256xf32>, i32 -> vector<8x256xf32>
    %c78 = arith.constant 78 : index
    %c0_117 = arith.constant 0 : index
    %400 = vector.load %arg2[%c78, %c0_117] : memref<135x256xf32, #tpu.memory_space<vmem>>, vector<1x256xf32>
    %401 = vector.broadcast %400 : vector<1x256xf32> to vector<8x256xf32>
    %402 = arith.mulf %399, %401 : vector<8x256xf32>
    %403 = arith.addf %398, %402 : vector<8x256xf32>
    %c227_i32_118 = arith.constant 227 : i32
    %404 = tpu.dynamic_rotate %1 by %c227_i32_118 dim 1 : vector<8x256xf32>, i32 -> vector<8x256xf32>
    %c79 = arith.constant 79 : index
    %c0_119 = arith.constant 0 : index
    %405 = vector.load %arg2[%c79, %c0_119] : memref<135x256xf32, #tpu.memory_space<vmem>>, vector<1x256xf32>
    %406 = vector.broadcast %405 : vector<1x256xf32> to vector<8x256xf32>
    %407 = arith.mulf %404, %406 : vector<8x256xf32>
    %408 = arith.addf %403, %407 : vector<8x256xf32>
    %c226_i32_120 = arith.constant 226 : i32
    %409 = tpu.dynamic_rotate %1 by %c226_i32_120 dim 1 : vector<8x256xf32>, i32 -> vector<8x256xf32>
    %c80 = arith.constant 80 : index
    %c0_121 = arith.constant 0 : index
    %410 = vector.load %arg2[%c80, %c0_121] : memref<135x256xf32, #tpu.memory_space<vmem>>, vector<1x256xf32>
    %411 = vector.broadcast %410 : vector<1x256xf32> to vector<8x256xf32>
    %412 = arith.mulf %409, %411 : vector<8x256xf32>
    %413 = arith.addf %408, %412 : vector<8x256xf32>
    %c225_i32_122 = arith.constant 225 : i32
    %414 = tpu.dynamic_rotate %1 by %c225_i32_122 dim 1 : vector<8x256xf32>, i32 -> vector<8x256xf32>
    %c81 = arith.constant 81 : index
    %c0_123 = arith.constant 0 : index
    %415 = vector.load %arg2[%c81, %c0_123] : memref<135x256xf32, #tpu.memory_space<vmem>>, vector<1x256xf32>
    %416 = vector.broadcast %415 : vector<1x256xf32> to vector<8x256xf32>
    %417 = arith.mulf %414, %416 : vector<8x256xf32>
    %418 = arith.addf %413, %417 : vector<8x256xf32>
    %c224_i32_124 = arith.constant 224 : i32
    %419 = tpu.dynamic_rotate %1 by %c224_i32_124 dim 1 : vector<8x256xf32>, i32 -> vector<8x256xf32>
    %c82 = arith.constant 82 : index
    %c0_125 = arith.constant 0 : index
    %420 = vector.load %arg2[%c82, %c0_125] : memref<135x256xf32, #tpu.memory_space<vmem>>, vector<1x256xf32>
    %421 = vector.broadcast %420 : vector<1x256xf32> to vector<8x256xf32>
    %422 = arith.mulf %419, %421 : vector<8x256xf32>
    %423 = arith.addf %418, %422 : vector<8x256xf32>
    %c223_i32_126 = arith.constant 223 : i32
    %424 = tpu.dynamic_rotate %1 by %c223_i32_126 dim 1 : vector<8x256xf32>, i32 -> vector<8x256xf32>
    %c83 = arith.constant 83 : index
    %c0_127 = arith.constant 0 : index
    %425 = vector.load %arg2[%c83, %c0_127] : memref<135x256xf32, #tpu.memory_space<vmem>>, vector<1x256xf32>
    %426 = vector.broadcast %425 : vector<1x256xf32> to vector<8x256xf32>
    %427 = arith.mulf %424, %426 : vector<8x256xf32>
    %428 = arith.addf %423, %427 : vector<8x256xf32>
    %c222_i32_128 = arith.constant 222 : i32
    %429 = tpu.dynamic_rotate %1 by %c222_i32_128 dim 1 : vector<8x256xf32>, i32 -> vector<8x256xf32>
    %c84 = arith.constant 84 : index
    %c0_129 = arith.constant 0 : index
    %430 = vector.load %arg2[%c84, %c0_129] : memref<135x256xf32, #tpu.memory_space<vmem>>, vector<1x256xf32>
    %431 = vector.broadcast %430 : vector<1x256xf32> to vector<8x256xf32>
    %432 = arith.mulf %429, %431 : vector<8x256xf32>
    %433 = arith.addf %428, %432 : vector<8x256xf32>
    %c221_i32_130 = arith.constant 221 : i32
    %434 = tpu.dynamic_rotate %1 by %c221_i32_130 dim 1 : vector<8x256xf32>, i32 -> vector<8x256xf32>
    %c85 = arith.constant 85 : index
    %c0_131 = arith.constant 0 : index
    %435 = vector.load %arg2[%c85, %c0_131] : memref<135x256xf32, #tpu.memory_space<vmem>>, vector<1x256xf32>
    %436 = vector.broadcast %435 : vector<1x256xf32> to vector<8x256xf32>
    %437 = arith.mulf %434, %436 : vector<8x256xf32>
    %438 = arith.addf %433, %437 : vector<8x256xf32>
    %c220_i32_132 = arith.constant 220 : i32
    %439 = tpu.dynamic_rotate %1 by %c220_i32_132 dim 1 : vector<8x256xf32>, i32 -> vector<8x256xf32>
    %c86 = arith.constant 86 : index
    %c0_133 = arith.constant 0 : index
    %440 = vector.load %arg2[%c86, %c0_133] : memref<135x256xf32, #tpu.memory_space<vmem>>, vector<1x256xf32>
    %441 = vector.broadcast %440 : vector<1x256xf32> to vector<8x256xf32>
    %442 = arith.mulf %439, %441 : vector<8x256xf32>
    %443 = arith.addf %438, %442 : vector<8x256xf32>
    %c219_i32_134 = arith.constant 219 : i32
    %444 = tpu.dynamic_rotate %1 by %c219_i32_134 dim 1 : vector<8x256xf32>, i32 -> vector<8x256xf32>
    %c87 = arith.constant 87 : index
    %c0_135 = arith.constant 0 : index
    %445 = vector.load %arg2[%c87, %c0_135] : memref<135x256xf32, #tpu.memory_space<vmem>>, vector<1x256xf32>
    %446 = vector.broadcast %445 : vector<1x256xf32> to vector<8x256xf32>
    %447 = arith.mulf %444, %446 : vector<8x256xf32>
    %448 = arith.addf %443, %447 : vector<8x256xf32>
    %c218_i32_136 = arith.constant 218 : i32
    %449 = tpu.dynamic_rotate %1 by %c218_i32_136 dim 1 : vector<8x256xf32>, i32 -> vector<8x256xf32>
    %c88 = arith.constant 88 : index
    %c0_137 = arith.constant 0 : index
    %450 = vector.load %arg2[%c88, %c0_137] : memref<135x256xf32, #tpu.memory_space<vmem>>, vector<1x256xf32>
    %451 = vector.broadcast %450 : vector<1x256xf32> to vector<8x256xf32>
    %452 = arith.mulf %449, %451 : vector<8x256xf32>
    %453 = arith.addf %448, %452 : vector<8x256xf32>
    %c217_i32_138 = arith.constant 217 : i32
    %454 = tpu.dynamic_rotate %1 by %c217_i32_138 dim 1 : vector<8x256xf32>, i32 -> vector<8x256xf32>
    %c89 = arith.constant 89 : index
    %c0_139 = arith.constant 0 : index
    %455 = vector.load %arg2[%c89, %c0_139] : memref<135x256xf32, #tpu.memory_space<vmem>>, vector<1x256xf32>
    %456 = vector.broadcast %455 : vector<1x256xf32> to vector<8x256xf32>
    %457 = arith.mulf %454, %456 : vector<8x256xf32>
    %458 = arith.addf %453, %457 : vector<8x256xf32>
    %459 = arith.addf %233, %458 : vector<8x256xf32>
    %cst_140 = arith.constant 0.000000e+00 : f32
    %460 = vector.broadcast %cst_140 : f32 to vector<8x256xf32>
    %c39_i32_141 = arith.constant 39 : i32
    %461 = tpu.dynamic_rotate %6 by %c39_i32_141 dim 1 : vector<8x256xf32>, i32 -> vector<8x256xf32>
    %c90 = arith.constant 90 : index
    %c0_142 = arith.constant 0 : index
    %462 = vector.load %arg2[%c90, %c0_142] : memref<135x256xf32, #tpu.memory_space<vmem>>, vector<1x256xf32>
    %463 = vector.broadcast %462 : vector<1x256xf32> to vector<8x256xf32>
    %464 = arith.mulf %461, %463 : vector<8x256xf32>
    %465 = arith.addf %460, %464 : vector<8x256xf32>
    %c38_i32_143 = arith.constant 38 : i32
    %466 = tpu.dynamic_rotate %6 by %c38_i32_143 dim 1 : vector<8x256xf32>, i32 -> vector<8x256xf32>
    %c91 = arith.constant 91 : index
    %c0_144 = arith.constant 0 : index
    %467 = vector.load %arg2[%c91, %c0_144] : memref<135x256xf32, #tpu.memory_space<vmem>>, vector<1x256xf32>
    %468 = vector.broadcast %467 : vector<1x256xf32> to vector<8x256xf32>
    %469 = arith.mulf %466, %468 : vector<8x256xf32>
    %470 = arith.addf %465, %469 : vector<8x256xf32>
    %c37_i32_145 = arith.constant 37 : i32
    %471 = tpu.dynamic_rotate %6 by %c37_i32_145 dim 1 : vector<8x256xf32>, i32 -> vector<8x256xf32>
    %c92 = arith.constant 92 : index
    %c0_146 = arith.constant 0 : index
    %472 = vector.load %arg2[%c92, %c0_146] : memref<135x256xf32, #tpu.memory_space<vmem>>, vector<1x256xf32>
    %473 = vector.broadcast %472 : vector<1x256xf32> to vector<8x256xf32>
    %474 = arith.mulf %471, %473 : vector<8x256xf32>
    %475 = arith.addf %470, %474 : vector<8x256xf32>
    %c36_i32_147 = arith.constant 36 : i32
    %476 = tpu.dynamic_rotate %6 by %c36_i32_147 dim 1 : vector<8x256xf32>, i32 -> vector<8x256xf32>
    %c93 = arith.constant 93 : index
    %c0_148 = arith.constant 0 : index
    %477 = vector.load %arg2[%c93, %c0_148] : memref<135x256xf32, #tpu.memory_space<vmem>>, vector<1x256xf32>
    %478 = vector.broadcast %477 : vector<1x256xf32> to vector<8x256xf32>
    %479 = arith.mulf %476, %478 : vector<8x256xf32>
    %480 = arith.addf %475, %479 : vector<8x256xf32>
    %c35_i32_149 = arith.constant 35 : i32
    %481 = tpu.dynamic_rotate %6 by %c35_i32_149 dim 1 : vector<8x256xf32>, i32 -> vector<8x256xf32>
    %c94 = arith.constant 94 : index
    %c0_150 = arith.constant 0 : index
    %482 = vector.load %arg2[%c94, %c0_150] : memref<135x256xf32, #tpu.memory_space<vmem>>, vector<1x256xf32>
    %483 = vector.broadcast %482 : vector<1x256xf32> to vector<8x256xf32>
    %484 = arith.mulf %481, %483 : vector<8x256xf32>
    %485 = arith.addf %480, %484 : vector<8x256xf32>
    %c34_i32_151 = arith.constant 34 : i32
    %486 = tpu.dynamic_rotate %6 by %c34_i32_151 dim 1 : vector<8x256xf32>, i32 -> vector<8x256xf32>
    %c95 = arith.constant 95 : index
    %c0_152 = arith.constant 0 : index
    %487 = vector.load %arg2[%c95, %c0_152] : memref<135x256xf32, #tpu.memory_space<vmem>>, vector<1x256xf32>
    %488 = vector.broadcast %487 : vector<1x256xf32> to vector<8x256xf32>
    %489 = arith.mulf %486, %488 : vector<8x256xf32>
    %490 = arith.addf %485, %489 : vector<8x256xf32>
    %c33_i32_153 = arith.constant 33 : i32
    %491 = tpu.dynamic_rotate %6 by %c33_i32_153 dim 1 : vector<8x256xf32>, i32 -> vector<8x256xf32>
    %c96 = arith.constant 96 : index
    %c0_154 = arith.constant 0 : index
    %492 = vector.load %arg2[%c96, %c0_154] : memref<135x256xf32, #tpu.memory_space<vmem>>, vector<1x256xf32>
    %493 = vector.broadcast %492 : vector<1x256xf32> to vector<8x256xf32>
    %494 = arith.mulf %491, %493 : vector<8x256xf32>
    %495 = arith.addf %490, %494 : vector<8x256xf32>
    %c32_i32_155 = arith.constant 32 : i32
    %496 = tpu.dynamic_rotate %6 by %c32_i32_155 dim 1 : vector<8x256xf32>, i32 -> vector<8x256xf32>
    %c97 = arith.constant 97 : index
    %c0_156 = arith.constant 0 : index
    %497 = vector.load %arg2[%c97, %c0_156] : memref<135x256xf32, #tpu.memory_space<vmem>>, vector<1x256xf32>
    %498 = vector.broadcast %497 : vector<1x256xf32> to vector<8x256xf32>
    %499 = arith.mulf %496, %498 : vector<8x256xf32>
    %500 = arith.addf %495, %499 : vector<8x256xf32>
    %c31_i32_157 = arith.constant 31 : i32
    %501 = tpu.dynamic_rotate %6 by %c31_i32_157 dim 1 : vector<8x256xf32>, i32 -> vector<8x256xf32>
    %c98 = arith.constant 98 : index
    %c0_158 = arith.constant 0 : index
    %502 = vector.load %arg2[%c98, %c0_158] : memref<135x256xf32, #tpu.memory_space<vmem>>, vector<1x256xf32>
    %503 = vector.broadcast %502 : vector<1x256xf32> to vector<8x256xf32>
    %504 = arith.mulf %501, %503 : vector<8x256xf32>
    %505 = arith.addf %500, %504 : vector<8x256xf32>
    %c30_i32_159 = arith.constant 30 : i32
    %506 = tpu.dynamic_rotate %6 by %c30_i32_159 dim 1 : vector<8x256xf32>, i32 -> vector<8x256xf32>
    %c99 = arith.constant 99 : index
    %c0_160 = arith.constant 0 : index
    %507 = vector.load %arg2[%c99, %c0_160] : memref<135x256xf32, #tpu.memory_space<vmem>>, vector<1x256xf32>
    %508 = vector.broadcast %507 : vector<1x256xf32> to vector<8x256xf32>
    %509 = arith.mulf %506, %508 : vector<8x256xf32>
    %510 = arith.addf %505, %509 : vector<8x256xf32>
    %c29_i32_161 = arith.constant 29 : i32
    %511 = tpu.dynamic_rotate %6 by %c29_i32_161 dim 1 : vector<8x256xf32>, i32 -> vector<8x256xf32>
    %c100 = arith.constant 100 : index
    %c0_162 = arith.constant 0 : index
    %512 = vector.load %arg2[%c100, %c0_162] : memref<135x256xf32, #tpu.memory_space<vmem>>, vector<1x256xf32>
    %513 = vector.broadcast %512 : vector<1x256xf32> to vector<8x256xf32>
    %514 = arith.mulf %511, %513 : vector<8x256xf32>
    %515 = arith.addf %510, %514 : vector<8x256xf32>
    %c28_i32_163 = arith.constant 28 : i32
    %516 = tpu.dynamic_rotate %6 by %c28_i32_163 dim 1 : vector<8x256xf32>, i32 -> vector<8x256xf32>
    %c101 = arith.constant 101 : index
    %c0_164 = arith.constant 0 : index
    %517 = vector.load %arg2[%c101, %c0_164] : memref<135x256xf32, #tpu.memory_space<vmem>>, vector<1x256xf32>
    %518 = vector.broadcast %517 : vector<1x256xf32> to vector<8x256xf32>
    %519 = arith.mulf %516, %518 : vector<8x256xf32>
    %520 = arith.addf %515, %519 : vector<8x256xf32>
    %c27_i32_165 = arith.constant 27 : i32
    %521 = tpu.dynamic_rotate %6 by %c27_i32_165 dim 1 : vector<8x256xf32>, i32 -> vector<8x256xf32>
    %c102 = arith.constant 102 : index
    %c0_166 = arith.constant 0 : index
    %522 = vector.load %arg2[%c102, %c0_166] : memref<135x256xf32, #tpu.memory_space<vmem>>, vector<1x256xf32>
    %523 = vector.broadcast %522 : vector<1x256xf32> to vector<8x256xf32>
    %524 = arith.mulf %521, %523 : vector<8x256xf32>
    %525 = arith.addf %520, %524 : vector<8x256xf32>
    %c26_i32_167 = arith.constant 26 : i32
    %526 = tpu.dynamic_rotate %6 by %c26_i32_167 dim 1 : vector<8x256xf32>, i32 -> vector<8x256xf32>
    %c103 = arith.constant 103 : index
    %c0_168 = arith.constant 0 : index
    %527 = vector.load %arg2[%c103, %c0_168] : memref<135x256xf32, #tpu.memory_space<vmem>>, vector<1x256xf32>
    %528 = vector.broadcast %527 : vector<1x256xf32> to vector<8x256xf32>
    %529 = arith.mulf %526, %528 : vector<8x256xf32>
    %530 = arith.addf %525, %529 : vector<8x256xf32>
    %c25_i32_169 = arith.constant 25 : i32
    %531 = tpu.dynamic_rotate %6 by %c25_i32_169 dim 1 : vector<8x256xf32>, i32 -> vector<8x256xf32>
    %c104 = arith.constant 104 : index
    %c0_170 = arith.constant 0 : index
    %532 = vector.load %arg2[%c104, %c0_170] : memref<135x256xf32, #tpu.memory_space<vmem>>, vector<1x256xf32>
    %533 = vector.broadcast %532 : vector<1x256xf32> to vector<8x256xf32>
    %534 = arith.mulf %531, %533 : vector<8x256xf32>
    %535 = arith.addf %530, %534 : vector<8x256xf32>
    %c7_i32_171 = arith.constant 7 : i32
    %536 = tpu.dynamic_rotate %6 by %c7_i32_171 dim 1 : vector<8x256xf32>, i32 -> vector<8x256xf32>
    %c105 = arith.constant 105 : index
    %c0_172 = arith.constant 0 : index
    %537 = vector.load %arg2[%c105, %c0_172] : memref<135x256xf32, #tpu.memory_space<vmem>>, vector<1x256xf32>
    %538 = vector.broadcast %537 : vector<1x256xf32> to vector<8x256xf32>
    %539 = arith.mulf %536, %538 : vector<8x256xf32>
    %540 = arith.addf %535, %539 : vector<8x256xf32>
    %c6_i32_173 = arith.constant 6 : i32
    %541 = tpu.dynamic_rotate %6 by %c6_i32_173 dim 1 : vector<8x256xf32>, i32 -> vector<8x256xf32>
    %c106 = arith.constant 106 : index
    %c0_174 = arith.constant 0 : index
    %542 = vector.load %arg2[%c106, %c0_174] : memref<135x256xf32, #tpu.memory_space<vmem>>, vector<1x256xf32>
    %543 = vector.broadcast %542 : vector<1x256xf32> to vector<8x256xf32>
    %544 = arith.mulf %541, %543 : vector<8x256xf32>
    %545 = arith.addf %540, %544 : vector<8x256xf32>
    %c5_i32_175 = arith.constant 5 : i32
    %546 = tpu.dynamic_rotate %6 by %c5_i32_175 dim 1 : vector<8x256xf32>, i32 -> vector<8x256xf32>
    %c107 = arith.constant 107 : index
    %c0_176 = arith.constant 0 : index
    %547 = vector.load %arg2[%c107, %c0_176] : memref<135x256xf32, #tpu.memory_space<vmem>>, vector<1x256xf32>
    %548 = vector.broadcast %547 : vector<1x256xf32> to vector<8x256xf32>
    %549 = arith.mulf %546, %548 : vector<8x256xf32>
    %550 = arith.addf %545, %549 : vector<8x256xf32>
    %c4_i32_177 = arith.constant 4 : i32
    %551 = tpu.dynamic_rotate %6 by %c4_i32_177 dim 1 : vector<8x256xf32>, i32 -> vector<8x256xf32>
    %c108 = arith.constant 108 : index
    %c0_178 = arith.constant 0 : index
    %552 = vector.load %arg2[%c108, %c0_178] : memref<135x256xf32, #tpu.memory_space<vmem>>, vector<1x256xf32>
    %553 = vector.broadcast %552 : vector<1x256xf32> to vector<8x256xf32>
    %554 = arith.mulf %551, %553 : vector<8x256xf32>
    %555 = arith.addf %550, %554 : vector<8x256xf32>
    %c3_i32_179 = arith.constant 3 : i32
    %556 = tpu.dynamic_rotate %6 by %c3_i32_179 dim 1 : vector<8x256xf32>, i32 -> vector<8x256xf32>
    %c109 = arith.constant 109 : index
    %c0_180 = arith.constant 0 : index
    %557 = vector.load %arg2[%c109, %c0_180] : memref<135x256xf32, #tpu.memory_space<vmem>>, vector<1x256xf32>
    %558 = vector.broadcast %557 : vector<1x256xf32> to vector<8x256xf32>
    %559 = arith.mulf %556, %558 : vector<8x256xf32>
    %560 = arith.addf %555, %559 : vector<8x256xf32>
    %c2_i32_181 = arith.constant 2 : i32
    %561 = tpu.dynamic_rotate %6 by %c2_i32_181 dim 1 : vector<8x256xf32>, i32 -> vector<8x256xf32>
    %c110 = arith.constant 110 : index
    %c0_182 = arith.constant 0 : index
    %562 = vector.load %arg2[%c110, %c0_182] : memref<135x256xf32, #tpu.memory_space<vmem>>, vector<1x256xf32>
    %563 = vector.broadcast %562 : vector<1x256xf32> to vector<8x256xf32>
    %564 = arith.mulf %561, %563 : vector<8x256xf32>
    %565 = arith.addf %560, %564 : vector<8x256xf32>
    %c1_i32_183 = arith.constant 1 : i32
    %566 = tpu.dynamic_rotate %6 by %c1_i32_183 dim 1 : vector<8x256xf32>, i32 -> vector<8x256xf32>
    %c111 = arith.constant 111 : index
    %c0_184 = arith.constant 0 : index
    %567 = vector.load %arg2[%c111, %c0_184] : memref<135x256xf32, #tpu.memory_space<vmem>>, vector<1x256xf32>
    %568 = vector.broadcast %567 : vector<1x256xf32> to vector<8x256xf32>
    %569 = arith.mulf %566, %568 : vector<8x256xf32>
    %570 = arith.addf %565, %569 : vector<8x256xf32>
    %c112 = arith.constant 112 : index
    %c0_185 = arith.constant 0 : index
    %571 = vector.load %arg2[%c112, %c0_185] : memref<135x256xf32, #tpu.memory_space<vmem>>, vector<1x256xf32>
    %572 = vector.broadcast %571 : vector<1x256xf32> to vector<8x256xf32>
    %573 = arith.mulf %6, %572 : vector<8x256xf32>
    %574 = arith.addf %570, %573 : vector<8x256xf32>
    %c255_i32_186 = arith.constant 255 : i32
    %575 = tpu.dynamic_rotate %6 by %c255_i32_186 dim 1 : vector<8x256xf32>, i32 -> vector<8x256xf32>
    %c113 = arith.constant 113 : index
    %c0_187 = arith.constant 0 : index
    %576 = vector.load %arg2[%c113, %c0_187] : memref<135x256xf32, #tpu.memory_space<vmem>>, vector<1x256xf32>
    %577 = vector.broadcast %576 : vector<1x256xf32> to vector<8x256xf32>
    %578 = arith.mulf %575, %577 : vector<8x256xf32>
    %579 = arith.addf %574, %578 : vector<8x256xf32>
    %c254_i32_188 = arith.constant 254 : i32
    %580 = tpu.dynamic_rotate %6 by %c254_i32_188 dim 1 : vector<8x256xf32>, i32 -> vector<8x256xf32>
    %c114 = arith.constant 114 : index
    %c0_189 = arith.constant 0 : index
    %581 = vector.load %arg2[%c114, %c0_189] : memref<135x256xf32, #tpu.memory_space<vmem>>, vector<1x256xf32>
    %582 = vector.broadcast %581 : vector<1x256xf32> to vector<8x256xf32>
    %583 = arith.mulf %580, %582 : vector<8x256xf32>
    %584 = arith.addf %579, %583 : vector<8x256xf32>
    %c253_i32_190 = arith.constant 253 : i32
    %585 = tpu.dynamic_rotate %6 by %c253_i32_190 dim 1 : vector<8x256xf32>, i32 -> vector<8x256xf32>
    %c115 = arith.constant 115 : index
    %c0_191 = arith.constant 0 : index
    %586 = vector.load %arg2[%c115, %c0_191] : memref<135x256xf32, #tpu.memory_space<vmem>>, vector<1x256xf32>
    %587 = vector.broadcast %586 : vector<1x256xf32> to vector<8x256xf32>
    %588 = arith.mulf %585, %587 : vector<8x256xf32>
    %589 = arith.addf %584, %588 : vector<8x256xf32>
    %c252_i32_192 = arith.constant 252 : i32
    %590 = tpu.dynamic_rotate %6 by %c252_i32_192 dim 1 : vector<8x256xf32>, i32 -> vector<8x256xf32>
    %c116 = arith.constant 116 : index
    %c0_193 = arith.constant 0 : index
    %591 = vector.load %arg2[%c116, %c0_193] : memref<135x256xf32, #tpu.memory_space<vmem>>, vector<1x256xf32>
    %592 = vector.broadcast %591 : vector<1x256xf32> to vector<8x256xf32>
    %593 = arith.mulf %590, %592 : vector<8x256xf32>
    %594 = arith.addf %589, %593 : vector<8x256xf32>
    %c251_i32_194 = arith.constant 251 : i32
    %595 = tpu.dynamic_rotate %6 by %c251_i32_194 dim 1 : vector<8x256xf32>, i32 -> vector<8x256xf32>
    %c117 = arith.constant 117 : index
    %c0_195 = arith.constant 0 : index
    %596 = vector.load %arg2[%c117, %c0_195] : memref<135x256xf32, #tpu.memory_space<vmem>>, vector<1x256xf32>
    %597 = vector.broadcast %596 : vector<1x256xf32> to vector<8x256xf32>
    %598 = arith.mulf %595, %597 : vector<8x256xf32>
    %599 = arith.addf %594, %598 : vector<8x256xf32>
    %c250_i32_196 = arith.constant 250 : i32
    %600 = tpu.dynamic_rotate %6 by %c250_i32_196 dim 1 : vector<8x256xf32>, i32 -> vector<8x256xf32>
    %c118 = arith.constant 118 : index
    %c0_197 = arith.constant 0 : index
    %601 = vector.load %arg2[%c118, %c0_197] : memref<135x256xf32, #tpu.memory_space<vmem>>, vector<1x256xf32>
    %602 = vector.broadcast %601 : vector<1x256xf32> to vector<8x256xf32>
    %603 = arith.mulf %600, %602 : vector<8x256xf32>
    %604 = arith.addf %599, %603 : vector<8x256xf32>
    %c249_i32_198 = arith.constant 249 : i32
    %605 = tpu.dynamic_rotate %6 by %c249_i32_198 dim 1 : vector<8x256xf32>, i32 -> vector<8x256xf32>
    %c119 = arith.constant 119 : index
    %c0_199 = arith.constant 0 : index
    %606 = vector.load %arg2[%c119, %c0_199] : memref<135x256xf32, #tpu.memory_space<vmem>>, vector<1x256xf32>
    %607 = vector.broadcast %606 : vector<1x256xf32> to vector<8x256xf32>
    %608 = arith.mulf %605, %607 : vector<8x256xf32>
    %609 = arith.addf %604, %608 : vector<8x256xf32>
    %c231_i32_200 = arith.constant 231 : i32
    %610 = tpu.dynamic_rotate %6 by %c231_i32_200 dim 1 : vector<8x256xf32>, i32 -> vector<8x256xf32>
    %c120 = arith.constant 120 : index
    %c0_201 = arith.constant 0 : index
    %611 = vector.load %arg2[%c120, %c0_201] : memref<135x256xf32, #tpu.memory_space<vmem>>, vector<1x256xf32>
    %612 = vector.broadcast %611 : vector<1x256xf32> to vector<8x256xf32>
    %613 = arith.mulf %610, %612 : vector<8x256xf32>
    %614 = arith.addf %609, %613 : vector<8x256xf32>
    %c230_i32_202 = arith.constant 230 : i32
    %615 = tpu.dynamic_rotate %6 by %c230_i32_202 dim 1 : vector<8x256xf32>, i32 -> vector<8x256xf32>
    %c121 = arith.constant 121 : index
    %c0_203 = arith.constant 0 : index
    %616 = vector.load %arg2[%c121, %c0_203] : memref<135x256xf32, #tpu.memory_space<vmem>>, vector<1x256xf32>
    %617 = vector.broadcast %616 : vector<1x256xf32> to vector<8x256xf32>
    %618 = arith.mulf %615, %617 : vector<8x256xf32>
    %619 = arith.addf %614, %618 : vector<8x256xf32>
    %c229_i32_204 = arith.constant 229 : i32
    %620 = tpu.dynamic_rotate %6 by %c229_i32_204 dim 1 : vector<8x256xf32>, i32 -> vector<8x256xf32>
    %c122 = arith.constant 122 : index
    %c0_205 = arith.constant 0 : index
    %621 = vector.load %arg2[%c122, %c0_205] : memref<135x256xf32, #tpu.memory_space<vmem>>, vector<1x256xf32>
    %622 = vector.broadcast %621 : vector<1x256xf32> to vector<8x256xf32>
    %623 = arith.mulf %620, %622 : vector<8x256xf32>
    %624 = arith.addf %619, %623 : vector<8x256xf32>
    %c228_i32_206 = arith.constant 228 : i32
    %625 = tpu.dynamic_rotate %6 by %c228_i32_206 dim 1 : vector<8x256xf32>, i32 -> vector<8x256xf32>
    %c123 = arith.constant 123 : index
    %c0_207 = arith.constant 0 : index
    %626 = vector.load %arg2[%c123, %c0_207] : memref<135x256xf32, #tpu.memory_space<vmem>>, vector<1x256xf32>
    %627 = vector.broadcast %626 : vector<1x256xf32> to vector<8x256xf32>
    %628 = arith.mulf %625, %627 : vector<8x256xf32>
    %629 = arith.addf %624, %628 : vector<8x256xf32>
    %c227_i32_208 = arith.constant 227 : i32
    %630 = tpu.dynamic_rotate %6 by %c227_i32_208 dim 1 : vector<8x256xf32>, i32 -> vector<8x256xf32>
    %c124 = arith.constant 124 : index
    %c0_209 = arith.constant 0 : index
    %631 = vector.load %arg2[%c124, %c0_209] : memref<135x256xf32, #tpu.memory_space<vmem>>, vector<1x256xf32>
    %632 = vector.broadcast %631 : vector<1x256xf32> to vector<8x256xf32>
    %633 = arith.mulf %630, %632 : vector<8x256xf32>
    %634 = arith.addf %629, %633 : vector<8x256xf32>
    %c226_i32_210 = arith.constant 226 : i32
    %635 = tpu.dynamic_rotate %6 by %c226_i32_210 dim 1 : vector<8x256xf32>, i32 -> vector<8x256xf32>
    %c125 = arith.constant 125 : index
    %c0_211 = arith.constant 0 : index
    %636 = vector.load %arg2[%c125, %c0_211] : memref<135x256xf32, #tpu.memory_space<vmem>>, vector<1x256xf32>
    %637 = vector.broadcast %636 : vector<1x256xf32> to vector<8x256xf32>
    %638 = arith.mulf %635, %637 : vector<8x256xf32>
    %639 = arith.addf %634, %638 : vector<8x256xf32>
    %c225_i32_212 = arith.constant 225 : i32
    %640 = tpu.dynamic_rotate %6 by %c225_i32_212 dim 1 : vector<8x256xf32>, i32 -> vector<8x256xf32>
    %c126 = arith.constant 126 : index
    %c0_213 = arith.constant 0 : index
    %641 = vector.load %arg2[%c126, %c0_213] : memref<135x256xf32, #tpu.memory_space<vmem>>, vector<1x256xf32>
    %642 = vector.broadcast %641 : vector<1x256xf32> to vector<8x256xf32>
    %643 = arith.mulf %640, %642 : vector<8x256xf32>
    %644 = arith.addf %639, %643 : vector<8x256xf32>
    %c224_i32_214 = arith.constant 224 : i32
    %645 = tpu.dynamic_rotate %6 by %c224_i32_214 dim 1 : vector<8x256xf32>, i32 -> vector<8x256xf32>
    %c127 = arith.constant 127 : index
    %c0_215 = arith.constant 0 : index
    %646 = vector.load %arg2[%c127, %c0_215] : memref<135x256xf32, #tpu.memory_space<vmem>>, vector<1x256xf32>
    %647 = vector.broadcast %646 : vector<1x256xf32> to vector<8x256xf32>
    %648 = arith.mulf %645, %647 : vector<8x256xf32>
    %649 = arith.addf %644, %648 : vector<8x256xf32>
    %c223_i32_216 = arith.constant 223 : i32
    %650 = tpu.dynamic_rotate %6 by %c223_i32_216 dim 1 : vector<8x256xf32>, i32 -> vector<8x256xf32>
    %c128 = arith.constant 128 : index
    %c0_217 = arith.constant 0 : index
    %651 = vector.load %arg2[%c128, %c0_217] : memref<135x256xf32, #tpu.memory_space<vmem>>, vector<1x256xf32>
    %652 = vector.broadcast %651 : vector<1x256xf32> to vector<8x256xf32>
    %653 = arith.mulf %650, %652 : vector<8x256xf32>
    %654 = arith.addf %649, %653 : vector<8x256xf32>
    %c222_i32_218 = arith.constant 222 : i32
    %655 = tpu.dynamic_rotate %6 by %c222_i32_218 dim 1 : vector<8x256xf32>, i32 -> vector<8x256xf32>
    %c129 = arith.constant 129 : index
    %c0_219 = arith.constant 0 : index
    %656 = vector.load %arg2[%c129, %c0_219] : memref<135x256xf32, #tpu.memory_space<vmem>>, vector<1x256xf32>
    %657 = vector.broadcast %656 : vector<1x256xf32> to vector<8x256xf32>
    %658 = arith.mulf %655, %657 : vector<8x256xf32>
    %659 = arith.addf %654, %658 : vector<8x256xf32>
    %c221_i32_220 = arith.constant 221 : i32
    %660 = tpu.dynamic_rotate %6 by %c221_i32_220 dim 1 : vector<8x256xf32>, i32 -> vector<8x256xf32>
    %c130 = arith.constant 130 : index
    %c0_221 = arith.constant 0 : index
    %661 = vector.load %arg2[%c130, %c0_221] : memref<135x256xf32, #tpu.memory_space<vmem>>, vector<1x256xf32>
    %662 = vector.broadcast %661 : vector<1x256xf32> to vector<8x256xf32>
    %663 = arith.mulf %660, %662 : vector<8x256xf32>
    %664 = arith.addf %659, %663 : vector<8x256xf32>
    %c220_i32_222 = arith.constant 220 : i32
    %665 = tpu.dynamic_rotate %6 by %c220_i32_222 dim 1 : vector<8x256xf32>, i32 -> vector<8x256xf32>
    %c131 = arith.constant 131 : index
    %c0_223 = arith.constant 0 : index
    %666 = vector.load %arg2[%c131, %c0_223] : memref<135x256xf32, #tpu.memory_space<vmem>>, vector<1x256xf32>
    %667 = vector.broadcast %666 : vector<1x256xf32> to vector<8x256xf32>
    %668 = arith.mulf %665, %667 : vector<8x256xf32>
    %669 = arith.addf %664, %668 : vector<8x256xf32>
    %c219_i32_224 = arith.constant 219 : i32
    %670 = tpu.dynamic_rotate %6 by %c219_i32_224 dim 1 : vector<8x256xf32>, i32 -> vector<8x256xf32>
    %c132 = arith.constant 132 : index
    %c0_225 = arith.constant 0 : index
    %671 = vector.load %arg2[%c132, %c0_225] : memref<135x256xf32, #tpu.memory_space<vmem>>, vector<1x256xf32>
    %672 = vector.broadcast %671 : vector<1x256xf32> to vector<8x256xf32>
    %673 = arith.mulf %670, %672 : vector<8x256xf32>
    %674 = arith.addf %669, %673 : vector<8x256xf32>
    %c218_i32_226 = arith.constant 218 : i32
    %675 = tpu.dynamic_rotate %6 by %c218_i32_226 dim 1 : vector<8x256xf32>, i32 -> vector<8x256xf32>
    %c133 = arith.constant 133 : index
    %c0_227 = arith.constant 0 : index
    %676 = vector.load %arg2[%c133, %c0_227] : memref<135x256xf32, #tpu.memory_space<vmem>>, vector<1x256xf32>
    %677 = vector.broadcast %676 : vector<1x256xf32> to vector<8x256xf32>
    %678 = arith.mulf %675, %677 : vector<8x256xf32>
    %679 = arith.addf %674, %678 : vector<8x256xf32>
    %c217_i32_228 = arith.constant 217 : i32
    %680 = tpu.dynamic_rotate %6 by %c217_i32_228 dim 1 : vector<8x256xf32>, i32 -> vector<8x256xf32>
    %c134 = arith.constant 134 : index
    %c0_229 = arith.constant 0 : index
    %681 = vector.load %arg2[%c134, %c0_229] : memref<135x256xf32, #tpu.memory_space<vmem>>, vector<1x256xf32>
    %682 = vector.broadcast %681 : vector<1x256xf32> to vector<8x256xf32>
    %683 = arith.mulf %680, %682 : vector<8x256xf32>
    %684 = arith.addf %679, %683 : vector<8x256xf32>
    %685 = arith.addf %459, %684 : vector<8x256xf32>
    %c0_230 = arith.constant 0 : index
    %c0_231 = arith.constant 0 : index
    %686 = vector.load %arg3[%c0_230, %c0_231] : memref<1x256xf32, #tpu.memory_space<vmem>>, vector<1x256xf32>
    %687 = vector.broadcast %686 : vector<1x256xf32> to vector<8x256xf32>
    %688 = arith.addf %685, %687 : vector<8x256xf32>
    %cst_232 = arith.constant 0.000000e+00 : f32
    %689 = vector.broadcast %cst_232 : f32 to vector<8x256xf32>
    %690 = arith.cmpf oge, %688, %689 : vector<8x256xf32>
    %cst_233 = arith.constant 0.00999999977 : f32
    %691 = vector.broadcast %cst_233 : f32 to vector<8x256xf32>
    %692 = arith.mulf %691, %688 : vector<8x256xf32>
    %693 = arith.select %690, %688, %692 : vector<8x256xi1>, vector<8x256xf32>
    %c0_234 = arith.constant 0 : index
    %c0_235 = arith.constant 0 : index
    %c0_236 = arith.constant 0 : index
    %694 = vector.load %arg4[%c0_234, %c0_235, %c0_236] : memref<1x8x256xf32, #tpu.memory_space<vmem>>, vector<1x8x256xf32>
    %695 = vector.shape_cast %694 : vector<1x8x256xf32> to vector<8x256xf32>
    %696 = vector.shape_cast %693 : vector<8x256xf32> to vector<1x8x256xf32>
    tpu.vector_store %arg4[%c0_234, %c0_235, %c0_236], %696 {strides = array<i32>} : memref<1x8x256xf32, #tpu.memory_space<vmem>>, vector<1x8x256xf32>,
    return
  }
  func.func @transform_0(%arg0: i32) -> (i32, i32, i32) {
    %c0_i32 = arith.constant 0 : i32
    %c0_i32_0 = arith.constant 0 : i32
    %c0_i32_1 = arith.constant 0 : i32
    return %arg0, %c0_i32, %c0_i32_0 : i32, i32, i32
  }
  func.func @transform_1(%arg0: i32) -> (i32, i32) {
    %c0_i32 = arith.constant 0 : i32
    %c0_i32_0 = arith.constant 0 : i32
    %c0_i32_1 = arith.constant 0 : i32
    return %c0_i32, %c0_i32_0 : i32, i32
  }
  func.func @transform_2(%arg0: i32) -> (i32, i32) {
    %c0_i32 = arith.constant 0 : i32
    %c0_i32_0 = arith.constant 0 : i32
    %c0_i32_1 = arith.constant 0 : i32
    return %c0_i32, %c0_i32_0 : i32, i32
  }
  func.func @transform_3(%arg0: i32) -> (i32, i32, i32) {
    %c0_i32 = arith.constant 0 : i32
    %c0_i32_0 = arith.constant 0 : i32
    %c0_i32_1 = arith.constant 0 : i32
    return %arg0, %c0_i32, %c0_i32_0 : i32, i32, i32
  }
}

</mosaic_0001>

<bundles_post_ra>
// kernel: fwd.1
= control target key start
LH: loop header
LB: loop body
LE: loop exit
PB: predicated region body
PF: predicated region fallthrough
CT: control target
= control target key end

     0   :  { %s3677_s12 = smov 0   ;;  %s6645_s0 = inlined_call_operand.vmem [shape: f32[2,8,256], index: 0, kind: input, shape index: {}]   ;;  %s6646_s1 = inlined_call_operand.vmem [shape: f32[135,256], index: 1, kind: input, shape index: {}]   ;;  %s6647_s2 = inlined_call_operand.vmem [shape: f32[1,256], index: 2, kind: input, shape index: {}]   ;;  %s6648_s3 = inlined_call_operand.vmem [shape: f32[2,8,256], index: 3, kind: output, shape index: {}]  }
   0x1   :  { %6875 = sst [smem:[#allocation102_spill]] %s6645_s0 }
   0x2   :  { %6876 = sst [smem:[#allocation103_spill]] %s6648_s3 }
   0x3 LB: > { %6877 = sst [smem:[#allocation2_spill]] %s3611_s12  ;;  %s3404_s13 = sadd.s32 4294967295, %s3611_s12   ;;  %s3611_s12 = sphi %s3677_s12, %s13_s12  }
   0x4   : > { %p3408_p0 = scmp.ge.s32.totalorder %s3611_s12, 1  ;;  %p137_p1 = scmp.lt.s32.totalorder %s3611_s12, 3 }
   0x6   : > { %p138_p2 = pnand %p3408_p0, %p137_p1 }
   0x8   : > { %141 = sbr.rel (%p138_p2) target bundleno = 682 (0x2aa), region = 32 }
   0xd   : > { %p161_p3 = scmp.lt.s32.totalorder %s3404_s13, 1  ;;  %s6878_s0 = sld [smem:[#allocation102_spill]]  ;;  %vm179_vm0 = vcmask 1040384   ;;  %vm186_vm1 = vcmask 1046528  }
   0xe   : > { %s6780_s18 = smov 38   ;;  %s3614_s19 = smov 39  }
   0xf   : > { %s7275_s13 = smov (!%p161_p3, %s3404_s13), 1  ;;  %s6776_s20 = smov 37  }
  0x10   : > { %s6649_s14 = sshll.u32 %s7275_s13, 4  ;;  %s6772_s21 = smov 36  }
  0x11   : > { %s6768_s22 = smov 35   ;;  %s6764_s23 = smov 34  }
  0x12   : > { %s6760_s24 = smov 33   ;;  %s6756_s25 = smov 32  }
  0x13   : > { %s3693_s17 = scalar_lea.vmem %s6878_s0, %s6649_s14  ;;  %s6752_s26 = smov 31  }
  0x14   : > { %v3696_v0 = vld [vmem:[%s3693_s17] sm:$0xff]  ;;  %v3699_v1 = vld [vmem:[%s3693_s17 + $0x8] sm:$0xff]  ;;  %s6748_s27 = smov 30   ;;  %s6744_s28 = smov 29  }
  0x15   : > { %v175_v2 = vrot.slane %v3696_v0, 7  ;;  %v176_v3 = vrot.slane %v3699_v1, 7  ;;  %s6740_s29 = smov 28   ;;  %s6732_s30 = smov 27  }
  0x16   : > { %s6728_s4 = smov 26   ;;  %s6722_s5 = smov 25  }
  0x17   : > { %v3703_v4 = vsel %vm179_vm0, 0.0, %v175_v2  ;;  %v3709_v5 = vsel %vm179_vm0, 0.0, %v176_v3  ;;  %s6718_s6 = smov 7   ;;  %s6714_s7 = smov 6  }
  0x18   : > { %6879 = vst [vmem:[#allocation3_spill] sm:$0xff] %v3703_v4  ;;  %214 = vrot.lane.b32.xlu1 %v3703_v4, %s6780_s18  ;;  %189 = vrot.lane.b32.xlu0 %v3703_v4, %s3614_s19  ;;  %6880 = vst [vmem:[#allocation4_spill] sm:$0xff] %v3709_v5  ;;  %s6702_s8 = smov 5   ;;  %s6706_s9 = smov 4  }
  0x19   : > { %s6710_s10 = smov 3   ;;  %s6650_s11 = smov 2  }
  0x1a   : > { %s6652_s15 = smov 1   ;;  %s6654_s16 = smov 127  }
  0x1b   : > { %s6656_s14 = smov 126   ;;  %s6990_s3 = smov 38  }
  0x1c   : > { %216 = vrot.lane.b32.xlu1 %v3709_v5, %s6780_s18  ;;  %191 = vrot.lane.b32.xlu0 %v3709_v5, %s3614_s19  ;;  %s7000_s12 = smov 36   ;;  %s7002_s0 = smov 34  }
  0x20   : > { %240 = vrot.lane.b32.xlu1 %v3709_v5, %s6776_s20  ;;  %238 = vrot.lane.b32.xlu0 %v3703_v4, %s6776_s20 }
  0x24   : > { %264 = vrot.lane.b32.xlu1 %v3709_v5, %s6772_s21  ;;  %262 = vrot.lane.b32.xlu0 %v3703_v4, %s6772_s21 }
  0x28   : > { %288 = vrot.lane.b32.xlu1 %v3709_v5, %s6768_s22  ;;  %286 = vrot.lane.b32.xlu0 %v3703_v4, %s6768_s22 }
  0x2c   : > { %312 = vrot.lane.b32.xlu1 %v3709_v5, %s6764_s23  ;;  %310 = vrot.lane.b32.xlu0 %v3703_v4, %s6764_s23 }
  0x30   : > { %336 = vrot.lane.b32.xlu1 %v3709_v5, %s6760_s24  ;;  %334 = vrot.lane.b32.xlu0 %v3703_v4, %s6760_s24 }
  0x34   : > { %360 = vrot.lane.b32.xlu1 %v3709_v5, %s6756_s25  ;;  %358 = vrot.lane.b32.xlu0 %v3703_v4, %s6756_s25 }
  0x38   : > { %384 = vrot.lane.b32.xlu1 %v3709_v5, %s6752_s26  ;;  %382 = vrot.lane.b32.xlu0 %v3703_v4, %s6752_s26 }
  0x3c   : > { %408 = vrot.lane.b32.xlu1 %v3709_v5, %s6748_s27  ;;  %406 = vrot.lane.b32.xlu0 %v3703_v4, %s6748_s27 }
  0x40   : > { %432 = vrot.lane.b32.xlu1 %v3709_v5, %s6744_s28  ;;  %430 = vrot.lane.b32.xlu0 %v3703_v4, %s6744_s28 }
  0x44   : > { %456 = vrot.lane.b32.xlu1 %v3709_v5, %s6740_s29  ;;  %454 = vrot.lane.b32.xlu0 %v3703_v4, %s6740_s29 }
  0x48   : > { %480 = vrot.lane.b32.xlu1 %v3709_v5, %s6732_s30  ;;  %478 = vrot.lane.b32.xlu0 %v3703_v4, %s6732_s30 }
  0x4c   : > { %504 = vrot.lane.b32.xlu1 %v3709_v5, %s6728_s4  ;;  %502 = vrot.lane.b32.xlu0 %v3703_v4, %s6728_s4 }
  0x50   : > { %528 = vrot.lane.b32.xlu1 %v3709_v5, %s6722_s5  ;;  %526 = vrot.lane.b32.xlu0 %v3703_v4, %s6722_s5 }
  0x54   : > { %552 = vrot.lane.b32.xlu1 %v3709_v5, %s6718_s6  ;;  %550 = vrot.lane.b32.xlu0 %v3703_v4, %s6718_s6 }
  0x58   : > { %576 = vrot.lane.b32.xlu1 %v3709_v5, %s6714_s7  ;;  %574 = vrot.lane.b32.xlu0 %v3703_v4, %s6714_s7 }
  0x5c   : > { %600 = vrot.lane.b32.xlu1 %v3709_v5, %s6702_s8  ;;  %598 = vrot.lane.b32.xlu0 %v3703_v4, %s6702_s8 }
  0x60   : > { %624 = vrot.lane.b32.xlu1 %v3709_v5, %s6706_s9  ;;  %622 = vrot.lane.b32.xlu0 %v3703_v4, %s6706_s9 }
  0x64   : > { %648 = vrot.lane.b32.xlu1 %v3709_v5, %s6710_s10  ;;  %646 = vrot.lane.b32.xlu0 %v3703_v4, %s6710_s10 }
  0x68   : > { %672 = vrot.lane.b32.xlu1 %v3709_v5, %s6650_s11  ;;  %670 = vrot.lane.b32.xlu0 %v3703_v4, %s6650_s11  ;;  %s6658_s11 = smov 125  }
  0x6c   : > { %696 = vrot.lane.b32.xlu1 %v3709_v5, %s6652_s15  ;;  %694 = vrot.lane.b32.xlu0 %v3703_v4, %s6652_s15  ;;  %s6660_s15 = smov 124  }
  0x70   : > { %737 = vrot.lane.b32.xlu1 %v3709_v5, %s6654_s16  ;;  %735 = vrot.lane.b32.xlu0 %v3703_v4, %s6654_s16  ;;  %s6736_s16 = smov 123  }
  0x74   : > { %761 = vrot.lane.b32.xlu1 %v3709_v5, %s6656_s14  ;;  %759 = vrot.lane.b32.xlu0 %v3703_v4, %s6656_s14  ;;  %s6662_s14 = smov 122  }
  0x78   : > { %785 = vrot.lane.b32.xlu1 %v3709_v5, %s6658_s11  ;;  %783 = vrot.lane.b32.xlu0 %v3703_v4, %s6658_s11  ;;  %s6664_s11 = smov 121  }
  0x7c   : > { %809 = vrot.lane.b32.xlu1 %v3709_v5, %s6660_s15  ;;  %807 = vrot.lane.b32.xlu0 %v3703_v4, %s6660_s15  ;;  %s6666_s15 = smov 103  }
  0x80   : > { %833 = vrot.lane.b32.xlu1 %v3709_v5, %s6736_s16  ;;  %831 = vrot.lane.b32.xlu0 %v3703_v4, %s6736_s16 }
  0x84   : > { %857 = vrot.lane.b32.xlu1 %v3709_v5, %s6662_s14  ;;  %855 = vrot.lane.b32.xlu0 %v3703_v4, %s6662_s14  ;;  %s6668_s14 = smov 102  }
  0x88   : > { %881 = vrot.lane.b32.xlu1 %v3709_v5, %s6664_s11  ;;  %879 = vrot.lane.b32.xlu0 %v3703_v4, %s6664_s11  ;;  %s6670_s11 = smov 101  }
  0x8a   : > { %v3823_v6 = vpop.permute.xlu1 %214  ;;  %v3825_v7 = vpop.permute.xlu0 %189 }
  0x8b   : > { %6881 = vst [vmem:[#allocation5_spill] sm:$0xff] %v3825_v7  ;;  %v3463_v7 = vld [vmem:[%s6646_s1 + $0x63] ss:$8 sm:$0x3] }
  0x8c   : > { %905 = vrot.lane.b32.xlu1 %v3709_v5, %s6666_s15  ;;  %903 = vrot.lane.b32.xlu0 %v3703_v4, %s6666_s15  ;;  %s6672_s15 = smov 100  }
  0x8e   : > { %v3831_v8 = vpop.permute.xlu1 %216  ;;  %v3833_v9 = vpop.permute.xlu0 %191 }
  0x8f   : > { %6882 = vst [vmem:[#allocation6_spill] sm:$0xff] %v3833_v9 }
  0x90   : > { %929 = vrot.lane.b32.xlu1 %v3709_v5, %s6668_s14  ;;  %927 = vrot.lane.b32.xlu0 %v3703_v4, %s6668_s14  ;;  %s6674_s14 = smov 99  }
  0x92   : > { %v3839_v10 = vpop.permute.xlu1 %240  ;;  %v3841_v11 = vpop.permute.xlu0 %238 }
  0x93   : > { %6883 = vst [vmem:[#allocation7_spill] sm:$0xff] %v3839_v10  ;;  %6884 = vst [vmem:[#allocation8_spill] sm:$0xff] %v3841_v11 }
  0x94   : > { %953 = vrot.lane.b32.xlu1 %v3709_v5, %s6670_s11  ;;  %951 = vrot.lane.b32.xlu0 %v3703_v4, %s6670_s11  ;;  %s6676_s11 = smov 98  }
  0x96   : > { %v3847_v12 = vpop.permute.xlu1 %264  ;;  %v3849_v13 = vpop.permute.xlu0 %262 }
  0x97   : > { %6885 = vst [vmem:[#allocation9_spill] sm:$0xff] %v3847_v12  ;;  %6886 = vst [vmem:[#allocation10_spill] sm:$0xff] %v3849_v13 }
  0x98   : > { %977 = vrot.lane.b32.xlu1 %v3709_v5, %s6672_s15  ;;  %975 = vrot.lane.b32.xlu0 %v3703_v4, %s6672_s15  ;;  %s6678_s15 = smov 97  }
  0x9a   : > { %v3855_v14 = vpop.permute.xlu1 %288  ;;  %v3857_v15 = vpop.permute.xlu0 %286 }
  0x9b   : > { %6887 = vst [vmem:[#allocation11_spill] sm:$0xff] %v3855_v14  ;;  %6888 = vst [vmem:[#allocation12_spill] sm:$0xff] %v3857_v15  ;;  %v4399_v15 = vld [vmem:[%s6646_s1 + $0x11] ss:$8 sm:$0x3] }
  0x9c   : > { %1001 = vrot.lane.b32.xlu1 %v3709_v5, %s6674_s14  ;;  %999 = vrot.lane.b32.xlu0 %v3703_v4, %s6674_s14  ;;  %s6680_s14 = smov 96   ;;  %6997 = vst [vmem:[#allocation100_spill] sm:$0xff] %v4399_v15  ;;  %v3458_v14 = vld [vmem:[%s6646_s1 + $0x56] ss:$8 sm:$0x3] }
  0x9e   : > { %v3863_v16 = vpop.permute.xlu1 %312  ;;  %v3865_v17 = vpop.permute.xlu0 %310 }
  0x9f   : > { %6889 = vst [vmem:[#allocation13_spill] sm:$0xff] %v3863_v16  ;;  %6890 = vst [vmem:[#allocation14_spill] sm:$0xff] %v3865_v17 }
  0xa0   : > { %1025 = vrot.lane.b32.xlu1 %v3709_v5, %s6676_s11  ;;  %1023 = vrot.lane.b32.xlu0 %v3703_v4, %s6676_s11  ;;  %s6682_s11 = smov 95  }
  0xa2   : > { %v3871_v18 = vpop.permute.xlu1 %336  ;;  %v3873_v19 = vpop.permute.xlu0 %334 }
  0xa3   : > { %6891 = vst [vmem:[#allocation15_spill] sm:$0xff] %v3871_v18  ;;  %6892 = vst [vmem:[#allocation16_spill] sm:$0xff] %v3873_v19  ;;  %v4379_v18 = vld [vmem:[%s6646_s1 + $0x7] ss:$8 sm:$0x3] }
  0xa4   : > { %1049 = vrot.lane.b32.xlu1 %v3709_v5, %s6678_s15  ;;  %1047 = vrot.lane.b32.xlu0 %v3703_v4, %s6678_s15  ;;  %s6684_s15 = smov 94   ;;  %6995 = vst [vmem:[#allocation98_spill] sm:$0xff] %v4379_v18 }
  0xa6   : > { %v3879_v20 = vpop.permute.xlu1 %360  ;;  %v3881_v21 = vpop.permute.xlu0 %358 }
  0xa7   : > { %6893 = vst [vmem:[#allocation17_spill] sm:$0xff] %v3879_v20  ;;  %6894 = vst [vmem:[#allocation18_spill] sm:$0xff] %v3881_v21  ;;  %v4384_v20 = vld [vmem:[%s6646_s1 + $0x10] ss:$8 sm:$0x3] }
  0xa8   : > { %1073 = vrot.lane.b32.xlu1 %v3709_v5, %s6680_s14  ;;  %1071 = vrot.lane.b32.xlu0 %v3703_v4, %s6680_s14  ;;  %s6686_s14 = smov 93   ;;  %6996 = vst [vmem:[#allocation99_spill] sm:$0xff] %v4384_v20 }
  0xaa   : > { %v3887_v22 = vpop.permute.xlu1 %384  ;;  %v3889_v23 = vpop.permute.xlu0 %382 }
  0xab   : > { %6895 = vst [vmem:[#allocation19_spill] sm:$0xff] %v3887_v22  ;;  %6896 = vst [vmem:[#allocation20_spill] sm:$0xff] %v3889_v23  ;;  %v4358_v23 = vld [vmem:[%s6646_s1 + $0x5] ss:$8 sm:$0x3] }
  0xac   : > { %1097 = vrot.lane.b32.xlu1 %v3709_v5, %s6682_s11  ;;  %1095 = vrot.lane.b32.xlu0 %v3703_v4, %s6682_s11  ;;  %s6688_s11 = smov 92   ;;  %6993 = vst [vmem:[#allocation96_spill] sm:$0xff] %v4358_v23  ;;  %v4363_v22 = vld [vmem:[%s6646_s1 + $0x6] ss:$8 sm:$0x3] }
  0xad   : > { %6994 = vst [vmem:[#allocation97_spill] sm:$0xff] %v4363_v22  ;;  %v3457_v22 = vld [vmem:[%s6646_s1 + $0x55] ss:$8 sm:$0x3] }
  0xae   : > { %v3895_v24 = vpop.permute.xlu1 %408  ;;  %v3897_v25 = vpop.permute.xlu0 %406  ;;  %v3459_v23 = vld [vmem:[%s6646_s1 + $0x57] ss:$8 sm:$0x3] }
  0xaf   : > { %6897 = vst [vmem:[#allocation21_spill] sm:$0xff] %v3895_v24  ;;  %6898 = vst [vmem:[#allocation22_spill] sm:$0xff] %v3897_v25 }
  0xb0   : > { %1121 = vrot.lane.b32.xlu1 %v3709_v5, %s6684_s15  ;;  %1119 = vrot.lane.b32.xlu0 %v3703_v4, %s6684_s15  ;;  %s6801_s15 = smov 91  }
  0xb2   : > { %v3903_v26 = vpop.permute.xlu1 %432  ;;  %v3905_v27 = vpop.permute.xlu0 %430 }
  0xb3   : > { %6899 = vst [vmem:[#allocation23_spill] sm:$0xff] %v3903_v26  ;;  %6900 = vst [vmem:[#allocation24_spill] sm:$0xff] %v3905_v27  ;;  %v4342_v27 = vld [vmem:[%s6646_s1 + $0x3] ss:$8 sm:$0x3] }
  0xb4   : > { %1145 = vrot.lane.b32.xlu1 %v3709_v5, %s6686_s14  ;;  %1143 = vrot.lane.b32.xlu0 %v3703_v4, %s6686_s14  ;;  %s6799_s14 = smov 90   ;;  %6991 = vst [vmem:[#allocation94_spill] sm:$0xff] %v4342_v27  ;;  %v4347_v26 = vld [vmem:[%s6646_s1 + $0x4] ss:$8 sm:$0x3] }
  0xb5   : > { %6992 = vst [vmem:[#allocation95_spill] sm:$0xff] %v4347_v26  ;;  %v4418_v26 = vld [vmem:[%s6646_s1 + $0x12] ss:$8 sm:$0x3] }
  0xb6   : > { %v3911_v28 = vpop.permute.xlu1 %456  ;;  %v3913_v29 = vpop.permute.xlu0 %454  ;;  %6999 = vst [vmem:[#allocation101_spill] sm:$0xff] %v4418_v26 }
  0xb7   : > { %6901 = vst [vmem:[#allocation25_spill] sm:$0xff] %v3911_v28  ;;  %6902 = vst [vmem:[#allocation26_spill] sm:$0xff] %v3913_v29 }
  0xb8   : > { %1169 = vrot.lane.b32.xlu1 %v3709_v5, %s6688_s11  ;;  %1167 = vrot.lane.b32.xlu0 %v3703_v4, %s6688_s11  ;;  %s6797_s11 = smov 89  }
  0xba   : > { %v3919_v30 = vpop.permute.xlu1 %480  ;;  %v3921_v31 = vpop.permute.xlu0 %478 }
  0xbb   : > { %6903 = vst [vmem:[#allocation27_spill] sm:$0xff] %v3919_v30  ;;  %6904 = vst [vmem:[#allocation28_spill] sm:$0xff] %v3921_v31 }
  0xbc   : > { %1193 = vrot.lane.b32.xlu1 %v3709_v5, %s6801_s15  ;;  %1191 = vrot.lane.b32.xlu0 %v3703_v4, %s6801_s15 }
  0xbe   : > { %v3927_v32 = vpop.permute.xlu1 %504  ;;  %v3929_v33 = vpop.permute.xlu0 %502 }
  0xbf   : > { %6905 = vst [vmem:[#allocation29_spill] sm:$0xff] %v3927_v32  ;;  %6906 = vst [vmem:[#allocation30_spill] sm:$0xff] %v3929_v33 }
  0xc0   : > { %1217 = vrot.lane.b32.xlu1 %v3709_v5, %s6799_s14  ;;  %1215 = vrot.lane.b32.xlu0 %v3703_v4, %s6799_s14 }
  0xc2   : > { %v3935_v34 = vpop.permute.xlu1 %528  ;;  %v3937_v35 = vpop.permute.xlu0 %526 }
  0xc3   : > { %6907 = vst [vmem:[#allocation31_spill] sm:$0xff] %v3935_v34  ;;  %6908 = vst [vmem:[#allocation32_spill] sm:$0xff] %v3937_v35 }
  0xc4   : > { %1241 = vrot.lane.b32.xlu1 %v3709_v5, %s6797_s11  ;;  %1239 = vrot.lane.b32.xlu0 %v3703_v4, %s6797_s11 }
  0xc6   : > { %v3943_v36 = vpop.permute.xlu1 %552  ;;  %v3945_v37 = vpop.permute.xlu0 %550 }
  0xc7   : > { %6909 = vst [vmem:[#allocation33_spill] sm:$0xff] %v3943_v36  ;;  %6910 = vst [vmem:[#allocation34_spill] sm:$0xff] %v3945_v37  ;;  %v182_v36 = vrot.slane %v3696_v0, 1 }
  0xc8   : > { %1267 = vrot.lane.b32.xlu1 %v3699_v1, %s3614_s19  ;;  %1265 = vrot.lane.b32.xlu0 %v3696_v0, %s3614_s19 }
  0xc9   : > { %v4301_v31 = vsel %vm186_vm1, %v182_v36, 0.0  ;;  %v4320_v36 = vld [vmem:[%s6646_s1 + $0x1] ss:$8 sm:$0x3] }
  0xca   : > { %v3951_v38 = vpop.permute.xlu1 %576  ;;  %v3953_v39 = vpop.permute.xlu0 %574  ;;  %6987 = vst [vmem:[#allocation91_spill] sm:$0xff] %v4320_v36 }
  0xcb   : > { %6911 = vst [vmem:[#allocation35_spill] sm:$0xff] %v3951_v38  ;;  %6912 = vst [vmem:[#allocation36_spill] sm:$0xff] %v3953_v39  ;;  %v183_v39 = vrot.slane %v3699_v1, 1  ;;  %v193_v38 = vlaneseq }
  0xcc   : > { %1290 = vrot.lane.b32.xlu1 %v3699_v1, %s6780_s18  ;;  %1288 = vrot.lane.b32.xlu0 %v3696_v0, %s6780_s18  ;;  %s6986_s18 = smov 92  }
  0xcd   : > { %v4297_v34 = vsel %vm186_vm1, %v183_v39, 0.0  ;;  %v201_v33 = vshrl.u32 %v193_v38, 7  ;;  %v4305_v29 = vand.u32 127, %v193_v38  ;;  %v4325_v38 = vld [vmem:[%s6646_s1] ss:$8 sm:$0x3] }
  0xce   : > { %v3959_v40 = vpop.permute.xlu1 %600  ;;  %v3961_v41 = vpop.permute.xlu0 %598  ;;  %6988 = vst [vmem:[#allocation92_spill] sm:$0xff] %v4325_v38 }
  0xcf   : > { %6913 = vst [vmem:[#allocation37_spill] sm:$0xff] %v3959_v40  ;;  %6914 = vst [vmem:[#allocation38_spill] sm:$0xff] %v3961_v41  ;;  %vm218_vm2 = vcmp.lt.s32.totalorder %v4305_v29, 38  ;;  %vm195_vm3 = vcmp.lt.s32.totalorder %v4305_v29, 39  ;;  %vm242_vm4 = vcmp.lt.s32.totalorder %v4305_v29, 37  ;;  %vm266_vm5 = vcmp.lt.s32.totalorder %v4305_v29, 36 }
  0xd0   : > { %1313 = vrot.lane.b32.xlu1 %v3699_v1, %s6776_s20  ;;  %1311 = vrot.lane.b32.xlu0 %v3696_v0, %s6776_s20  ;;  %s6985_s20 = smov 93   ;;  %vm290_vm6 = vcmp.lt.s32.totalorder %v4305_v29, 35  ;;  %vm314_vm7 = vcmp.lt.s32.totalorder %v4305_v29, 34  ;;  %vm338_vm8 = vcmp.lt.s32.totalorder %v4305_v29, 33  ;;  %vm362_vm9 = vcmp.lt.s32.totalorder %v4305_v29, 32 }
  0xd1   : > { %vm386_vm10 = vcmp.lt.s32.totalorder %v4305_v29, 31  ;;  %vm410_vm11 = vcmp.lt.s32.totalorder %v4305_v29, 30  ;;  %vm6847_vm12 = vcmp.lt.s32.totalorder %v4305_v29, 29  ;;  %vm6848_vm13 = vcmp.lt.s32.totalorder %v4305_v29, 28 }
  0xd2   : > { %v3967_v42 = vpop.permute.xlu1 %624  ;;  %v3969_v43 = vpop.permute.xlu0 %622  ;;  %vm6849_vm14 = vcmp.lt.s32.totalorder %v4305_v29, 27  ;;  %vm6850_vm15 = vcmp.lt.s32.totalorder %v4305_v29, 26  ;;  %vm6851_vm0 = vcmp.lt.s32.totalorder %v4305_v29, 25  ;;  %vm6852_vm1 = vcmp.lt.s32.totalorder %v4305_v29, 7 }
  0xd3   : > { %6915 = vst [vmem:[#allocation39_spill] sm:$0xff] %v3967_v42  ;;  %6916 = vst [vmem:[#allocation40_spill] sm:$0xff] %v3969_v43 }
  0xd4   : > { %1336 = vrot.lane.b32.xlu1 %v3699_v1, %s6772_s21  ;;  %1334 = vrot.lane.b32.xlu0 %v3696_v0, %s6772_s21  ;;  %s6984_s21 = smov 94  }
  0xd6   : > { %v3975_v44 = vpop.permute.xlu1 %648  ;;  %v3977_v45 = vpop.permute.xlu0 %646 }
  0xd7   : > { %6917 = vst [vmem:[#allocation41_spill] sm:$0xff] %v3975_v44  ;;  %6918 = vst [vmem:[#allocation42_spill] sm:$0xff] %v3977_v45 }
  0xd8   : > { %1359 = vrot.lane.b32.xlu1 %v3699_v1, %s6768_s22  ;;  %1357 = vrot.lane.b32.xlu0 %v3696_v0, %s6768_s22  ;;  %s6983_s22 = smov 95  }
  0xda   : > { %v3983_v46 = vpop.permute.xlu1 %672  ;;  %v3985_v47 = vpop.permute.xlu0 %670 }
  0xdb   : > { %6919 = vst [vmem:[#allocation43_spill] sm:$0xff] %v3983_v46  ;;  %6920 = vst [vmem:[#allocation44_spill] sm:$0xff] %v3985_v47 }
  0xdc   : > { %1382 = vrot.lane.b32.xlu1 %v3699_v1, %s6764_s23  ;;  %1380 = vrot.lane.b32.xlu0 %v3696_v0, %s6764_s23  ;;  %s6982_s23 = smov 96  }
  0xde   : > { %v3991_v48 = vpop.permute.xlu1 %696  ;;  %v3993_v49 = vpop.permute.xlu0 %694 }
  0xdf   : > { %6921 = vst [vmem:[#allocation45_spill] sm:$0xff] %v3991_v48  ;;  %6922 = vst [vmem:[#allocation46_spill] sm:$0xff] %v3993_v49 }
  0xe0   : > { %1405 = vrot.lane.b32.xlu1 %v3699_v1, %s6760_s24  ;;  %1403 = vrot.lane.b32.xlu0 %v3696_v0, %s6760_s24  ;;  %s6981_s24 = smov 97  }
  0xe2   : > { %v3999_v50 = vpop.permute.xlu1 %737  ;;  %v4001_v51 = vpop.permute.xlu0 %735 }
  0xe3   : > { %6923 = vst [vmem:[#allocation47_spill] sm:$0xff] %v3999_v50  ;;  %6924 = vst [vmem:[#allocation48_spill] sm:$0xff] %v4001_v51 }
  0xe4   : > { %1428 = vrot.lane.b32.xlu1 %v3699_v1, %s6756_s25  ;;  %1426 = vrot.lane.b32.xlu0 %v3696_v0, %s6756_s25  ;;  %s6980_s25 = smov 98  }
  0xe6   : > { %v4007_v52 = vpop.permute.xlu1 %761  ;;  %v4009_v53 = vpop.permute.xlu0 %759 }
  0xe7   : > { %6925 = vst [vmem:[#allocation49_spill] sm:$0xff] %v4007_v52  ;;  %6926 = vst [vmem:[#allocation50_spill] sm:$0xff] %v4009_v53 }
  0xe8   : > { %1451 = vrot.lane.b32.xlu1 %v3699_v1, %s6752_s26  ;;  %1449 = vrot.lane.b32.xlu0 %v3696_v0, %s6752_s26  ;;  %s6979_s26 = smov 99  }
  0xea   : > { %v4015_v54 = vpop.permute.xlu1 %785  ;;  %v4017_v55 = vpop.permute.xlu0 %783 }
  0xeb   : > { %6927 = vst [vmem:[#allocation51_spill] sm:$0xff] %v4015_v54  ;;  %6928 = vst [vmem:[#allocation52_spill] sm:$0xff] %v4017_v55 }
  0xec   : > { %1474 = vrot.lane.b32.xlu1 %v3699_v1, %s6748_s27  ;;  %1472 = vrot.lane.b32.xlu0 %v3696_v0, %s6748_s27  ;;  %s6978_s27 = smov 100  }
  0xee   : > { %v4023_v56 = vpop.permute.xlu1 %809  ;;  %v4025_v57 = vpop.permute.xlu0 %807 }
  0xef   : > { %6929 = vst [vmem:[#allocation53_spill] sm:$0xff] %v4023_v56  ;;  %6930 = vst [vmem:[#allocation54_spill] sm:$0xff] %v4025_v57 }
  0xf0   : > { %1497 = vrot.lane.b32.xlu1 %v3699_v1, %s6744_s28  ;;  %1495 = vrot.lane.b32.xlu0 %v3696_v0, %s6744_s28  ;;  %s6977_s28 = smov 101  }
  0xf2   : > { %v4031_v58 = vpop.permute.xlu1 %833  ;;  %v4033_v59 = vpop.permute.xlu0 %831 }
  0xf3   : > { %6931 = vst [vmem:[#allocation55_spill] sm:$0xff] %v4031_v58  ;;  %6932 = vst [vmem:[#allocation56_spill] sm:$0xff] %v4033_v59 }
  0xf4   : > { %1520 = vrot.lane.b32.xlu1 %v3699_v1, %s6740_s29  ;;  %1518 = vrot.lane.b32.xlu0 %v3696_v0, %s6740_s29  ;;  %s6976_s29 = smov 102  }
  0xf6   : > { %v4039_v60 = vpop.permute.xlu1 %857  ;;  %v4041_v61 = vpop.permute.xlu0 %855 }
  0xf7   : > { %6933 = vst [vmem:[#allocation57_spill] sm:$0xff] %v4039_v60  ;;  %6934 = vst [vmem:[#allocation58_spill] sm:$0xff] %v4041_v61 }
  0xf8   : > { %1543 = vrot.lane.b32.xlu1 %v3699_v1, %s6732_s30  ;;  %1541 = vrot.lane.b32.xlu0 %v3696_v0, %s6732_s30  ;;  %s6974_s30 = smov 121  }
  0xfa   : > { %v4047_v62 = vpop.permute.xlu1 %881  ;;  %v4049_v63 = vpop.permute.xlu0 %879 }
  0xfb   : > { %6935 = vst [vmem:[#allocation59_spill] sm:$0xff] %v4047_v62  ;;  %6936 = vst [vmem:[#allocation60_spill] sm:$0xff] %v4049_v63 }
  0xfc   : > { %1566 = vrot.lane.b32.xlu1 %v3699_v1, %s6728_s4  ;;  %1564 = vrot.lane.b32.xlu0 %v3696_v0, %s6728_s4  ;;  %s6971_s4 = smov 122  }
  0xfe   : > { %v4055_v2 = vpop.permute.xlu1 %905  ;;  %v4057_v3 = vpop.permute.xlu0 %903 }
  0xff   : > { %6937 = vst [vmem:[#allocation61_spill] sm:$0xff] %v4055_v2  ;;  %6938 = vst [vmem:[#allocation62_spill] sm:$0xff] %v4057_v3 }
 0x100   : > { %1589 = vrot.lane.b32.xlu1 %v3699_v1, %s6722_s5  ;;  %1587 = vrot.lane.b32.xlu0 %v3696_v0, %s6722_s5  ;;  %s6966_s5 = smov 124  }
 0x102   : > { %v4063_v61 = vpop.permute.xlu1 %929  ;;  %v4065_v62 = vpop.permute.xlu0 %927 }
 0x103   : > { %6939 = vst [vmem:[#allocation63_spill] sm:$0xff] %v4063_v61  ;;  %6940 = vst [vmem:[#allocation64_spill] sm:$0xff] %v4065_v62 }
 0x104   : > { %1612 = vrot.lane.b32.xlu1 %v3699_v1, %s6718_s6  ;;  %1610 = vrot.lane.b32.xlu0 %v3696_v0, %s6718_s6  ;;  %s6963_s6 = smov 125  }
 0x106   : > { %v4071_v63 = vpop.permute.xlu1 %953  ;;  %v4073_v2 = vpop.permute.xlu0 %951 }
 0x107   : > { %6941 = vst [vmem:[#allocation65_spill] sm:$0xff] %v4071_v63  ;;  %6942 = vst [vmem:[#allocation66_spill] sm:$0xff] %v4073_v2 }
 0x108   : > { %1635 = vrot.lane.b32.xlu1 %v3699_v1, %s6714_s7  ;;  %1633 = vrot.lane.b32.xlu0 %v3696_v0, %s6714_s7  ;;  %s6960_s7 = smov 126  }
 0x10a   : > { %v4079_v3 = vpop.permute.xlu1 %977  ;;  %v4081_v61 = vpop.permute.xlu0 %975 }
 0x10b   : > { %6943 = vst [vmem:[#allocation67_spill] sm:$0xff] %v4079_v3  ;;  %6944 = vst [vmem:[#allocation68_spill] sm:$0xff] %v4081_v61 }
 0x10c   : > { %1658 = vrot.lane.b32.xlu1 %v3699_v1, %s6702_s8  ;;  %1656 = vrot.lane.b32.xlu0 %v3696_v0, %s6702_s8  ;;  %s6951_s8 = smov 2  }
 0x10e   : > { %v4087_v62 = vpop.permute.xlu1 %1001  ;;  %v4089_v63 = vpop.permute.xlu0 %999 }
 0x10f   : > { %6945 = vst [vmem:[#allocation69_spill] sm:$0xff] %v4087_v62  ;;  %6946 = vst [vmem:[#allocation70_spill] sm:$0xff] %v4089_v63 }
 0x110   : > { %1681 = vrot.lane.b32.xlu1 %v3699_v1, %s6706_s9  ;;  %1679 = vrot.lane.b32.xlu0 %v3696_v0, %s6706_s9  ;;  %s6954_s9 = smov 1  }
 0x112   : > { %v4095_v2 = vpop.permute.xlu1 %1025  ;;  %v4097_v3 = vpop.permute.xlu0 %1023 }
 0x113   : > { %6947 = vst [vmem:[#allocation71_spill] sm:$0xff] %v4095_v2  ;;  %6948 = vst [vmem:[#allocation72_spill] sm:$0xff] %v4097_v3 }
 0x114   : > { %1704 = vrot.lane.b32.xlu1 %v3699_v1, %s6710_s10  ;;  %1702 = vrot.lane.b32.xlu0 %v3696_v0, %s6710_s10  ;;  %s6957_s10 = smov 127  }
 0x116   : > { %v4103_v61 = vpop.permute.xlu1 %1049  ;;  %v4105_v62 = vpop.permute.xlu0 %1047 }
 0x117   : > { %6949 = vst [vmem:[#allocation73_spill] sm:$0xff] %v4103_v61  ;;  %6950 = vst [vmem:[#allocation74_spill] sm:$0xff] %v4105_v62 }
 0x118   : > { %1727 = vrot.lane.b32.xlu1 %v3699_v1, %s6951_s8  ;;  %1725 = vrot.lane.b32.xlu0 %v3696_v0, %s6951_s8 }
 0x11a   : > { %v4111_v63 = vpop.permute.xlu1 %1073  ;;  %v4113_v2 = vpop.permute.xlu0 %1071 }
 0x11b   : > { %6952 = vst [vmem:[#allocation75_spill] sm:$0xff] %v4111_v63  ;;  %6953 = vst [vmem:[#allocation76_spill] sm:$0xff] %v4113_v2 }
 0x11c   : > { %1750 = vrot.lane.b32.xlu1 %v3699_v1, %s6954_s9  ;;  %1748 = vrot.lane.b32.xlu0 %v3696_v0, %s6954_s9 }
 0x11e   : > { %v4119_v3 = vpop.permute.xlu1 %1097  ;;  %v4121_v61 = vpop.permute.xlu0 %1095 }
 0x11f   : > { %6955 = vst [vmem:[#allocation77_spill] sm:$0xff] %v4119_v3  ;;  %6956 = vst [vmem:[#allocation78_spill] sm:$0xff] %v4121_v61 }
 0x120   : > { %1790 = vrot.lane.b32.xlu1 %v3699_v1, %s6957_s10  ;;  %1788 = vrot.lane.b32.xlu0 %v3696_v0, %s6957_s10 }
 0x122   : > { %v4127_v62 = vpop.permute.xlu1 %1121  ;;  %v4129_v63 = vpop.permute.xlu0 %1119 }
 0x123   : > { %6958 = vst [vmem:[#allocation79_spill] sm:$0xff] %v4127_v62  ;;  %6959 = vst [vmem:[#allocation80_spill] sm:$0xff] %v4129_v63 }
 0x124   : > { %1813 = vrot.lane.b32.xlu1 %v3699_v1, %s6960_s7  ;;  %1811 = vrot.lane.b32.xlu0 %v3696_v0, %s6960_s7 }
 0x126   : > { %v4135_v2 = vpop.permute.xlu1 %1145  ;;  %v4137_v3 = vpop.permute.xlu0 %1143 }
 0x127   : > { %6961 = vst [vmem:[#allocation81_spill] sm:$0xff] %v4135_v2  ;;  %6962 = vst [vmem:[#allocation82_spill] sm:$0xff] %v4137_v3 }
 0x128   : > { %1836 = vrot.lane.b32.xlu1 %v3699_v1, %s6963_s6  ;;  %1834 = vrot.lane.b32.xlu0 %v3696_v0, %s6963_s6 }
 0x12a   : > { %v4143_v61 = vpop.permute.xlu1 %1169  ;;  %v4145_v62 = vpop.permute.xlu0 %1167 }
 0x12b   : > { %6964 = vst [vmem:[#allocation83_spill] sm:$0xff] %v4143_v61  ;;  %6965 = vst [vmem:[#allocation84_spill] sm:$0xff] %v4145_v62 }
 0x12c   : > { %1859 = vrot.lane.b32.xlu1 %v3699_v1, %s6966_s5  ;;  %1857 = vrot.lane.b32.xlu0 %v3696_v0, %s6966_s5 }
 0x12e   : > { %v4151_v63 = vpop.permute.xlu1 %1193  ;;  %v4153_v2 = vpop.permute.xlu0 %1191 }
 0x12f   : > { %6967 = vst [vmem:[#allocation85_spill] sm:$0xff] %v4151_v63  ;;  %6968 = vst [vmem:[#allocation86_spill] sm:$0xff] %v4153_v2 }
 0x130   : > { %1882 = vrot.lane.b32.xlu1 %v3699_v1, %s6736_s16  ;;  %1880 = vrot.lane.b32.xlu0 %v3696_v0, %s6736_s16  ;;  %s6975_s16 = smov 103  }
 0x132   : > { %v4159_v3 = vpop.permute.xlu1 %1217  ;;  %v4161_v61 = vpop.permute.xlu0 %1215 }
 0x133   : > { %6969 = vst [vmem:[#allocation87_spill] sm:$0xff] %v4159_v3  ;;  %6970 = vst [vmem:[#allocation88_spill] sm:$0xff] %v4161_v61 }
 0x134   : > { %1905 = vrot.lane.b32.xlu1 %v3699_v1, %s6971_s4  ;;  %1903 = vrot.lane.b32.xlu0 %v3696_v0, %s6971_s4 }
 0x136   : > { %v4167_v62 = vpop.permute.xlu1 %1241  ;;  %v4169_v63 = vpop.permute.xlu0 %1239 }
 0x137   : > { %6972 = vst [vmem:[#allocation89_spill] sm:$0xff] %v4167_v62  ;;  %6973 = vst [vmem:[#allocation90_spill] sm:$0xff] %v4169_v63 }
 0x138   : > { %1928 = vrot.lane.b32.xlu1 %v3699_v1, %s6974_s30  ;;  %1926 = vrot.lane.b32.xlu0 %v3696_v0, %s6974_s30 }
 0x13a   : > { %v4175_v2 = vpop.permute.xlu1 %1267  ;;  %v4177_v3 = vpop.permute.xlu0 %1265 }
 0x13c   : > { %1951 = vrot.lane.b32.xlu1 %v3699_v1, %s6975_s16  ;;  %1949 = vrot.lane.b32.xlu0 %v3696_v0, %s6975_s16 }
 0x13e   : > { %v4183_v61 = vpop.permute.xlu1 %1290  ;;  %v4185_v62 = vpop.permute.xlu0 %1288 }
 0x13f   : > { %v1292_v16 = vsel %vm218_vm2, %v4185_v62, %v4183_v61  ;;  %v1293_v19 = vsel %vm218_vm2, %v4183_v61, %v4185_v62  ;;  %v3461_v61 = vld [vmem:[%s6646_s1 + $0x61] ss:$8 sm:$0x3]  ;;  %v1269_v62 = vsel %vm195_vm3, %v4177_v3, %v4175_v2 }
 0x140   : > { %1974 = vrot.lane.b32.xlu1 %v3699_v1, %s6976_s29  ;;  %1972 = vrot.lane.b32.xlu0 %v3696_v0, %s6976_s29 }
 0x142   : > { %v4191_v63 = vpop.permute.xlu1 %1313  ;;  %v4193_v60 = vpop.permute.xlu0 %1311 }
 0x143   : > { %v1316_v13 = vsel %vm242_vm4, %v4191_v63, %v4193_v60 }
 0x144   : > { %1997 = vrot.lane.b32.xlu1 %v3699_v1, %s6977_s28  ;;  %1995 = vrot.lane.b32.xlu0 %v3696_v0, %s6977_s28 }
 0x146   : > { %v4199_v59 = vpop.permute.xlu1 %1336  ;;  %v4201_v58 = vpop.permute.xlu0 %1334 }
 0x148   : > { %2020 = vrot.lane.b32.xlu1 %v3699_v1, %s6978_s27  ;;  %2018 = vrot.lane.b32.xlu0 %v3696_v0, %s6978_s27 }
 0x14a   : > { %v4207_v57 = vpop.permute.xlu1 %1359  ;;  %v4209_v56 = vpop.permute.xlu0 %1357 }
 0x14c   : > { %2043 = vrot.lane.b32.xlu1 %v3699_v1, %s6979_s26  ;;  %2041 = vrot.lane.b32.xlu0 %v3696_v0, %s6979_s26 }
 0x14e   : > { %v4215_v55 = vpop.permute.xlu1 %1382  ;;  %v4217_v54 = vpop.permute.xlu0 %1380 }
 0x150   : > { %2066 = vrot.lane.b32.xlu1 %v3699_v1, %s6980_s25  ;;  %2064 = vrot.lane.b32.xlu0 %v3696_v0, %s6980_s25 }
 0x152   : > { %v4223_v53 = vpop.permute.xlu1 %1405  ;;  %v4225_v52 = vpop.permute.xlu0 %1403 }
 0x154   : > { %2089 = vrot.lane.b32.xlu1 %v3699_v1, %s6981_s24  ;;  %2087 = vrot.lane.b32.xlu0 %v3696_v0, %s6981_s24 }
 0x156   : > { %v4231_v51 = vpop.permute.xlu1 %1428  ;;  %v4233_v50 = vpop.permute.xlu0 %1426 }
 0x158   : > { %2112 = vrot.lane.b32.xlu1 %v3699_v1, %s6982_s23  ;;  %2110 = vrot.lane.b32.xlu0 %v3696_v0, %s6982_s23 }
 0x15a   : > { %v4239_v4 = vpop.permute.xlu1 %1451  ;;  %v4241_v5 = vpop.permute.xlu0 %1449 }
 0x15c   : > { %2135 = vrot.lane.b32.xlu1 %v3699_v1, %s6983_s22  ;;  %2133 = vrot.lane.b32.xlu0 %v3696_v0, %s6983_s22 }
 0x15e   : > { %v4247_v49 = vpop.permute.xlu1 %1474  ;;  %v4249_v48 = vpop.permute.xlu0 %1472 }
 0x160   : > { %2158 = vrot.lane.b32.xlu1 %v3699_v1, %s6984_s21  ;;  %2156 = vrot.lane.b32.xlu0 %v3696_v0, %s6984_s21 }
 0x162   : > { %v4255_v47 = vpop.permute.xlu1 %1497  ;;  %v4257_v46 = vpop.permute.xlu0 %1495 }
 0x164   : > { %2181 = vrot.lane.b32.xlu1 %v3699_v1, %s6985_s20  ;;  %2179 = vrot.lane.b32.xlu0 %v3696_v0, %s6985_s20 }
 0x166   : > { %v4263_v45 = vpop.permute.xlu1 %1520  ;;  %v4265_v44 = vpop.permute.xlu0 %1518 }
 0x168   : > { %2204 = vrot.lane.b32.xlu1 %v3699_v1, %s6986_s18  ;;  %2202 = vrot.lane.b32.xlu0 %v3696_v0, %s6986_s18 }
 0x16a   : > { %v4271_v43 = vpop.permute.xlu1 %1543  ;;  %v4273_v42 = vpop.permute.xlu0 %1541 }
 0x16c   : > { %2227 = vrot.lane.b32.xlu1 %v3699_v1, %s6801_s15  ;;  %2225 = vrot.lane.b32.xlu0 %v3696_v0, %s6801_s15  ;;  %s7004_s15 = smov 32  }
 0x16e   : > { %v4279_v41 = vpop.permute.xlu1 %1566  ;;  %v4281_v40 = vpop.permute.xlu0 %1564 }
 0x170   : > { %2250 = vrot.lane.b32.xlu1 %v3699_v1, %s6799_s14  ;;  %2248 = vrot.lane.b32.xlu0 %v3696_v0, %s6799_s14  ;;  %s7006_s14 = smov 30  }
 0x172   : > { %v4288_v37 = vpop.permute.xlu1 %1589  ;;  %v4291_v35 = vpop.permute.xlu0 %1587 }
 0x174   : > { %2273 = vrot.lane.b32.xlu1 %v3699_v1, %s6797_s11  ;;  %2271 = vrot.lane.b32.xlu0 %v3696_v0, %s6797_s11  ;;  %v4311_v1 = vsub.s32 0, %v201_v33  ;;  %v4313_v0 = vsub.s32 1, %v201_v33  ;;  %v4333_v33 = vld [vmem:[%s6646_s1 + $0x2] ss:$8 sm:$0x3]  ;;  %s6998_s11 = smov 37  }
 0x175   : > { %6989 = vst [vmem:[#allocation93_spill] sm:$0xff] %v4333_v33 }
 0x176   : > { %v4299_v32 = vpop.permute.xlu1 %1612  ;;  %v4303_v30 = vpop.permute.xlu0 %1610  ;;  %v1300_v24 = vrot.slane %v3458_v14, %v4311_v1  ;;  %v1304_v25 = vrot.slane %v3458_v14, %v4313_v0  ;;  %v3460_v14 = vld [vmem:[%s6646_s1 + $0x60] ss:$8 sm:$0x3]  ;;  %v1277_v33 = vrot.slane %v3457_v22, %v4311_v1  ;;  %v1281_v18 = vrot.slane %v3457_v22, %v4313_v0 }
 0x177   : > { %v1323_v26 = vrot.slane %v3459_v23, %v4311_v1  ;;  %v1327_v15 = vrot.slane %v3459_v23, %v4313_v0  ;;  %v1270_v22 = vsel %vm195_vm3, %v4175_v2, %v4177_v3  ;;  %v1315_v23 = vsel %vm242_vm4, %v4193_v60, %v4191_v63  ;;  %v3462_v3 = vld [vmem:[%s6646_s1 + $0x62] ss:$8 sm:$0x3] }
 0x178   : > { %2298 = vrot.lane.b32.xlu1 %v4297_v34, %s3614_s19  ;;  %2296 = vrot.lane.b32.xlu0 %v4301_v31, %s3614_s19  ;;  %v1307_v11 = vmul.f32 %v1300_v24, %v1293_v19  ;;  %v1308_v10 = vmul.f32 %v1304_v25, %v1292_v16  ;;  %v1346_v38 = vrot.slane %v3460_v14, %v4311_v1  ;;  %s7003_s19 = smov 33  }
 0x179   : > { %v1350_v2 = vrot.slane %v3460_v14, %v4313_v0  ;;  %v1338_v60 = vsel %vm266_vm5, %v4201_v58, %v4199_v59  ;;  %v1339_v16 = vsel %vm266_vm5, %v4199_v59, %v4201_v58  ;;  %v1369_v19 = vrot.slane %v3461_v61, %v4311_v1 }
 0x17a   : > { %v4315_v39 = vpop.permute.xlu1 %1635  ;;  %v4327_v28 = vpop.permute.xlu0 %1633  ;;  %v1373_v24 = vrot.slane %v3461_v61, %v4313_v0  ;;  %v1284_v25 = vmul.f32 %v1277_v33, %v1270_v22  ;;  %v1285_v63 = vmul.f32 %v1281_v18, %v1269_v62  ;;  %v1330_v14 = vmul.f32 %v1323_v26, %v1316_v13  ;;  %v3464_v22 = vld [vmem:[%s6646_s1 + $0x64] ss:$8 sm:$0x3] }
 0x17b   : > { %v1331_v9 = vmul.f32 %v1327_v15, %v1315_v23  ;;  %v1361_v58 = vsel %vm290_vm6, %v4209_v56, %v4207_v57  ;;  %v1362_v59 = vsel %vm290_vm6, %v4207_v57, %v4209_v56  ;;  %v1392_v13 = vrot.slane %v3462_v3, %v4311_v1 }
 0x17c   : > { %2321 = vrot.lane.b32.xlu1 %v4297_v34, %s6990_s3  ;;  %2319 = vrot.lane.b32.xlu0 %v4301_v31, %s6990_s3  ;;  %v1396_v15 = vrot.slane %v3462_v3, %v4313_v0  ;;  %v1309_v26 = vadd.f32 %v1307_v11, %v1284_v25  ;;  %v1310_v33 = vadd.f32 %v1308_v10, %v1285_v63  ;;  %s7005_s3 = smov 31  }
 0x17d   : > { %v1353_v61 = vmul.f32 %v1346_v38, %v1339_v16  ;;  %v1354_v62 = vmul.f32 %v1350_v2, %v1338_v60  ;;  %v1384_v56 = vsel %vm314_vm7, %v4217_v54, %v4215_v55  ;;  %v1385_v57 = vsel %vm314_vm7, %v4215_v55, %v4217_v54  ;;  %v3465_v16 = vld [vmem:[%s6646_s1 + $0x65] ss:$8 sm:$0x3] }
 0x17e   : > { %v4365_v21 = vpop.permute.xlu1 %1658  ;;  %v4386_v17 = vpop.permute.xlu0 %1656  ;;  %v1415_v10 = vrot.slane %v3463_v7, %v4311_v1  ;;  %v1419_v11 = vrot.slane %v3463_v7, %v4313_v0  ;;  %v1332_v38 = vadd.f32 %v1330_v14, %v1309_v26  ;;  %v1333_v2 = vadd.f32 %v1331_v9, %v1310_v33 }
 0x17f   : > { %v1376_v3 = vmul.f32 %v1369_v19, %v1362_v59  ;;  %v1377_v60 = vmul.f32 %v1373_v24, %v1361_v58  ;;  %v1407_v7 = vsel %vm338_vm8, %v4225_v52, %v4223_v53  ;;  %v1408_v54 = vsel %vm338_vm8, %v4223_v53, %v4225_v52  ;;  %v3466_v58 = vld [vmem:[%s6646_s1 + $0x66] ss:$8 sm:$0x3] }
 0x180   : > { %2344 = vrot.lane.b32.xlu1 %v4297_v34, %s6998_s11  ;;  %2342 = vrot.lane.b32.xlu0 %v4301_v31, %s6998_s11  ;;  %s7001_s11 = smov 35   ;;  %v1438_v9 = vrot.slane %v3464_v22, %v4311_v1  ;;  %v1442_v55 = vrot.slane %v3464_v22, %v4313_v0  ;;  %v1355_v24 = vadd.f32 %v1353_v61, %v1332_v38  ;;  %v3467_v22 = vld [vmem:[%s6646_s1 + $0x67] ss:$8 sm:$0x3] }
 0x181   : > { %v1356_v25 = vadd.f32 %v1354_v62, %v1333_v2  ;;  %v1399_v63 = vmul.f32 %v1392_v13, %v1385_v57  ;;  %v1400_v14 = vmul.f32 %v1396_v15, %v1384_v56  ;;  %v1430_v52 = vsel %vm362_vm9, %v4233_v50, %v4231_v51 }
 0x182   : > { %v4436_v27 = vpop.permute.xlu1 %1681  ;;  %v4445_v20 = vpop.permute.xlu0 %1679  ;;  %v1431_v53 = vsel %vm362_vm9, %v4231_v51, %v4233_v50  ;;  %v1461_v26 = vrot.slane %v3465_v16, %v4311_v1  ;;  %v1465_v13 = vrot.slane %v3465_v16, %v4313_v0  ;;  %v1378_v15 = vadd.f32 %v1376_v3, %v1355_v24 }
 0x183   : > { %v1379_v33 = vadd.f32 %v1377_v60, %v1356_v25  ;;  %v1422_v61 = vmul.f32 %v1415_v10, %v1408_v54  ;;  %v1423_v62 = vmul.f32 %v1419_v11, %v1407_v7  ;;  %v1453_v50 = vsel %vm386_vm10, %v4241_v5, %v4239_v4  ;;  %v3468_v60 = vld [vmem:[%s6646_s1 + $0x70] ss:$8 sm:$0x3] }
 0x184   : > { %2367 = vrot.lane.b32.xlu1 %v4297_v34, %s7000_s12  ;;  %2365 = vrot.lane.b32.xlu0 %v4301_v31, %s7000_s12  ;;  %v1454_v51 = vsel %vm386_vm10, %v4239_v4, %v4241_v5  ;;  %v1484_v56 = vrot.slane %v3466_v58, %v4311_v1  ;;  %v1488_v57 = vrot.slane %v3466_v58, %v4313_v0  ;;  %s7007_s12 = smov 29  }
 0x185   : > { %v1401_v11 = vadd.f32 %v1399_v63, %v1378_v15  ;;  %v1402_v38 = vadd.f32 %v1400_v14, %v1379_v33  ;;  %v1445_v2 = vmul.f32 %v1438_v9, %v1431_v53  ;;  %v1446_v3 = vmul.f32 %v1442_v55, %v1430_v52  ;;  %v3469_v63 = vld [vmem:[%s6646_s1 + $0x71] ss:$8 sm:$0x3]  ;;  %v3470_v33 = vld [vmem:[%s6646_s1 + $0x72] ss:$8 sm:$0x3] }
 0x186   : > { %v4490_v12 = vpop.permute.xlu1 %1704  ;;  %v4498_v36 = vpop.permute.xlu0 %1702  ;;  %v1476_v4 = vsel %vm410_vm11, %v4249_v48, %v4247_v49  ;;  %v1477_v5 = vsel %vm410_vm11, %v4247_v49, %v4249_v48  ;;  %v1507_v7 = vrot.slane %v3467_v22, %v4311_v1  ;;  %v1511_v54 = vrot.slane %v3467_v22, %v4313_v0 }
 0x187   : > { %v1424_v9 = vadd.f32 %v1422_v61, %v1401_v11  ;;  %v1425_v55 = vadd.f32 %v1423_v62, %v1402_v38  ;;  %v1468_v24 = vmul.f32 %v1461_v26, %v1454_v51  ;;  %v1469_v25 = vmul.f32 %v1465_v13, %v1453_v50  ;;  %v3471_v11 = vld [vmem:[%s6646_s1 + $0x73] ss:$8 sm:$0x3] }
 0x188   : > { %2390 = vrot.lane.b32.xlu1 %v4297_v34, %s7001_s11  ;;  %2388 = vrot.lane.b32.xlu0 %v4301_v31, %s7001_s11  ;;  %v1499_v48 = vsel %vm6847_vm12, %v4257_v46, %v4255_v47  ;;  %v1500_v49 = vsel %vm6847_vm12, %v4255_v47, %v4257_v46  ;;  %v1530_v14 = vrot.slane %v3468_v60, %v4311_v1  ;;  %vm6860_vm12 = vcmp.lt.s32.totalorder %v4305_v29, 6  ;;  %s7008_s11 = smov 28  }
 0x189   : > { %v1534_v58 = vrot.slane %v3468_v60, %v4313_v0  ;;  %v1447_v53 = vadd.f32 %v1445_v2, %v1424_v9  ;;  %v1448_v26 = vadd.f32 %v1446_v3, %v1425_v55  ;;  %v1491_v13 = vmul.f32 %v1484_v56, %v1477_v5 }
 0x18a   : > { %v4528_v18 = vpop.permute.xlu1 %1727  ;;  %v4534_v23 = vpop.permute.xlu0 %1725  ;;  %v1492_v15 = vmul.f32 %v1488_v57, %v1476_v4  ;;  %v1522_v46 = vsel %vm6848_vm13, %v4265_v44, %v4263_v45  ;;  %v1523_v47 = vsel %vm6848_vm13, %v4263_v45, %v4265_v44  ;;  %v1553_v62 = vrot.slane %v3469_v63, %v4311_v1 }
 0x18b   : > { %v1557_v22 = vrot.slane %v3469_v63, %v4313_v0  ;;  %v1470_v50 = vadd.f32 %v1468_v24, %v1447_v53  ;;  %v1471_v51 = vadd.f32 %v1469_v25, %v1448_v26  ;;  %v1514_v56 = vmul.f32 %v1507_v7, %v1500_v49 }
 0x18c   : > { %2413 = vrot.lane.b32.xlu1 %v4297_v34, %s7002_s0  ;;  %2411 = vrot.lane.b32.xlu0 %v4301_v31, %s7002_s0  ;;  %v1515_v57 = vmul.f32 %v1511_v54, %v1499_v48  ;;  %v1545_v44 = vsel %vm6849_vm14, %v4273_v42, %v4271_v43  ;;  %v1546_v45 = vsel %vm6849_vm14, %v4271_v43, %v4273_v42  ;;  %vm6857_vm13 = vcmp.lt.s32.totalorder %v4305_v29, 5  ;;  %v3472_v54 = vld [vmem:[%s6646_s1 + $0x74] ss:$8 sm:$0x3]  ;;  %s7009_s0 = smov 27  }
 0x18d   : > { %v1576_v38 = vrot.slane %v3470_v33, %v4311_v1  ;;  %v1580_v2 = vrot.slane %v3470_v33, %v4313_v0  ;;  %v1493_v60 = vadd.f32 %v1491_v13, %v1470_v50  ;;  %v1494_v4 = vadd.f32 %v1492_v15, %v1471_v51 }
 0x18e   : > { %v4564_v19 = vpop.permute.xlu1 %1750  ;;  %v4570_v59 = vpop.permute.xlu0 %1748  ;;  %v1537_v5 = vmul.f32 %v1530_v14, %v1523_v47  ;;  %v1538_v7 = vmul.f32 %v1534_v58, %v1522_v46  ;;  %v1568_v42 = vsel %vm6850_vm15, %v4281_v40, %v4279_v41  ;;  %v1569_v43 = vsel %vm6850_vm15, %v4279_v41, %v4281_v40  ;;  %v3473_v14 = vld [vmem:[%s6646_s1 + $0x75] ss:$8 sm:$0x3]  ;;  %v3474_v47 = vld [vmem:[%s6646_s1 + $0x76] ss:$8 sm:$0x3] }
 0x18f   : > { %v1599_v55 = vrot.slane %v3471_v11, %v4311_v1  ;;  %v1603_v24 = vrot.slane %v3471_v11, %v4313_v0  ;;  %vm6856_vm14 = vcmp.lt.s32.totalorder %v4305_v29, 4  ;;  %v1516_v25 = vadd.f32 %v1514_v56, %v1493_v60 }
 0x190   : > { %2436 = vrot.lane.b32.xlu1 %v4297_v34, %s7003_s19  ;;  %2434 = vrot.lane.b32.xlu0 %v4301_v31, %s7003_s19  ;;  %v1517_v63 = vadd.f32 %v1515_v57, %v1494_v4  ;;  %v1560_v48 = vmul.f32 %v1553_v62, %v1546_v45  ;;  %v1561_v49 = vmul.f32 %v1557_v22, %v1545_v44  ;;  %vm6855_vm15 = vcmp.lt.s32.totalorder %v4305_v29, 3  ;;  %v3475_v44 = vld [vmem:[%s6646_s1 + $0x77] ss:$8 sm:$0x3]  ;;  %s7016_s19 = smov 3  }
 0x191   : > { %v1591_v40 = vsel %vm6851_vm0, %v4291_v35, %v4288_v37  ;;  %v1592_v41 = vsel %vm6851_vm0, %v4288_v37, %v4291_v35  ;;  %v1622_v58 = vrot.slane %v3472_v54, %v4311_v1  ;;  %v1626_v53 = vrot.slane %v3472_v54, %v4313_v0  ;;  %v3476_v54 = vld [vmem:[%s6646_s1 + $0x80] ss:$8 sm:$0x3] }
 0x192   : > { %v4600_v10 = vpop.permute.xlu1 %1790  ;;  %v4606_v16 = vpop.permute.xlu0 %1788  ;;  %v1539_v13 = vadd.f32 %v1537_v5, %v1516_v25  ;;  %v1540_v15 = vadd.f32 %v1538_v7, %v1517_v63  ;;  %v1583_v33 = vmul.f32 %v1576_v38, %v1569_v43  ;;  %v1584_v46 = vmul.f32 %v1580_v2, %v1568_v42 }
 0x193   : > { %v1614_v35 = vsel %vm6852_vm1, %v4303_v30, %v4299_v32  ;;  %v1615_v37 = vsel %vm6852_vm1, %v4299_v32, %v4303_v30  ;;  %v1645_v22 = vrot.slane %v3473_v14, %v4311_v1  ;;  %v1649_v50 = vrot.slane %v3473_v14, %v4313_v0 }
 0x194   : > { %2459 = vrot.lane.b32.xlu1 %v4297_v34, %s7004_s15  ;;  %2457 = vrot.lane.b32.xlu0 %v4301_v31, %s7004_s15  ;;  %vm6854_vm0 = vcmp.lt.s32.totalorder %v4305_v29, 2  ;;  %v1562_v51 = vadd.f32 %v1560_v48, %v1539_v13  ;;  %v1563_v56 = vadd.f32 %v1561_v49, %v1540_v15  ;;  %v1606_v57 = vmul.f32 %v1599_v55, %v1592_v41  ;;  %v3477_v49 = vld [vmem:[%s6646_s1 + $0x81] ss:$8 sm:$0x3]  ;;  %s7014_s15 = smov 5  }
 0x195   : > { %v1607_v11 = vmul.f32 %v1603_v24, %v1591_v40  ;;  %v1637_v30 = vsel %vm6860_vm12, %v4327_v28, %v4315_v39  ;;  %v1638_v32 = vsel %vm6860_vm12, %v4315_v39, %v4327_v28  ;;  %v1668_v45 = vrot.slane %v3474_v47, %v4311_v1 }
 0x196   : > { %v4636_v52 = vpop.permute.xlu1 %1813  ;;  %v4642_v61 = vpop.permute.xlu0 %1811  ;;  %v1672_v38 = vrot.slane %v3474_v47, %v4313_v0  ;;  %vm6853_vm1 = vcmp.lt.s32.totalorder %v4305_v29, 1  ;;  %v1585_v60 = vadd.f32 %v1583_v33, %v1562_v51  ;;  %v1586_v4 = vadd.f32 %v1584_v46, %v1563_v56  ;;  %v3478_v33 = vld [vmem:[%s6646_s1 + $0x82] ss:$8 sm:$0x3] }
 0x197   : > { %v1629_v5 = vmul.f32 %v1622_v58, %v1615_v37  ;;  %v1630_v7 = vmul.f32 %v1626_v53, %v1614_v35  ;;  %v1660_v28 = vsel %vm6857_vm13, %v4386_v17, %v4365_v21  ;;  %v1661_v39 = vsel %vm6857_vm13, %v4365_v21, %v4386_v17  ;;  %v4801_v37 = vld [vmem:[%s6646_s1 + $0x13] ss:$8 sm:$0x3] }
 0x198   : > { %2482 = vrot.lane.b32.xlu1 %v4297_v34, %s7005_s3  ;;  %2480 = vrot.lane.b32.xlu0 %v4301_v31, %s7005_s3  ;;  %v1691_v43 = vrot.slane %v3475_v44, %v4311_v1  ;;  %v1695_v55 = vrot.slane %v3475_v44, %v4313_v0  ;;  %v1608_v24 = vadd.f32 %v1606_v57, %v1585_v60  ;;  %vm6863_vm13 = vcmp.lt.s32.totalorder %v4305_v29, 123 }
 0x199   : > { %v1609_v25 = vadd.f32 %v1607_v11, %v1586_v4  ;;  %v1652_v63 = vmul.f32 %v1645_v22, %v1638_v32  ;;  %v1653_v48 = vmul.f32 %v1649_v50, %v1637_v30  ;;  %v1683_v17 = vsel %vm6856_vm14, %v4445_v20, %v4436_v27  ;;  %v4820_v30 = vld [vmem:[%s6646_s1 + $0x14] ss:$8 sm:$0x3]  ;;  %v3479_v4 = vld [vmem:[%s6646_s1 + $0x83] ss:$8 sm:$0x3] }
 0x19a   : > { %v4672_v3 = vpop.permute.xlu1 %1836  ;;  %v4678_v9 = vpop.permute.xlu0 %1834  ;;  %v1684_v21 = vsel %vm6856_vm14, %v4436_v27, %v4445_v20  ;;  %v1714_v14 = vrot.slane %v3476_v54, %v4311_v1  ;;  %v1718_v40 = vrot.slane %v3476_v54, %v4313_v0  ;;  %v1631_v58 = vadd.f32 %v1629_v5, %v1608_v24 }
 0x19b   : > { %v1632_v53 = vadd.f32 %v1630_v7, %v1609_v25  ;;  %v1675_v13 = vmul.f32 %v1668_v45, %v1661_v39  ;;  %v1676_v15 = vmul.f32 %v1672_v38, %v1660_v28  ;;  %v1706_v20 = vsel %vm6855_vm15, %v4498_v36, %v4490_v12  ;;  %v4844_v28 = vld [vmem:[%s6646_s1 + $0x15] ss:$8 sm:$0x3]  ;;  %v4849_v39 = vld [vmem:[%s6646_s1 + $0x16] ss:$8 sm:$0x3] }
 0x19c   : > { %2505 = vrot.lane.b32.xlu1 %v4297_v34, %s7006_s14  ;;  %2503 = vrot.lane.b32.xlu0 %v4301_v31, %s7006_s14  ;;  %v1707_v27 = vsel %vm6855_vm15, %v4490_v12, %v4498_v36  ;;  %v1737_v47 = vrot.slane %v3477_v49, %v4311_v1  ;;  %v1741_v35 = vrot.slane %v3477_v49, %v4313_v0  ;;  %vm6861_vm15 = vcmp.lt.s32.totalorder %v4305_v29, 125  ;;  %s7013_s14 = smov 6  }
 0x19d   : > { %v1654_v22 = vadd.f32 %v1652_v63, %v1631_v58  ;;  %v1655_v50 = vadd.f32 %v1653_v48, %v1632_v53  ;;  %v1698_v51 = vmul.f32 %v1691_v43, %v1684_v21  ;;  %v1699_v56 = vmul.f32 %v1695_v55, %v1683_v17  ;;  %v4860_v63 = vld [vmem:[%s6646_s1 + $0x17] ss:$8 sm:$0x3]  ;;  %v4869_v21 = vld [vmem:[%s6646_s1 + $0x20] ss:$8 sm:$0x3] }
 0x19e   : > { %v4708_v26 = vpop.permute.xlu1 %1859  ;;  %v4714_v62 = vpop.permute.xlu0 %1857  ;;  %v1729_v12 = vsel %vm6854_vm0, %v4534_v23, %v4528_v18  ;;  %v1730_v36 = vsel %vm6854_vm0, %v4528_v18, %v4534_v23  ;;  %v1760_v57 = vrot.slane %v3478_v33, %v4311_v1  ;;  %v1764_v11 = vrot.slane %v3478_v33, %v4313_v0 }
 0x19f   : > { %v1677_v32 = vadd.f32 %v1675_v13, %v1654_v22  ;;  %v1678_v45 = vadd.f32 %v1676_v15, %v1655_v50  ;;  %v1721_v38 = vmul.f32 %v1714_v14, %v1707_v27  ;;  %v1722_v60 = vmul.f32 %v1718_v40, %v1706_v20 }
 0x1a0   : > { %2528 = vrot.lane.b32.xlu1 %v4297_v34, %s7007_s12  ;;  %2526 = vrot.lane.b32.xlu0 %v4301_v31, %s7007_s12  ;;  %v467_v23 = vrot.slane %v4801_v37, %v4311_v1  ;;  %v471_v5 = vrot.slane %v4801_v37, %v4313_v0  ;;  %v1752_v7 = vsel %vm6853_vm1, %v4570_v59, %v4564_v19  ;;  %s7011_s12 = smov 25   ;;  %vm6858_vm0 = vcmp.lt.s32.totalorder %v4305_v29, 126 }
 0x1a1   : > { %v1753_v54 = vsel %vm6853_vm1, %v4564_v19, %v4570_v59  ;;  %v1700_v43 = vadd.f32 %v1698_v51, %v1677_v32  ;;  %v1701_v55 = vadd.f32 %v1699_v56, %v1678_v45  ;;  %v1744_v24 = vmul.f32 %v1737_v47, %v1730_v36  ;;  %v3480_v47 = vld [vmem:[%s6646_s1 + $0x84] ss:$8 sm:$0x3]  ;;  %v3481_v32 = vld [vmem:[%s6646_s1 + $0x85] ss:$8 sm:$0x3] }
 0x1a2   : > { %v4744_v2 = vpop.permute.xlu1 %1882  ;;  %v4750_v42 = vpop.permute.xlu0 %1880  ;;  %v1745_v25 = vmul.f32 %v1741_v35, %v1729_v12  ;;  %v491_v19 = vrot.slane %v4820_v30, %v4311_v1  ;;  %v495_v59 = vrot.slane %v4820_v30, %v4313_v0  ;;  %v1777_v48 = vrot.slane %v3479_v4, %v4311_v1  ;;  %v3603_v12 = vld [vmem:[%s3693_s17] sm:$0xff] }
 0x1a3   : > { %v1781_v49 = vrot.slane %v3479_v4, %v4313_v0  ;;  %v1723_v14 = vadd.f32 %v1721_v38, %v1700_v43  ;;  %v1724_v40 = vadd.f32 %v1722_v60, %v1701_v55  ;;  %v1767_v58 = vmul.f32 %v1760_v57, %v1753_v54  ;;  %v3604_v57 = vld [vmem:[%s3693_s17 + $0x8] sm:$0xff]  ;;  %s7012_s17 = smov 7  }
 0x1a4   : > { %2551 = vrot.lane.b32.xlu1 %v4297_v34, %s7008_s11  ;;  %2549 = vrot.lane.b32.xlu0 %v4301_v31, %s7008_s11  ;;  %v1768_v53 = vmul.f32 %v1764_v11, %v1752_v7  ;;  %v515_v15 = vrot.slane %v4844_v28, %v4311_v1  ;;  %v519_v33 = vrot.slane %v4844_v28, %v4313_v0  ;;  %vm6859_vm1 = vcmp.lt.s32.totalorder %v4305_v29, 127  ;;  %v3482_v54 = vld [vmem:[%s6646_s1 + $0x86] ss:$8 sm:$0x3]  ;;  %s7015_s11 = smov 4   ;;  %v7091_v28 = vld [vmem:[#allocation33_spill] sm:$0xff] }
 0x1a5   : > { %v539_v20 = vrot.slane %v4849_v39, %v4311_v1  ;;  %v543_v27 = vrot.slane %v4849_v39, %v4313_v0  ;;  %v563_v35 = vrot.slane %v4860_v63, %v4311_v1  ;;  %v567_v22 = vrot.slane %v4860_v63, %v4313_v0 }
 0x1a6   : > { %v4779_v41 = vpop.permute.xlu1 %1905  ;;  %v4784_v46 = vpop.permute.xlu0 %1903  ;;  %v1746_v50 = vadd.f32 %v1744_v24, %v1723_v14  ;;  %v1747_v51 = vadd.f32 %v1745_v25, %v1724_v40  ;;  %v587_v56 = vrot.slane %v4869_v21, %v4311_v1  ;;  %v1784_v36 = vmul.f32 %v3603_v12, %v1777_v48  ;;  %v3483_v40 = vld [vmem:[%s6646_s1 + $0x87] ss:$8 sm:$0x3]  ;;  %v3484_v12 = vld [vmem:[%s6646_s1 + $0x90] ss:$8 sm:$0x3] }
 0x1a7   : > { %v1785_v11 = vmul.f32 %v3604_v57, %v1781_v49  ;;  %v1800_v4 = vrot.slane %v3480_v47, %v4311_v1  ;;  %v1804_v7 = vrot.slane %v3480_v47, %v4313_v0  ;;  %v1792_v55 = vsel %vm6859_vm1, %v4606_v16, %v4600_v10 }
 0x1a8   : > { %2574 = vrot.lane.b32.xlu1 %v4297_v34, %s7009_s0  ;;  %2572 = vrot.lane.b32.xlu0 %v4301_v31, %s7009_s0  ;;  %s7010_s0 = smov 26   ;;  %v1769_v38 = vadd.f32 %v1767_v58, %v1746_v50  ;;  %v1770_v60 = vadd.f32 %v1768_v53, %v1747_v51  ;;  %v1793_v24 = vsel %vm6859_vm1, %v4600_v10, %v4606_v16  ;;  %vm6862_vm14 = vcmp.lt.s32.totalorder %v4305_v29, 124 }
 0x1a9   : > { %v1823_v25 = vrot.slane %v3481_v32, %v4311_v1  ;;  %v1827_v48 = vrot.slane %v3481_v32, %v4313_v0  ;;  %v1815_v49 = vsel %vm6858_vm0, %v4642_v61, %v4636_v52  ;;  %v1816_v10 = vsel %vm6858_vm0, %v4636_v52, %v4642_v61 }
 0x1aa   : > { %v4815_v44 = vpop.permute.xlu1 %1928  ;;  %v4825_v18 = vpop.permute.xlu0 %1926  ;;  %v1846_v16 = vrot.slane %v3482_v54, %v4311_v1  ;;  %v1850_v14 = vrot.slane %v3482_v54, %v4313_v0  ;;  %v1786_v53 = vadd.f32 %v1784_v36, %v1769_v38  ;;  %v1787_v47 = vadd.f32 %v1785_v11, %v1770_v60  ;;  %v3485_v60 = vld [vmem:[%s6646_s1 + $0x91] ss:$8 sm:$0x3] }
 0x1ab   : > { %v1807_v50 = vmul.f32 %v1800_v4, %v1792_v55  ;;  %v1808_v51 = vmul.f32 %v1804_v7, %v1793_v24  ;;  %vm6864_vm0 = vcmp.lt.s32.totalorder %v4305_v29, 122  ;;  %vm6865_vm1 = vcmp.lt.s32.totalorder %v4305_v29, 121 }
 0x1ac   : > { %2597 = vrot.lane.b32.xlu1 %v4297_v34, %s7010_s0  ;;  %2595 = vrot.lane.b32.xlu0 %v4301_v31, %s7010_s0  ;;  %v1838_v52 = vsel %vm6861_vm15, %v4678_v9, %v4672_v3  ;;  %v1839_v61 = vsel %vm6861_vm15, %v4672_v3, %v4678_v9  ;;  %vm6866_vm12 = vcmp.lt.s32.totalorder %v4305_v29, 103  ;;  %v1830_v36 = vmul.f32 %v1823_v25, %v1815_v49  ;;  %v3486_v49 = vld [vmem:[%s6646_s1 + $0x92] ss:$8 sm:$0x3] }
 0x1ad   : > { %v1831_v11 = vmul.f32 %v1827_v48, %v1816_v10  ;;  %v1869_v32 = vrot.slane %v3483_v40, %v4311_v1  ;;  %v1873_v38 = vrot.slane %v3483_v40, %v4313_v0  ;;  %v1861_v3 = vsel %vm6862_vm14, %v4714_v62, %v4708_v26 }
 0x1ae   : > { %v4864_v17 = vpop.permute.xlu1 %1951  ;;  %v4871_v13 = vpop.permute.xlu0 %1949  ;;  %v1862_v9 = vsel %vm6862_vm14, %v4708_v26, %v4714_v62  ;;  %v1892_v4 = vrot.slane %v3484_v12, %v4311_v1  ;;  %v1896_v7 = vrot.slane %v3484_v12, %v4313_v0  ;;  %vm6867_vm15 = vcmp.lt.s32.totalorder %v4305_v29, 102 }
 0x1af   : > { %v1809_v55 = vadd.f32 %v1807_v50, %v1786_v53  ;;  %v1810_v24 = vadd.f32 %v1808_v51, %v1787_v47  ;;  %v1853_v25 = vmul.f32 %v1846_v16, %v1838_v52  ;;  %v1854_v48 = vmul.f32 %v1850_v14, %v1839_v61  ;;  %v3487_v51 = vld [vmem:[%s6646_s1 + $0x93] ss:$8 sm:$0x3] }
 0x1b0   : > { %2620 = vrot.lane.b32.xlu1 %v4297_v34, %s7011_s12  ;;  %2618 = vrot.lane.b32.xlu0 %v4301_v31, %s7011_s12  ;;  %v1884_v26 = vsel %vm6863_vm13, %v4750_v42, %v4744_v2  ;;  %v1885_v62 = vsel %vm6863_vm13, %v4744_v2, %v4750_v42  ;;  %v1915_v40 = vrot.slane %v3485_v60, %v4311_v1  ;;  %vm6868_vm14 = vcmp.lt.s32.totalorder %v4305_v29, 101 }
 0x1b1   : > { %v1919_v16 = vrot.slane %v3485_v60, %v4313_v0  ;;  %v1832_v14 = vadd.f32 %v1830_v36, %v1809_v55  ;;  %v1833_v53 = vadd.f32 %v1831_v11, %v1810_v24  ;;  %v1876_v47 = vmul.f32 %v1869_v32, %v1861_v3  ;;  %v3488_v60 = vld [vmem:[%s6646_s1 + $0x94] ss:$8 sm:$0x3] }
 0x1b2   : > { %v4900_v45 = vpop.permute.xlu1 %1974  ;;  %v4907_v43 = vpop.permute.xlu0 %1972  ;;  %v1877_v50 = vmul.f32 %v1873_v38, %v1862_v9  ;;  %v1907_v2 = vsel %vm6864_vm0, %v4784_v46, %v4779_v41  ;;  %v1908_v42 = vsel %vm6864_vm0, %v4779_v41, %v4784_v46  ;;  %v1938_v12 = vrot.slane %v3486_v49, %v4311_v1 }
 0x1b3   : > { %v1942_v52 = vrot.slane %v3486_v49, %v4313_v0  ;;  %vm6869_vm13 = vcmp.lt.s32.totalorder %v4305_v29, 100  ;;  %v1855_v36 = vadd.f32 %v1853_v25, %v1832_v14  ;;  %v1856_v11 = vadd.f32 %v1854_v48, %v1833_v53  ;;  %v3489_v48 = vld [vmem:[%s6646_s1 + $0x95] ss:$8 sm:$0x3] }
 0x1b4   : > { %2643 = vrot.lane.b32.xlu1 %v4297_v34, %s7012_s17  ;;  %2641 = vrot.lane.b32.xlu0 %v4301_v31, %s7012_s17  ;;  %v1899_v32 = vmul.f32 %v1892_v4, %v1884_v26  ;;  %v1900_v38 = vmul.f32 %v1896_v7, %v1885_v62  ;;  %v1930_v41 = vsel %vm6865_vm1, %v4825_v18, %v4815_v44  ;;  %vm1003_vm0 = vcmp.lt.s32.totalorder %v4305_v29, 99 }
 0x1b5   : > { %v1931_v46 = vsel %vm6865_vm1, %v4815_v44, %v4825_v18  ;;  %v1961_v9 = vrot.slane %v3487_v51, %v4311_v1  ;;  %v1965_v4 = vrot.slane %v3487_v51, %v4313_v0  ;;  %v1878_v7 = vadd.f32 %v1876_v47, %v1855_v36  ;;  %v3490_v47 = vld [vmem:[%s6646_s1 + $0x96] ss:$8 sm:$0x3] }
 0x1b6   : > { %v4940_v58 = vpop.permute.xlu1 %1997  ;;  %v4945_v57 = vpop.permute.xlu0 %1995  ;;  %v1879_v55 = vadd.f32 %v1877_v50, %v1856_v11  ;;  %v1922_v24 = vmul.f32 %v1915_v40, %v1907_v2  ;;  %v1923_v25 = vmul.f32 %v1919_v16, %v1908_v42  ;;  %v1953_v44 = vsel %vm6866_vm12, %v4871_v13, %v4864_v17  ;;  %v3491_v11 = vld [vmem:[%s6646_s1 + $0x97] ss:$8 sm:$0x3] }
 0x1b7   : > { %v1954_v18 = vsel %vm6866_vm12, %v4864_v17, %v4871_v13  ;;  %v1984_v49 = vrot.slane %v3488_v60, %v4311_v1  ;;  %v1988_v26 = vrot.slane %v3488_v60, %v4313_v0  ;;  %vm1027_vm1 = vcmp.lt.s32.totalorder %v4305_v29, 98 }
 0x1b8   : > { %2666 = vrot.lane.b32.xlu1 %v4297_v34, %s7013_s14  ;;  %2664 = vrot.lane.b32.xlu0 %v4301_v31, %s7013_s14  ;;  %v1901_v40 = vadd.f32 %v1899_v32, %v1878_v7  ;;  %v1902_v16 = vadd.f32 %v1900_v38, %v1879_v55  ;;  %v1945_v14 = vmul.f32 %v1938_v12, %v1930_v41  ;;  %vm1051_vm12 = vcmp.lt.s32.totalorder %v4305_v29, 97  ;;  %v3492_v7 = vld [vmem:[%s6646_s1 + $0xa0] ss:$8 sm:$0x3] }
 0x1b9   : > { %v1946_v53 = vmul.f32 %v1942_v52, %v1931_v46  ;;  %v1976_v17 = vsel %vm6867_vm15, %v4907_v43, %v4900_v45  ;;  %v1977_v13 = vsel %vm6867_vm15, %v4900_v45, %v4907_v43  ;;  %v2007_v51 = vrot.slane %v3489_v48, %v4311_v1 }
 0x1ba   : > { %v4977_v54 = vpop.permute.xlu1 %2020  ;;  %v4983_v10 = vpop.permute.xlu0 %2018  ;;  %v2011_v2 = vrot.slane %v3489_v48, %v4313_v0  ;;  %v1924_v42 = vadd.f32 %v1922_v24, %v1901_v40  ;;  %v1925_v12 = vadd.f32 %v1923_v25, %v1902_v16  ;;  %v1968_v52 = vmul.f32 %v1961_v9, %v1953_v44 }
 0x1bb   : > { %v1969_v36 = vmul.f32 %v1965_v4, %v1954_v18  ;;  %v1999_v45 = vsel %vm6868_vm14, %v4945_v57, %v4940_v58  ;;  %v2000_v43 = vsel %vm6868_vm14, %v4940_v58, %v4945_v57  ;;  %v2030_v32 = vrot.slane %v3490_v47, %v4311_v1 }
 0x1bc   : > { %2689 = vrot.lane.b32.xlu1 %v4297_v34, %s7014_s15  ;;  %2687 = vrot.lane.b32.xlu0 %v4301_v31, %s7014_s15  ;;  %v2034_v38 = vrot.slane %v3490_v47, %v4313_v0  ;;  %vm1075_vm15 = vcmp.lt.s32.totalorder %v4305_v29, 96  ;;  %v1947_v41 = vadd.f32 %v1945_v14, %v1924_v42  ;;  %v1948_v46 = vadd.f32 %v1946_v53, %v1925_v12 }
 0x1bd   : > { %v1991_v9 = vmul.f32 %v1984_v49, %v1976_v17  ;;  %v1992_v4 = vmul.f32 %v1988_v26, %v1977_v13  ;;  %v2022_v58 = vsel %vm6869_vm13, %v4983_v10, %v4977_v54  ;;  %v2023_v57 = vsel %vm6869_vm13, %v4977_v54, %v4983_v10  ;;  %v3493_v26 = vld [vmem:[%s6646_s1 + $0xa1] ss:$8 sm:$0x3] }
 0x1be   : > { %v5013_v61 = vpop.permute.xlu1 %2043  ;;  %v5019_v3 = vpop.permute.xlu0 %2041  ;;  %v2053_v24 = vrot.slane %v3491_v11, %v4311_v1  ;;  %v2057_v25 = vrot.slane %v3491_v11, %v4313_v0  ;;  %vm1099_vm14 = vcmp.lt.s32.totalorder %v4305_v29, 95  ;;  %v1970_v48 = vadd.f32 %v1968_v52, %v1947_v41 }
 0x1bf   : > { %v1971_v44 = vadd.f32 %v1969_v36, %v1948_v46  ;;  %v2014_v18 = vmul.f32 %v2007_v51, %v1999_v45  ;;  %v2015_v49 = vmul.f32 %v2011_v2, %v2000_v43  ;;  %v2045_v54 = vsel %vm1003_vm0, %v5019_v3, %v5013_v61  ;;  %v3494_v51 = vld [vmem:[%s6646_s1 + $0xa2] ss:$8 sm:$0x3]  ;;  %v3495_v43 = vld [vmem:[%s6646_s1 + $0xa3] ss:$8 sm:$0x3] }
 0x1c0   : > { %2712 = vrot.lane.b32.xlu1 %v4297_v34, %s7015_s11  ;;  %2710 = vrot.lane.b32.xlu0 %v4301_v31, %s7015_s11  ;;  %v2046_v10 = vsel %vm1003_vm0, %v5013_v61, %v5019_v3  ;;  %v2076_v40 = vrot.slane %v3492_v7, %v4311_v1  ;;  %v2080_v16 = vrot.slane %v3492_v7, %v4313_v0  ;;  %vm6870_vm13 = vcmp.lt.s32.totalorder %v4305_v29, 94 }
 0x1c1   : > { %v1993_v53 = vadd.f32 %v1991_v9, %v1970_v48  ;;  %v1994_v47 = vadd.f32 %v1992_v4, %v1971_v44  ;;  %v2037_v17 = vmul.f32 %v2030_v32, %v2022_v58  ;;  %v2038_v13 = vmul.f32 %v2034_v38, %v2023_v57  ;;  %v3496_v57 = vld [vmem:[%s6646_s1 + $0xa4] ss:$8 sm:$0x3] }
 0x1c2   : > { %v2067_v62 = vpop.permute.xlu1 %2066  ;;  %v2065_v50 = vpop.permute.xlu0 %2064  ;;  %v2099_v3 = vrot.slane %v3493_v26, %v4311_v1  ;;  %v2103_v12 = vrot.slane %v3493_v26, %v4313_v0  ;;  %v2060_v11 = vmul.f32 %v2053_v24, %v2045_v54  ;;  %v2061_v45 = vmul.f32 %v2057_v25, %v2046_v10  ;;  %v3497_v26 = vld [vmem:[%s6646_s1 + $0xa5] ss:$8 sm:$0x3] }
 0x1c3   : > { %v2068_v42 = vsel %vm1027_vm1, %v2065_v50, %v2067_v62  ;;  %v2069_v61 = vsel %vm1027_vm1, %v2067_v62, %v2065_v50  ;;  %v2016_v52 = vadd.f32 %v2014_v18, %v1993_v53  ;;  %v2017_v36 = vadd.f32 %v2015_v49, %v1994_v47  ;;  %v5161_v53 = vld [vmem:[%s6646_s1 + $0x21] ss:$8 sm:$0x3] }
 0x1c4   : > { %2735 = vrot.lane.b32.xlu1 %v4297_v34, %s7016_s19  ;;  %2733 = vrot.lane.b32.xlu0 %v4301_v31, %s7016_s19  ;;  %v2122_v32 = vrot.slane %v3494_v51, %v4311_v1  ;;  %v2126_v38 = vrot.slane %v3494_v51, %v4313_v0  ;;  %v2083_v4 = vmul.f32 %v2076_v40, %v2068_v42  ;;  %s7135_s19 = smov 90  }
 0x1c5   : > { %v2039_v46 = vadd.f32 %v2037_v17, %v2016_v52  ;;  %v2040_v9 = vadd.f32 %v2038_v13, %v2017_v36  ;;  %v2084_v7 = vmul.f32 %v2080_v16, %v2069_v61  ;;  %v2149_v25 = vrot.slane %v3495_v43, %v4313_v0 }
 0x1c6   : > { %v2090_v60 = vpop.permute.xlu1 %2089  ;;  %v2088_v55 = vpop.permute.xlu0 %2087  ;;  %v2168_v16 = vrot.slane %v3496_v57, %v4311_v1 }
 0x1c7   : > { %v2091_v62 = vsel %vm1051_vm12, %v2088_v55, %v2090_v60  ;;  %v2092_v50 = vsel %vm1051_vm12, %v2090_v60, %v2088_v55  ;;  %v2145_v55 = vrot.slane %v3495_v43, %v4311_v1  ;;  %v2062_v48 = vadd.f32 %v2060_v11, %v2039_v46  ;;  %v3498_v43 = vld [vmem:[%s6646_s1 + $0xa6] ss:$8 sm:$0x3]  ;;  %v5191_v46 = vld [vmem:[%s6646_s1 + $0x23] ss:$8 sm:$0x3] }
 0x1c8   : > { %2758 = vrot.lane.b32.xlu1 %v4297_v34, %s6951_s8  ;;  %2756 = vrot.lane.b32.xlu0 %v4301_v31, %s6951_s8  ;;  %v2063_v44 = vadd.f32 %v2061_v45, %v2040_v9  ;;  %v2106_v18 = vmul.f32 %v2099_v3, %v2091_v62  ;;  %v2107_v49 = vmul.f32 %v2103_v12, %v2092_v50 }
 0x1c9   : > { %v2085_v47 = vadd.f32 %v2083_v4, %v2062_v48  ;;  %v2191_v3 = vrot.slane %v3497_v26, %v4311_v1  ;;  %v2195_v12 = vrot.slane %v3497_v26, %v4313_v0  ;;  %v591_v62 = vrot.slane %v4869_v21, %v4313_v0  ;;  %v3499_v26 = vld [vmem:[%s6646_s1 + $0xa7] ss:$8 sm:$0x3] }
 0x1ca   : > { %v2113_v14 = vpop.permute.xlu1 %2112  ;;  %v2111_v2 = vpop.permute.xlu0 %2110  ;;  %v2086_v17 = vadd.f32 %v2084_v7, %v2063_v44  ;;  %v611_v50 = vrot.slane %v5161_v53, %v4311_v1 }
 0x1cb   : > { %v2114_v24 = vsel %vm1075_vm15, %v2111_v2, %v2113_v14  ;;  %v2115_v60 = vsel %vm1075_vm15, %v2113_v14, %v2111_v2  ;;  %v2172_v14 = vrot.slane %v3496_v57, %v4313_v0  ;;  %v2108_v52 = vadd.f32 %v2106_v18, %v2085_v47  ;;  %v7017_v47 = vld [vmem:[#allocation5_spill] sm:$0xff] }
 0x1cc   : > { %2781 = vrot.lane.b32.xlu1 %v4297_v34, %s6954_s9  ;;  %2779 = vrot.lane.b32.xlu0 %v4301_v31, %s6954_s9  ;;  %v2129_v13 = vmul.f32 %v2122_v32, %v2114_v24  ;;  %v2130_v51 = vmul.f32 %v2126_v38, %v2115_v60  ;;  %v2109_v36 = vadd.f32 %v2107_v49, %v2086_v17  ;;  %v7018_v17 = vld [vmem:[#allocation6_spill] sm:$0xff] }
 0x1cd   : > { %v615_v32 = vrot.slane %v5161_v53, %v4313_v0 }
 0x1ce   : > { %v2136_v41 = vpop.permute.xlu1 %2135  ;;  %v2134_v58 = vpop.permute.xlu0 %2133  ;;  %v2131_v9 = vadd.f32 %v2129_v13, %v2108_v52  ;;  %v2132_v4 = vadd.f32 %v2130_v51, %v2109_v36  ;;  %v197_v13 = vsel %vm195_vm3, %v7018_v17, %v7017_v47  ;;  %v2241_v52 = vrot.slane %v3499_v26, %v4313_v0  ;;  %v5232_v36 = vld [vmem:[%s6646_s1 + $0x24] ss:$8 sm:$0x3] }
 0x1cf   : > { %v2137_v54 = vsel %vm1099_vm14, %v2134_v58, %v2136_v41  ;;  %v2138_v10 = vsel %vm1099_vm14, %v2136_v41, %v2134_v58  ;;  %v5186_v41 = vld [vmem:[%s6646_s1 + $0x22] ss:$8 sm:$0x3] }
 0x1d0   : > { %2821 = vrot.lane.b32.xlu1 %v4297_v34, %s6957_s10  ;;  %2819 = vrot.lane.b32.xlu0 %v4301_v31, %s6957_s10  ;;  %v2152_v11 = vmul.f32 %v2145_v55, %v2137_v54  ;;  %v2153_v45 = vmul.f32 %v2149_v25, %v2138_v10  ;;  %v2214_v55 = vrot.slane %v3498_v43, %v4311_v1 }
 0x1d1   : > { %v2218_v25 = vrot.slane %v3498_v43, %v4313_v0  ;;  %v220_v54 = vsel %vm218_vm2, %v3831_v8, %v3823_v6  ;;  %v635_v10 = vrot.slane %v5186_v41, %v4311_v1 }
 0x1d2   : > { %v2159_v40 = vpop.permute.xlu1 %2158  ;;  %v2157_v2 = vpop.permute.xlu0 %2156  ;;  %v2154_v48 = vadd.f32 %v2152_v11, %v2131_v9  ;;  %v2155_v44 = vadd.f32 %v2153_v45, %v2132_v4  ;;  %v219_v9 = vsel %vm218_vm2, %v3823_v6, %v3831_v8  ;;  %v7019_v4 = vld [vmem:[#allocation91_spill] sm:$0xff]  ;;  %v196_v6 = vsel %vm195_vm3, %v7017_v47, %v7018_v17 }
 0x1d3   : > { %v2160_v42 = vsel %vm6870_vm13, %v2157_v2, %v2159_v40  ;;  %v2161_v61 = vsel %vm6870_vm13, %v2159_v40, %v2157_v2  ;;  %vm6871_vm13 = vcmp.lt.s32.totalorder %v4305_v29, 93 }
 0x1d4   : > { %2844 = vrot.lane.b32.xlu1 %v4297_v34, %s6960_s7  ;;  %2842 = vrot.lane.b32.xlu0 %v4301_v31, %s6960_s7  ;;  %v2175_v7 = vmul.f32 %v2168_v16, %v2160_v42  ;;  %v2176_v58 = vmul.f32 %v2172_v14, %v2161_v61 }
 0x1d6   : > { %v2182_v38 = vpop.permute.xlu1 %2181  ;;  %v2180_v57 = vpop.permute.xlu0 %2179  ;;  %v2177_v51 = vadd.f32 %v2175_v7, %v2154_v48  ;;  %v2178_v2 = vadd.f32 %v2176_v58, %v2155_v44  ;;  %v7020_v7 = vrot.slane %v7019_v4, %v4311_v1  ;;  %v3500_v48 = vld [vmem:[%s6646_s1 + $0xb0] ss:$8 sm:$0x3] }
 0x1d7   : > { %v2183_v24 = vsel %vm6871_vm13, %v2180_v57, %v2182_v38  ;;  %v2184_v60 = vsel %vm6871_vm13, %v2182_v38, %v2180_v57  ;;  %vm6872_vm13 = vcmp.lt.s32.totalorder %v4305_v29, 92  ;;  %v7021_v57 = vld [vmem:[#allocation92_spill] sm:$0xff] }
 0x1d8   : > { %2867 = vrot.lane.b32.xlu1 %v4297_v34, %s6963_s6  ;;  %v2198_v18 = vmul.f32 %v2191_v3, %v2183_v24  ;;  %v2199_v49 = vmul.f32 %v2195_v12, %v2184_v60  ;;  %2865 = vrot.lane.b32.xlu0 %v4301_v31, %s6963_s6  ;;  %v2237_v12 = vrot.slane %v3499_v26, %v4311_v1 }
 0x1d9   : > { %v234_v58 = vmul.f32 %v7020_v7, %v220_v54  ;;  %v7022_v24 = vrot.slane %v7021_v57, %v4311_v1 }
 0x1da   : > { %v2205_v14 = vpop.permute.xlu1 %2204  ;;  %v2203_v42 = vpop.permute.xlu0 %2202  ;;  %v2200_v11 = vadd.f32 %v2198_v18, %v2177_v51  ;;  %v2201_v45 = vadd.f32 %v2199_v49, %v2178_v2  ;;  %v2264_v51 = vrot.slane %v3500_v48, %v4313_v0  ;;  %v7024_v2 = vrot.slane %v7019_v4, %v4313_v0  ;;  %v7052_v49 = vld [vmem:[#allocation97_spill] sm:$0xff] }
 0x1db   : > { %v2206_v61 = vsel %vm6872_vm13, %v2203_v42, %v2205_v14  ;;  %v2207_v3 = vsel %vm6872_vm13, %v2205_v14, %v2203_v42  ;;  %v210_v60 = vmul.f32 %v7022_v24, %v197_v13  ;;  %vm6873_vm13 = vcmp.lt.s32.totalorder %v4305_v29, 91  ;;  %v7029_v24 = vld [vmem:[#allocation10_spill] sm:$0xff] }
 0x1dc   : > { %2890 = vrot.lane.b32.xlu1 %v4297_v34, %s6966_s5  ;;  %v2221_v43 = vmul.f32 %v2214_v55, %v2206_v61  ;;  %v2222_v38 = vmul.f32 %v2218_v25, %v2207_v3  ;;  %2888 = vrot.lane.b32.xlu0 %v4301_v31, %s6966_s5  ;;  %s7023_s5 = smov 123   ;;  %v2260_v13 = vrot.slane %v3500_v48, %v4311_v1 }
 0x1dd   : > { %v235_v42 = vmul.f32 %v7024_v2, %v219_v9  ;;  %v7025_v61 = vrot.slane %v7021_v57, %v4313_v0  ;;  %v7028_v57 = vld [vmem:[#allocation9_spill] sm:$0xff]  ;;  %v7053_v55 = vrot.slane %v7052_v49, %v4311_v1 }
 0x1de   : > { %v2228_v25 = vpop.permute.xlu1 %2227  ;;  %v2223_v8 = vadd.f32 %v2221_v43, %v2200_v11  ;;  %v2224_v44 = vadd.f32 %v2222_v38, %v2201_v45  ;;  %v2226_v18 = vpop.permute.xlu0 %2225  ;;  %v236_v11 = vadd.f32 %v234_v58, %v210_v60  ;;  %v7026_v45 = vld [vmem:[#allocation7_spill] sm:$0xff]  ;;  %v7027_v43 = vld [vmem:[#allocation8_spill] sm:$0xff]  ;;  %v3501_v38 = vld [vmem:[%s6646_s1 + $0xb1] ss:$8 sm:$0x3]  ;;  %v267_v60 = vsel %vm266_vm5, %v7029_v24, %v7028_v57 }
 0x1df   : > { %v2229_v54 = vsel %vm6873_vm13, %v2226_v18, %v2228_v25  ;;  %v2230_v14 = vsel %vm6873_vm13, %v2228_v25, %v2226_v18  ;;  %v211_v3 = vmul.f32 %v7025_v61, %v196_v6  ;;  %v244_v9 = vsel %vm242_vm4, %v7026_v45, %v7027_v43 }
 0x1e0   : > { %2913 = vrot.lane.b32.xlu1 %v4297_v34, %s7023_s5  ;;  %v2244_v47 = vmul.f32 %v2237_v12, %v2229_v54  ;;  %v2245_v17 = vmul.f32 %v2241_v52, %v2230_v14  ;;  %2911 = vrot.lane.b32.xlu0 %v4301_v31, %s7023_s5  ;;  %v243_v12 = vsel %vm242_vm4, %v7027_v43, %v7026_v45  ;;  %vm6874_vm13 = vcmp.lt.s32.totalorder %v4305_v29, 90  ;;  %v7033_v43 = vld [vmem:[#allocation11_spill] sm:$0xff] }
 0x1e1   : > { %v268_v25 = vsel %vm266_vm5, %v7028_v57, %v7029_v24  ;;  %v2283_v18 = vrot.slane %v3501_v38, %v4311_v1  ;;  %v2287_v54 = vrot.slane %v3501_v38, %v4313_v0  ;;  %v237_v14 = vadd.f32 %v235_v42, %v211_v3 }
 0x1e2   : > { %v2251_v52 = vpop.permute.xlu1 %2250  ;;  %v2246_v4 = vadd.f32 %v2244_v47, %v2223_v8  ;;  %v2247_v7 = vadd.f32 %v2245_v17, %v2224_v44  ;;  %v2249_v58 = vpop.permute.xlu0 %2248  ;;  %v7030_v47 = vld [vmem:[#allocation93_spill] sm:$0xff] }
 0x1e3   : > { %v2252_v48 = vsel %vm6874_vm13, %v2249_v58, %v2251_v52  ;;  %v2253_v6 = vsel %vm6874_vm13, %v2251_v52, %v2249_v58  ;;  %v7031_v17 = vrot.slane %v7030_v47, %v4311_v1  ;;  %v7032_v61 = vrot.slane %v7030_v47, %v4313_v0  ;;  %v7034_v52 = vld [vmem:[#allocation12_spill] sm:$0xff]  ;;  %v7035_v58 = vld [vmem:[#allocation94_spill] sm:$0xff] }
 0x1e4   : > { %2936 = vrot.lane.b32.xlu1 %v4297_v34, %s6971_s4  ;;  %v2267_v8 = vmul.f32 %v2260_v13, %v2252_v48  ;;  %v2268_v44 = vmul.f32 %v2264_v51, %v2253_v6  ;;  %2934 = vrot.lane.b32.xlu0 %v4301_v31, %s6971_s4  ;;  %v291_v13 = vsel %vm290_vm6, %v7034_v52, %v7033_v43  ;;  %v5319_v51 = vld [vmem:[%s6646_s1 + $0x25] ss:$8 sm:$0x3]  ;;  %vm1243_vm13 = vcmp.lt.s32.totalorder %v4305_v29, 89 }
 0x1e5   : > { %v258_v2 = vmul.f32 %v7031_v17, %v244_v9  ;;  %v259_v45 = vmul.f32 %v7032_v61, %v243_v12  ;;  %v292_v42 = vsel %vm290_vm6, %v7033_v43, %v7034_v52  ;;  %v7036_v57 = vrot.slane %v7035_v58, %v4311_v1  ;;  %v7038_v61 = vld [vmem:[#allocation95_spill] sm:$0xff] }
 0x1e6   : > { %v2274_v38 = vpop.permute.xlu1 %2273  ;;  %v2269_v3 = vadd.f32 %v2267_v8, %v2246_v4  ;;  %v2270_v12 = vadd.f32 %v2268_v44, %v2247_v7  ;;  %v2272_v9 = vpop.permute.xlu0 %2271  ;;  %v7037_v48 = vrot.slane %v7035_v58, %v4313_v0  ;;  %v7039_v43 = vrot.slane %v7038_v61, %v4311_v1 }
 0x1e7   : > { %v282_v24 = vmul.f32 %v7036_v57, %v268_v25  ;;  %v2275_v47 = vsel %vm1243_vm13, %v2272_v9, %v2274_v38  ;;  %v2276_v17 = vsel %vm1243_vm13, %v2274_v38, %v2272_v9  ;;  %v261_v44 = vadd.f32 %v259_v45, %v237_v14  ;;  %v3502_v57 = vld [vmem:[%s6646_s1 + $0xb2] ss:$8 sm:$0x3] }
 0x1e8   : > { %v283_v6 = vmul.f32 %v7037_v48, %v267_v60  ;;  %2959 = vrot.lane.b32.xlu1 %v4297_v34, %s6974_s30  ;;  %v2290_v25 = vmul.f32 %v2283_v18, %v2275_v47  ;;  %v2291_v8 = vmul.f32 %v2287_v54, %v2276_v17  ;;  %2957 = vrot.lane.b32.xlu0 %v4301_v31, %s6974_s30  ;;  %v3503_v18 = vld [vmem:[%s6646_s1 + $0xb3] ss:$8 sm:$0x3]  ;;  %s7272_s30 = sld [smem:[#allocation103_spill]] }
 0x1e9   : > { %v260_v60 = vadd.f32 %v258_v2, %v236_v11  ;;  %v306_v52 = vmul.f32 %v7039_v43, %v292_v42  ;;  %v7040_v38 = vrot.slane %v7038_v61, %v4313_v0  ;;  %v7041_v54 = vld [vmem:[#allocation13_spill] sm:$0xff]  ;;  %v7042_v11 = vld [vmem:[#allocation14_spill] sm:$0xff]  ;;  %v2308_v43 = vrot.slane %v3502_v57, %v4311_v1 }
 0x1ea   : > { %v2299_v58 = vpop.permute.xlu1 %2298  ;;  %v315_v14 = vsel %vm314_vm7, %v7042_v11, %v7041_v54  ;;  %v316_v2 = vsel %vm314_vm7, %v7041_v54, %v7042_v11  ;;  %v5364_v45 = vadd.f32 %v2290_v25, %v2269_v3  ;;  %v2297_v42 = vpop.permute.xlu0 %2296  ;;  %v285_v47 = vadd.f32 %v283_v6, %v261_v44  ;;  %v7048_v11 = vld [vmem:[#allocation15_spill] sm:$0xff] }
 0x1eb   : > { %v307_v9 = vmul.f32 %v7040_v38, %v291_v13  ;;  %v5366_v13 = vadd.f32 %v2291_v8, %v2270_v12  ;;  %v284_v48 = vadd.f32 %v282_v24, %v260_v60  ;;  %v2300_v17 = vsel %vm195_vm3, %v2297_v42, %v2299_v58  ;;  %v3504_v24 = vld [vmem:[%s6646_s1 + $0xb4] ss:$8 sm:$0x3]  ;;  %v7045_v8 = vld [vmem:[#allocation96_spill] sm:$0xff] }
 0x1ec   : > { %7043 = vst [vmem:[#allocation5_spill] sm:$0xff] %v5364_v45  ;;  %v2301_v61 = vsel %vm195_vm3, %v2299_v58, %v2297_v42  ;;  %2982 = vrot.lane.b32.xlu1 %v4297_v34, %s6975_s16  ;;  %v2312_v38 = vrot.slane %v3502_v57, %v4313_v0  ;;  %2980 = vrot.lane.b32.xlu0 %v4301_v31, %s6975_s16  ;;  %v7049_v42 = vld [vmem:[#allocation16_spill] sm:$0xff]  ;;  %s7140_s16 = smov 89  }
 0x1ed   : > { %7044 = vst [vmem:[#allocation6_spill] sm:$0xff] %v5366_v13  ;;  %v2331_v3 = vrot.slane %v3503_v18, %v4311_v1  ;;  %v2335_v12 = vrot.slane %v3503_v18, %v4313_v0  ;;  %v308_v6 = vadd.f32 %v306_v52, %v284_v48  ;;  %v309_v25 = vadd.f32 %v307_v9, %v285_v47  ;;  %v7050_v9 = vld [vmem:[#allocation17_spill] sm:$0xff]  ;;  %v7051_v48 = vld [vmem:[#allocation18_spill] sm:$0xff] }
 0x1ee   : > { %v7046_v60 = vrot.slane %v7045_v8, %v4311_v1  ;;  %v7047_v58 = vrot.slane %v7045_v8, %v4313_v0  ;;  %v2322_v54 = vpop.permute.xlu1 %2321  ;;  %v339_v18 = vsel %vm338_vm8, %v7049_v42, %v7048_v11  ;;  %v340_v52 = vsel %vm338_vm8, %v7048_v11, %v7049_v42  ;;  %v2320_v47 = vpop.permute.xlu0 %2319  ;;  %v3519_v13 = vld [vmem:[%s6646_s1 + $0xd3] ss:$8 sm:$0x3] }
 0x1ef   : > { %v2323_v8 = vsel %vm218_vm2, %v2320_v47, %v2322_v54  ;;  %v2358_v11 = vrot.slane %v3504_v24, %v4313_v0  ;;  %v2315_v42 = vmul.f32 %v2308_v43, %v2301_v61  ;;  %v2316_v7 = vmul.f32 %v2312_v38, %v2300_v17  ;;  %v3505_v17 = vld [vmem:[%s6646_s1 + $0xb5] ss:$8 sm:$0x3]  ;;  %v7055_v61 = vld [vmem:[#allocation19_spill] sm:$0xff]  ;;  %v7056_v43 = vld [vmem:[#allocation20_spill] sm:$0xff] }
 0x1f0   : > { %v330_v44 = vmul.f32 %v7046_v60, %v316_v2  ;;  %v331_v57 = vmul.f32 %v7047_v58, %v315_v14  ;;  %v363_v2 = vsel %vm362_vm9, %v7051_v48, %v7050_v9  ;;  %v364_v14 = vsel %vm362_vm9, %v7050_v9, %v7051_v48  ;;  %3005 = vrot.lane.b32.xlu1 %v4297_v34, %s6976_s29 }
 0x1f1   : > { %v2324_v60 = vsel %vm218_vm2, %v2322_v54, %v2320_v47  ;;  %v2354_v58 = vrot.slane %v3504_v24, %v4311_v1  ;;  %v2339_v26 = vmul.f32 %v2335_v12, %v2323_v8  ;;  %3003 = vrot.lane.b32.xlu0 %v4301_v31, %s6976_s29  ;;  %v354_v54 = vmul.f32 %v7053_v55, %v340_v52 }
 0x1f2   : > { %v2338_v4 = vmul.f32 %v2331_v3, %v2324_v60  ;;  %v332_v9 = vadd.f32 %v330_v44, %v308_v6  ;;  %v333_v48 = vadd.f32 %v331_v57, %v309_v25  ;;  %v7054_v47 = vrot.slane %v7052_v49, %v4313_v0  ;;  %v2345_v40 = vpop.permute.xlu1 %2344  ;;  %v2343_v24 = vpop.permute.xlu0 %2342  ;;  %v7057_v49 = vld [vmem:[#allocation98_spill] sm:$0xff]  ;;  %v7060_v60 = vld [vmem:[#allocation99_spill] sm:$0xff] }
 0x1f3   : > { %v387_v38 = vsel %vm386_vm10, %v7056_v43, %v7055_v61  ;;  %v388_v3 = vsel %vm386_vm10, %v7055_v61, %v7056_v43  ;;  %v2341_v12 = vadd.f32 %v2339_v26, %v2316_v7  ;;  %v7058_v6 = vrot.slane %v7057_v49, %v4311_v1 }
 0x1f4   : > { %v355_v16 = vmul.f32 %v7054_v47, %v339_v18  ;;  %v2340_v55 = vadd.f32 %v2338_v4, %v2315_v42  ;;  %v7059_v44 = vrot.slane %v7057_v49, %v4313_v0  ;;  %v2346_v18 = vsel %vm242_vm4, %v2343_v24, %v2345_v40  ;;  %3028 = vrot.lane.b32.xlu1 %v4297_v34, %s6977_s28 }
 0x1f5   : > { %v378_v25 = vmul.f32 %v7058_v6, %v364_v14  ;;  %v2347_v52 = vsel %vm242_vm4, %v2345_v40, %v2343_v24  ;;  %v2362_v26 = vmul.f32 %v2358_v11, %v2346_v18  ;;  %3026 = vrot.lane.b32.xlu0 %v4301_v31, %s6977_s28  ;;  %v2377_v7 = vrot.slane %v3505_v17, %v4311_v1  ;;  %v7063_v11 = vld [vmem:[#allocation21_spill] sm:$0xff]  ;;  %v7064_v24 = vld [vmem:[#allocation22_spill] sm:$0xff] }
 0x1f6   : > { %v379_v57 = vmul.f32 %v7059_v44, %v363_v2  ;;  %v2361_v4 = vmul.f32 %v2354_v58, %v2347_v52  ;;  %v2381_v14 = vrot.slane %v3505_v17, %v4313_v0  ;;  %v356_v8 = vadd.f32 %v354_v54, %v332_v9  ;;  %v2368_v43 = vpop.permute.xlu1 %2367  ;;  %v3506_v58 = vld [vmem:[%s6646_s1 + $0xb6] ss:$8 sm:$0x3]  ;;  %v2366_v54 = vpop.permute.xlu0 %2365  ;;  %v7065_v52 = vld [vmem:[#allocation100_spill] sm:$0xff] }
 0x1f7   : > { %v357_v2 = vadd.f32 %v355_v16, %v333_v48  ;;  %v7061_v42 = vrot.slane %v7060_v60, %v4311_v1  ;;  %v7062_v40 = vrot.slane %v7060_v60, %v4313_v0  ;;  %v411_v17 = vsel %vm410_vm11, %v7064_v24, %v7063_v11 }
 0x1f8   : > { %v412_v16 = vsel %vm410_vm11, %v7063_v11, %v7064_v24  ;;  %v2363_v9 = vadd.f32 %v2361_v4, %v2340_v55  ;;  %v2364_v48 = vadd.f32 %v2362_v26, %v2341_v12  ;;  %v2369_v49 = vsel %vm266_vm5, %v2366_v54, %v2368_v43  ;;  %3051 = vrot.lane.b32.xlu1 %v4297_v34, %s6978_s27  ;;  %v7072_v11 = vld [vmem:[#allocation25_spill] sm:$0xff]  ;;  %v7073_v24 = vld [vmem:[#allocation26_spill] sm:$0xff] }
 0x1f9   : > { %v402_v47 = vmul.f32 %v7061_v42, %v388_v3  ;;  %v403_v61 = vmul.f32 %v7062_v40, %v387_v38  ;;  %v380_v3 = vadd.f32 %v378_v25, %v356_v8  ;;  %v381_v38 = vadd.f32 %v379_v57, %v357_v2  ;;  %3049 = vrot.lane.b32.xlu0 %v4301_v31, %s6978_s27  ;;  %v7069_v42 = vld [vmem:[#allocation24_spill] sm:$0xff] }
 0x1fa   : > { %v2370_v6 = vsel %vm266_vm5, %v2368_v43, %v2366_v54  ;;  %v2385_v18 = vmul.f32 %v2381_v14, %v2369_v49  ;;  %v2400_v55 = vrot.slane %v3506_v58, %v4311_v1  ;;  %v2404_v12 = vrot.slane %v3506_v58, %v4313_v0  ;;  %v2391_v60 = vpop.permute.xlu1 %2390  ;;  %v7068_v14 = vld [vmem:[#allocation23_spill] sm:$0xff]  ;;  %v2389_v58 = vpop.permute.xlu0 %2388 }
 0x1fb   : > { %v2384_v44 = vmul.f32 %v2377_v7, %v2370_v6  ;;  %v404_v25 = vadd.f32 %v402_v47, %v380_v3  ;;  %v405_v57 = vadd.f32 %v403_v61, %v381_v38  ;;  %v7066_v4 = vrot.slane %v7065_v52, %v4311_v1  ;;  %v3507_v7 = vld [vmem:[%s6646_s1 + $0xb7] ss:$8 sm:$0x3] }
 0x1fc   : > { %v7067_v8 = vrot.slane %v7065_v52, %v4313_v0  ;;  %vm7070_vm2 = vcmp.lt.s32.totalorder %v4305_v29, 29  ;;  %v2387_v43 = vadd.f32 %v2385_v18, %v2364_v48  ;;  %vm7074_vm4 = vcmp.lt.s32.totalorder %v4305_v29, 28  ;;  %3074 = vrot.lane.b32.xlu1 %v4297_v34, %s6979_s26  ;;  %v7076_v18 = vld [vmem:[#allocation101_spill] sm:$0xff] }
 0x1fd   : > { %v426_v26 = vmul.f32 %v7066_v4, %v412_v16  ;;  %v435_v40 = vsel %vm7070_vm2, %v7069_v42, %v7068_v14  ;;  %vm7071_vm3 = vmmov %vm7070_vm2  ;;  %v2386_v61 = vadd.f32 %v2384_v44, %v2363_v9  ;;  %v2392_v54 = vsel %vm290_vm6, %v2389_v58, %v2391_v60  ;;  %3072 = vrot.lane.b32.xlu0 %v4301_v31, %s6979_s26 }
 0x1fe   : > { %v427_v2 = vmul.f32 %v7067_v8, %v411_v17  ;;  %v436_v47 = vsel %vm7071_vm3, %v7068_v14, %v7069_v42  ;;  %v459_v17 = vsel %vm7074_vm4, %v7073_v24, %v7072_v11  ;;  %vm7075_vm5 = vmmov %vm7074_vm4  ;;  %v2393_v3 = vsel %vm290_vm6, %v2391_v60, %v2389_v58  ;;  %v2414_v14 = vpop.permute.xlu1 %2413  ;;  %v7080_v42 = vld [vmem:[#allocation28_spill] sm:$0xff] }
 0x1ff   : > { %v460_v16 = vsel %vm7075_vm5, %v7072_v11, %v7073_v24  ;;  %v2407_v9 = vmul.f32 %v2400_v55, %v2393_v3  ;;  %v2408_v48 = vmul.f32 %v2404_v12, %v2392_v54  ;;  %v2423_v38 = vrot.slane %v3507_v7, %v4311_v1  ;;  %v3508_v55 = vld [vmem:[%s6646_s1 + $0xc0] ss:$8 sm:$0x3]  ;;  %v3509_v3 = vld [vmem:[%s6646_s1 + $0xc1] ss:$8 sm:$0x3] }
 0x200   : > { %v2427_v49 = vrot.slane %v3507_v7, %v4313_v0  ;;  %v428_v6 = vadd.f32 %v426_v26, %v404_v25  ;;  %v429_v44 = vadd.f32 %v427_v2, %v405_v57  ;;  %v7077_v52 = vrot.slane %v7076_v18, %v4311_v1  ;;  %v7079_v12 = vld [vmem:[#allocation27_spill] sm:$0xff]  ;;  %v2412_v2 = vpop.permute.xlu0 %2411  ;;  %3097 = vrot.lane.b32.xlu1 %v4297_v34, %s6980_s25 }
 0x201   : > { %v7078_v8 = vrot.slane %v7076_v18, %v4313_v0  ;;  %vm7081_vm6 = vcmp.lt.s32.totalorder %v4305_v29, 27  ;;  %v2409_v57 = vadd.f32 %v2407_v9, %v2386_v61  ;;  %v2410_v26 = vadd.f32 %v2408_v48, %v2387_v43  ;;  %3095 = vrot.lane.b32.xlu0 %v4301_v31, %s6980_s25  ;;  %v7083_v9 = vld [vmem:[#allocation29_spill] sm:$0xff]  ;;  %v7084_v48 = vld [vmem:[#allocation30_spill] sm:$0xff] }
 0x202   : > { %v450_v4 = vmul.f32 %v7077_v52, %v436_v47  ;;  %v483_v7 = vsel %vm7081_vm6, %v7080_v42, %v7079_v12  ;;  %vm7082_vm2 = vmmov %vm7081_vm6  ;;  %v475_v47 = vmul.f32 %v471_v5, %v459_v17  ;;  %v2415_v58 = vsel %vm314_vm7, %v2412_v2, %v2414_v14  ;;  %v2437_v54 = vpop.permute.xlu1 %2436 }
 0x203   : > { %v451_v60 = vmul.f32 %v7078_v8, %v435_v40  ;;  %v484_v25 = vsel %vm7082_vm2, %v7079_v12, %v7080_v42  ;;  %v474_v40 = vmul.f32 %v467_v23, %v460_v16  ;;  %v2416_v11 = vsel %vm314_vm7, %v2414_v14, %v2412_v2  ;;  %v7088_v2 = vld [vmem:[#allocation32_spill] sm:$0xff] }
 0x204   : > { %v2430_v61 = vmul.f32 %v2423_v38, %v2416_v11  ;;  %v2431_v43 = vmul.f32 %v2427_v49, %v2415_v58  ;;  %v2446_v23 = vrot.slane %v3508_v55, %v4311_v1  ;;  %v2450_v24 = vrot.slane %v3508_v55, %v4313_v0  ;;  %3120 = vrot.lane.b32.xlu1 %v4297_v34, %s6981_s24 }
 0x205   : > { %v452_v37 = vadd.f32 %v450_v4, %v428_v6  ;;  %v453_v5 = vadd.f32 %v451_v60, %v429_v44  ;;  %v498_v17 = vmul.f32 %v491_v19, %v484_v25  ;;  %v499_v16 = vmul.f32 %v495_v59, %v483_v7  ;;  %v2435_v44 = vpop.permute.xlu0 %2434  ;;  %3118 = vrot.lane.b32.xlu0 %v4301_v31, %s6981_s24 }
 0x206   : > { %vm7085_vm7 = vcmp.lt.s32.totalorder %v4305_v29, 26  ;;  %v2432_v19 = vadd.f32 %v2430_v61, %v2409_v57  ;;  %v2433_v6 = vadd.f32 %v2431_v43, %v2410_v26  ;;  %v2438_v18 = vsel %vm338_vm8, %v2435_v44, %v2437_v54  ;;  %v2460_v25 = vpop.permute.xlu1 %2459  ;;  %v3510_v57 = vld [vmem:[%s6646_s1 + $0xc2] ss:$8 sm:$0x3] }
 0x207   : > { %v507_v38 = vsel %vm7085_vm7, %v7084_v48, %v7083_v9  ;;  %vm7086_vm3 = vmmov %vm7085_vm7  ;;  %v476_v30 = vadd.f32 %v474_v40, %v452_v37  ;;  %v477_v59 = vadd.f32 %v475_v47, %v453_v5  ;;  %v2439_v52 = vsel %vm338_vm8, %v2437_v54, %v2435_v44  ;;  %v7087_v26 = vld [vmem:[#allocation31_spill] sm:$0xff] }
 0x208   : > { %v508_v49 = vsel %vm7086_vm3, %v7083_v9, %v7084_v48  ;;  %v2453_v4 = vmul.f32 %v2446_v23, %v2439_v52  ;;  %v2454_v8 = vmul.f32 %v2450_v24, %v2438_v18  ;;  %v2469_v60 = vrot.slane %v3509_v3, %v4311_v1  ;;  %3143 = vrot.lane.b32.xlu1 %v4297_v34, %s6982_s23 }
 0x209   : > { %v2473_v14 = vrot.slane %v3509_v3, %v4313_v0  ;;  %v500_v55 = vadd.f32 %v498_v17, %v476_v30  ;;  %v501_v12 = vadd.f32 %v499_v16, %v477_v59  ;;  %v522_v42 = vmul.f32 %v515_v15, %v508_v49  ;;  %v2458_v11 = vpop.permute.xlu0 %2457  ;;  %3141 = vrot.lane.b32.xlu0 %v4301_v31, %s6982_s23  ;;  %v3511_v49 = vld [vmem:[%s6646_s1 + $0xc3] ss:$8 sm:$0x3] }
 0x20a   : > { %v523_v7 = vmul.f32 %v519_v33, %v507_v38  ;;  %vm7089_vm8 = vcmp.lt.s32.totalorder %v4305_v29, 25  ;;  %v2455_v15 = vadd.f32 %v2453_v4, %v2432_v19  ;;  %v2456_v58 = vadd.f32 %v2454_v8, %v2433_v6  ;;  %v7092_v33 = vld [vmem:[#allocation34_spill] sm:$0xff]  ;;  %v2483_v38 = vpop.permute.xlu1 %2482  ;;  %v7095_v19 = vld [vmem:[#allocation35_spill] sm:$0xff]  ;;  %v7096_v6 = vld [vmem:[#allocation36_spill] sm:$0xff] }
 0x20b   : > { %v531_v40 = vsel %vm7089_vm8, %v7088_v2, %v7087_v26  ;;  %vm7090_vm4 = vmmov %vm7089_vm8  ;;  %vm7093_vm5 = vcmp.lt.s32.totalorder %v4305_v29, 7  ;;  %v2461_v23 = vsel %vm362_vm9, %v2458_v11, %v2460_v25  ;;  %v2462_v24 = vsel %vm362_vm9, %v2460_v25, %v2458_v11  ;;  %v7099_v25 = vld [vmem:[#allocation37_spill] sm:$0xff] }
 0x20c   : > { %v532_v47 = vsel %vm7090_vm4, %v7087_v26, %v7088_v2  ;;  %v555_v61 = vsel %vm7093_vm5, %v7092_v33, %v7091_v28  ;;  %vm7094_vm6 = vmmov %vm7093_vm5  ;;  %v2476_v37 = vmul.f32 %v2469_v60, %v2462_v24  ;;  %v2477_v5 = vmul.f32 %v2473_v14, %v2461_v23  ;;  %3166 = vrot.lane.b32.xlu1 %v4297_v34, %s6983_s22  ;;  %v7103_v24 = vld [vmem:[#allocation39_spill] sm:$0xff] }
 0x20d   : > { %v556_v43 = vsel %vm7094_vm6, %v7091_v28, %v7092_v33  ;;  %v2492_v17 = vrot.slane %v3510_v57, %v4311_v1  ;;  %v2496_v16 = vrot.slane %v3510_v57, %v4313_v0  ;;  %v524_v54 = vadd.f32 %v522_v42, %v500_v55  ;;  %v2481_v18 = vpop.permute.xlu0 %2480  ;;  %3164 = vrot.lane.b32.xlu0 %v4301_v31, %s6983_s22  ;;  %v7100_v57 = vld [vmem:[#allocation38_spill] sm:$0xff] }
 0x20e   : > { %v525_v3 = vadd.f32 %v523_v7, %v501_v12  ;;  %v546_v9 = vmul.f32 %v539_v20, %v532_v47  ;;  %v547_v48 = vmul.f32 %v543_v27, %v531_v40  ;;  %vm7097_vm9 = vcmp.lt.s32.totalorder %v4305_v29, 6  ;;  %v2506_v42 = vpop.permute.xlu1 %2505  ;;  %v3512_v7 = vld [vmem:[%s6646_s1 + $0xc4] ss:$8 sm:$0x3] }
 0x20f   : > { %v579_v44 = vsel %vm7097_vm9, %v7096_v6, %v7095_v19  ;;  %vm7098_vm2 = vmmov %vm7097_vm9  ;;  %v2478_v20 = vadd.f32 %v2476_v37, %v2455_v15  ;;  %v2479_v59 = vadd.f32 %v2477_v5, %v2456_v58  ;;  %v570_v39 = vmul.f32 %v563_v35, %v556_v43  ;;  %v7104_v37 = vld [vmem:[#allocation40_spill] sm:$0xff] }
 0x210   : > { %v580_v30 = vsel %vm7098_vm2, %v7095_v19, %v7096_v6  ;;  %v571_v27 = vmul.f32 %v567_v22, %v555_v61  ;;  %v2484_v52 = vsel %vm386_vm10, %v2481_v18, %v2483_v38  ;;  %v2485_v4 = vsel %vm386_vm10, %v2483_v38, %v2481_v18  ;;  %3189 = vrot.lane.b32.xlu1 %v4297_v34, %s6984_s21  ;;  %v7107_v38 = vld [vmem:[#allocation41_spill] sm:$0xff] }
 0x211   : > { %v2499_v8 = vmul.f32 %v2492_v17, %v2485_v4  ;;  %v2500_v60 = vmul.f32 %v2496_v16, %v2484_v52  ;;  %v2515_v35 = vrot.slane %v3511_v49, %v4311_v1  ;;  %v2519_v14 = vrot.slane %v3511_v49, %v4313_v0  ;;  %v2504_v47 = vpop.permute.xlu0 %2503  ;;  %3187 = vrot.lane.b32.xlu0 %v4301_v31, %s6984_s21  ;;  %v7108_v49 = vld [vmem:[#allocation42_spill] sm:$0xff]  ;;  %v7114_v52 = vld [vmem:[#allocation43_spill] sm:$0xff]  ;;  %v7115_v4 = vld [vmem:[#allocation44_spill] sm:$0xff] }
 0x212   : > { %v548_v63 = vadd.f32 %v546_v9, %v524_v54  ;;  %v549_v22 = vadd.f32 %v547_v48, %v525_v3  ;;  %v594_v55 = vmul.f32 %v587_v56, %v580_v30  ;;  %v595_v12 = vmul.f32 %v591_v62, %v579_v44  ;;  %v2529_v16 = vpop.permute.xlu1 %2528 }
 0x213   : > { %vm7101_vm10 = vcmp.lt.s32.totalorder %v4305_v29, 5  ;;  %v2501_v56 = vadd.f32 %v2499_v8, %v2478_v20  ;;  %v2502_v40 = vadd.f32 %v2500_v60, %v2479_v59  ;;  %v2507_v15 = vsel %vm410_vm11, %v2504_v47, %v2506_v42 }
 0x214   : > { %v603_v26 = vsel %vm7101_vm10, %v7100_v57, %v7099_v25  ;;  %vm7102_vm7 = vmmov %vm7101_vm10  ;;  %v572_v21 = vadd.f32 %v570_v39, %v548_v63  ;;  %v573_v62 = vadd.f32 %v571_v27, %v549_v22  ;;  %v2508_v58 = vsel %vm410_vm11, %v2506_v42, %v2504_v47  ;;  %3212 = vrot.lane.b32.xlu1 %v4297_v34, %s6985_s20  ;;  %v3434_v22 = vld [vmem:[%s6646_s1 + $0x26] ss:$8 sm:$0x3] }
 0x215   : > { %v604_v2 = vsel %vm7102_vm7, %v7099_v25, %v7100_v57  ;;  %v2522_v11 = vmul.f32 %v2515_v35, %v2508_v58  ;;  %v2523_v28 = vmul.f32 %v2519_v14, %v2507_v15  ;;  %v2538_v33 = vrot.slane %v3512_v7, %v4311_v1  ;;  %3210 = vrot.lane.b32.xlu0 %v4301_v31, %s6985_s20  ;;  %v7121_v25 = vld [vmem:[#allocation46_spill] sm:$0xff] }
 0x216   : > { %v2542_v61 = vrot.slane %v3512_v7, %v4313_v0  ;;  %v618_v43 = vmul.f32 %v611_v50, %v604_v2  ;;  %v619_v23 = vmul.f32 %v615_v32, %v603_v26  ;;  %vm7105_vm11 = vcmp.lt.s32.totalorder %v4305_v29, 4  ;;  %v2527_v50 = vpop.permute.xlu0 %2526  ;;  %v5709_v60 = vpop.permute.xlu1 %2551  ;;  %v7120_v7 = vld [vmem:[#allocation45_spill] sm:$0xff] }
 0x217   : > { %v627_v5 = vsel %vm7105_vm11, %v7104_v37, %v7103_v24  ;;  %vm7106_vm3 = vmmov %vm7105_vm11  ;;  %v596_v54 = vadd.f32 %v594_v55, %v572_v21  ;;  %v597_v3 = vadd.f32 %v595_v12, %v573_v62  ;;  %v2524_v9 = vadd.f32 %v2522_v11, %v2501_v56 }
 0x218   : > { %v628_v17 = vsel %vm7106_vm3, %v7103_v24, %v7104_v37  ;;  %v2525_v48 = vadd.f32 %v2523_v28, %v2502_v40  ;;  %vm7109_vm8 = vcmp.lt.s32.totalorder %v4305_v29, 3  ;;  %vm7111_vm5 = vcmp.lt.s32.totalorder %v4305_v29, 29  ;;  %3235 = vrot.lane.b32.xlu1 %v4297_v34, %s6986_s18 }
 0x219   : > { %v651_v53 = vsel %vm7109_vm8, %v7108_v49, %v7107_v38  ;;  %vm7110_vm4 = vmmov %vm7109_vm8  ;;  %v2530_v19 = vsel %vm7111_vm5, %v2527_v50, %v2529_v16  ;;  %v642_v44 = vmul.f32 %v635_v10, %v628_v17  ;;  %v7113_v30 = vrot.slane %v5186_v41, %v4313_v0  ;;  %3233 = vrot.lane.b32.xlu0 %v4301_v31, %s6986_s18  ;;  %s7128_s18 = smov 91   ;;  %v7129_v17 = vld [vmem:[#allocation4_spill] sm:$0xff] }
 0x21a   : > { %v652_v32 = vsel %vm7110_vm4, %v7107_v38, %v7108_v49  ;;  %vm7112_vm6 = vmmov %vm7111_vm5  ;;  %v2546_v18 = vmul.f32 %v2542_v61, %v2530_v19  ;;  %v620_v39 = vadd.f32 %v618_v43, %v596_v54  ;;  %v621_v27 = vadd.f32 %v619_v23, %v597_v3  ;;  %v5724_v42 = vpop.permute.xlu0 %2549  ;;  %v5746_v58 = vpop.permute.xlu1 %2574  ;;  %v3435_v23 = vld [vmem:[%s6646_s1 + $0x27] ss:$8 sm:$0x3] }
 0x21b   : > { %v2531_v6 = vsel %vm7112_vm6, %v2529_v16, %v2527_v50  ;;  %v643_v20 = vmul.f32 %v7113_v30, %v627_v5  ;;  %vm7116_vm9 = vcmp.lt.s32.totalorder %v4305_v29, 2  ;;  %v7118_v41 = vrot.slane %v5191_v46, %v4311_v1  ;;  %v7130_v38 = vld [vmem:[#allocation3_spill] sm:$0xff]  ;;  %v7132_v19 = vld [vmem:[#allocation48_spill] sm:$0xff] }
 0x21c   : > { %v2545_v59 = vmul.f32 %v2538_v33, %v2531_v6  ;;  %v675_v8 = vsel %vm7116_vm9, %v7115_v4, %v7114_v52  ;;  %vm7117_vm2 = vmmov %vm7116_vm9  ;;  %v7119_v14 = vrot.slane %v5191_v46, %v4313_v0  ;;  %v5722_v12 = vadd.f32 %v2546_v18, %v2525_v48  ;;  %3258 = vrot.lane.b32.xlu1 %v4297_v34, %s7128_s18  ;;  %v7136_v18 = vld [vmem:[#allocation49_spill] sm:$0xff] }
 0x21d   : > { %v676_v10 = vsel %vm7117_vm2, %v7114_v52, %v7115_v4  ;;  %v666_v35 = vmul.f32 %v7118_v41, %v652_v32  ;;  %vm7122_vm10 = vcmp.lt.s32.totalorder %v4305_v29, 1  ;;  %v644_v26 = vadd.f32 %v642_v44, %v620_v39  ;;  %3256 = vrot.lane.b32.xlu0 %v4301_v31, %s7128_s18  ;;  %v7131_v32 = vld [vmem:[#allocation47_spill] sm:$0xff]  ;;  %v7137_v39 = vld [vmem:[#allocation50_spill] sm:$0xff] }
 0x21e   : > { %v667_v63 = vmul.f32 %v7119_v14, %v651_v53  ;;  %v5720_v55 = vadd.f32 %v2545_v59, %v2524_v9  ;;  %v699_v57 = vsel %vm7122_vm10, %v7121_v25, %v7120_v7  ;;  %vm7123_vm7 = vmmov %vm7122_vm10  ;;  %v645_v2 = vadd.f32 %v643_v20, %v621_v27  ;;  %v5757_v24 = vpop.permute.xlu0 %2572  ;;  %v5768_v3 = vpop.permute.xlu1 %2597  ;;  %v3437_v59 = vld [vmem:[%s6646_s1 + $0x31] ss:$8 sm:$0x3]  ;;  %v3438_v14 = vld [vmem:[%s6646_s1 + $0x32] ss:$8 sm:$0x3] }
 0x21f   : > { %v700_v46 = vsel %vm7123_vm7, %v7120_v7, %v7121_v25  ;;  %v7124_v56 = vrot.slane %v5232_v36, %v4311_v1  ;;  %v7125_v47 = vrot.slane %v5232_v36, %v4313_v0  ;;  %v724_v62 = vrot.slane %v3434_v22, %v4311_v1 }
 0x220   : > { %v728_v15 = vrot.slane %v3434_v22, %v4313_v0  ;;  %v668_v11 = vadd.f32 %v666_v35, %v644_v26  ;;  %v669_v28 = vadd.f32 %v667_v63, %v645_v2  ;;  %v7126_v33 = vrot.slane %v5319_v51, %v4311_v1  ;;  %3281 = vrot.lane.b32.xlu1 %v4297_v34, %s7135_s19  ;;  %v7142_v26 = vld [vmem:[#allocation52_spill] sm:$0xff] }
 0x221   : > { %v690_v40 = vmul.f32 %v7124_v56, %v676_v10  ;;  %v691_v21 = vmul.f32 %v7125_v47, %v675_v8  ;;  %v7127_v43 = vrot.slane %v5319_v51, %v4313_v0  ;;  %v748_v54 = vrot.slane %v3435_v23, %v4311_v1  ;;  %v3436_v51 = vld [vmem:[%s6646_s1 + $0x30] ss:$8 sm:$0x3]  ;;  %3279 = vrot.lane.b32.xlu0 %v4301_v31, %s7135_s19  ;;  %s7271_s19 = sshll.u32 %s7275_s13, 4 }
 0x222   : > { %v714_v61 = vmul.f32 %v7126_v33, %v700_v46  ;;  %v732_v16 = vmul.f32 %v728_v15, %v7129_v17  ;;  %v752_v50 = vrot.slane %v3435_v23, %v4313_v0  ;;  %v731_v49 = vmul.f32 %v724_v62, %v7130_v38  ;;  %v5772_v53 = vpop.permute.xlu0 %2595  ;;  %v5799_v4 = vpop.permute.xlu1 %2620  ;;  %v7141_v46 = vld [vmem:[#allocation51_spill] sm:$0xff]  ;;  %v7146_v33 = vld [vmem:[#allocation54_spill] sm:$0xff]  ;;  %v7150_v38 = vld [vmem:[#allocation56_spill] sm:$0xff]  ;;  %s170_s9 = scalar_lea.vmem %s7272_s30, %s7271_s19 }
 0x223   : > { %v715_v36 = vmul.f32 %v7127_v43, %v699_v57  ;;  %v692_v37 = vadd.f32 %v690_v40, %v668_v11  ;;  %v693_v5 = vadd.f32 %v691_v21, %v669_v28  ;;  %vm7133_vm11 = vcmp.lt.s32.totalorder %v4305_v29, 127  ;;  %v3439_v21 = vld [vmem:[%s6646_s1 + $0x33] ss:$8 sm:$0x3] }
 0x224   : > { %v740_v6 = vsel %vm7133_vm11, %v7132_v19, %v7131_v32  ;;  %vm7134_vm3 = vmmov %vm7133_vm11  ;;  %v772_v30 = vrot.slane %v3436_v51, %v4311_v1  ;;  %v776_v20 = vrot.slane %v3436_v51, %v4313_v0  ;;  %vm7138_vm8 = vcmp.lt.s32.totalorder %v4305_v29, 126  ;;  %3304 = vrot.lane.b32.xlu1 %v4297_v34, %s7140_s16  ;;  %v7145_v28 = vld [vmem:[#allocation53_spill] sm:$0xff] }
 0x225   : > { %v716_v9 = vadd.f32 %v714_v61, %v692_v37  ;;  %v717_v48 = vadd.f32 %v715_v36, %v693_v5  ;;  %v741_v44 = vsel %vm7134_vm3, %v7131_v32, %v7132_v19  ;;  %v764_v27 = vsel %vm7138_vm8, %v7137_v39, %v7136_v18  ;;  %vm7139_vm4 = vmmov %vm7138_vm8  ;;  %3302 = vrot.lane.b32.xlu0 %v4301_v31, %s7140_s16  ;;  %v3440_v5 = vld [vmem:[%s6646_s1 + $0x34] ss:$8 sm:$0x3] }
 0x226   : > { %v765_v52 = vsel %vm7139_vm4, %v7136_v18, %v7137_v39  ;;  %v755_v41 = vmul.f32 %v748_v54, %v740_v6  ;;  %v756_v35 = vmul.f32 %v752_v50, %v741_v44  ;;  %v5804_v63 = vpop.permute.xlu0 %2618  ;;  %v796_v22 = vrot.slane %v3437_v59, %v4311_v1  ;;  %v5825_v62 = vpop.permute.xlu1 %2643  ;;  %v7149_v50 = vld [vmem:[#allocation55_spill] sm:$0xff]  ;;  %v7153_v39 = vld [vmem:[#allocation57_spill] sm:$0xff] }
 0x227   : > { %v734_v8 = vadd.f32 %v732_v16, %v717_v48  ;;  %v733_v10 = vadd.f32 %v731_v49, %v716_v9  ;;  %v800_v7 = vrot.slane %v3437_v59, %v4313_v0  ;;  %v779_v25 = vmul.f32 %v772_v30, %v764_v27  ;;  %v3441_v30 = vld [vmem:[%s6646_s1 + $0x35] ss:$8 sm:$0x3] }
 0x228   : > { %v780_v57 = vmul.f32 %v776_v20, %v765_v52  ;;  %vm7143_vm5 = vcmp.lt.s32.totalorder %v4305_v29, 125  ;;  %v820_v40 = vrot.slane %v3438_v14, %v4311_v1  ;;  %v824_v47 = vrot.slane %v3438_v14, %v4313_v0  ;;  %v7154_v27 = vld [vmem:[#allocation58_spill] sm:$0xff] }
 0x229   : > { %v788_v2 = vsel %vm7143_vm5, %v7142_v26, %v7141_v46  ;;  %vm7144_vm6 = vmmov %vm7143_vm5  ;;  %v757_v15 = vadd.f32 %v755_v41, %v733_v10  ;;  %v758_v11 = vadd.f32 %v756_v35, %v734_v8  ;;  %vm7147_vm9 = vcmp.lt.s32.totalorder %v4305_v29, 124  ;;  %v3442_v35 = vld [vmem:[%s6646_s1 + $0x36] ss:$8 sm:$0x3] }
 0x22a   : > { %v789_v56 = vsel %vm7144_vm6, %v7141_v46, %v7142_v26  ;;  %v812_v61 = vsel %vm7147_vm9, %v7146_v33, %v7145_v28  ;;  %vm7148_vm2 = vmmov %vm7147_vm9  ;;  %v5835_v36 = vpop.permute.xlu0 %2641  ;;  %v803_v23 = vmul.f32 %v796_v22, %v788_v2  ;;  %v844_v54 = vrot.slane %v3439_v21, %v4311_v1  ;;  %v5850_v19 = vpop.permute.xlu1 %2666  ;;  %v7157_v2 = vld [vmem:[#allocation59_spill] sm:$0xff] }
 0x22b   : > { %v813_v43 = vsel %vm7148_vm2, %v7145_v28, %v7146_v33  ;;  %v804_v37 = vmul.f32 %v800_v7, %v789_v56  ;;  %v781_v17 = vadd.f32 %v779_v25, %v757_v15  ;;  %v782_v16 = vadd.f32 %v780_v57, %v758_v11  ;;  %v7158_v56 = vld [vmem:[#allocation60_spill] sm:$0xff]  ;;  %v3443_v28 = vld [vmem:[%s6646_s1 + $0x37] ss:$8 sm:$0x3] }
 0x22c   : > { %v848_v51 = vrot.slane %v3439_v21, %v4313_v0  ;;  %v827_v9 = vmul.f32 %v820_v40, %v812_v61  ;;  %v828_v48 = vmul.f32 %v824_v47, %v813_v43  ;;  %vm7151_vm10 = vcmp.lt.s32.totalorder %v4305_v29, 123  ;;  %v7161_v43 = vld [vmem:[#allocation61_spill] sm:$0xff] }
 0x22d   : > { %v836_v49 = vsel %vm7151_vm10, %v7150_v38, %v7149_v50  ;;  %vm7152_vm7 = vmmov %vm7151_vm10  ;;  %v868_v6 = vrot.slane %v3440_v5, %v4311_v1  ;;  %v872_v44 = vrot.slane %v3440_v5, %v4313_v0  ;;  %v805_v59 = vadd.f32 %v803_v23, %v781_v17  ;;  %v7162_v23 = vld [vmem:[#allocation62_spill] sm:$0xff] }
 0x22e   : > { %v837_v32 = vsel %vm7152_vm7, %v7149_v50, %v7150_v38  ;;  %v5857_v20 = vpop.permute.xlu0 %2664  ;;  %v806_v18 = vadd.f32 %v804_v37, %v782_v16  ;;  %vm7155_vm11 = vcmp.lt.s32.totalorder %v4305_v29, 122  ;;  %v851_v10 = vmul.f32 %v844_v54, %v836_v49  ;;  %v5872_v57 = vpop.permute.xlu1 %2689  ;;  %v3444_v54 = vld [vmem:[%s6646_s1 + $0x40] ss:$8 sm:$0x3] }
 0x22f   : > { %v860_v52 = vsel %vm7155_vm11, %v7154_v27, %v7153_v39  ;;  %vm7156_vm3 = vmmov %vm7155_vm11  ;;  %v852_v41 = vmul.f32 %v848_v51, %v837_v32  ;;  %v829_v14 = vadd.f32 %v827_v9, %v805_v59  ;;  %v892_v7 = vrot.slane %v3441_v30, %v4311_v1 }
 0x230   : > { %v861_v8 = vsel %vm7156_vm3, %v7153_v39, %v7154_v27  ;;  %v830_v22 = vadd.f32 %v828_v48, %v806_v18  ;;  %v896_v25 = vrot.slane %v3441_v30, %v4313_v0  ;;  %v875_v46 = vmul.f32 %v868_v6, %v860_v52  ;;  %v7166_v30 = vld [vmem:[#allocation64_spill] sm:$0xff] }
 0x231   : > { %v876_v26 = vmul.f32 %v872_v44, %v861_v8  ;;  %vm7159_vm8 = vcmp.lt.s32.totalorder %v4305_v29, 121  ;;  %v916_v15 = vrot.slane %v3442_v35, %v4311_v1  ;;  %v920_v11 = vrot.slane %v3442_v35, %v4313_v0  ;;  %v7165_v44 = vld [vmem:[#allocation63_spill] sm:$0xff]  ;;  %v7170_v35 = vld [vmem:[#allocation66_spill] sm:$0xff] }
 0x232   : > { %v884_v40 = vsel %vm7159_vm8, %v7158_v56, %v7157_v2  ;;  %vm7160_vm4 = vmmov %vm7159_vm8  ;;  %v5882_v21 = vpop.permute.xlu0 %2687  ;;  %v853_v33 = vadd.f32 %v851_v10, %v829_v14  ;;  %v854_v61 = vadd.f32 %v852_v41, %v830_v22  ;;  %vm7163_vm5 = vcmp.lt.s32.totalorder %v4305_v29, 103  ;;  %v5900_v51 = vpop.permute.xlu1 %2712  ;;  %v3445_v52 = vld [vmem:[%s6646_s1 + $0x41] ss:$8 sm:$0x3]  ;;  %v7169_v41 = vld [vmem:[#allocation65_spill] sm:$0xff] }
 0x233   : > { %v885_v47 = vsel %vm7160_vm4, %v7157_v2, %v7158_v56  ;;  %v908_v37 = vsel %vm7163_vm5, %v7162_v23, %v7161_v43  ;;  %vm7164_vm6 = vmmov %vm7163_vm5  ;;  %v899_v17 = vmul.f32 %v892_v7, %v884_v40  ;;  %v940_v50 = vrot.slane %v3443_v28, %v4311_v1 }
 0x234   : > { %v909_v5 = vsel %vm7164_vm6, %v7161_v43, %v7162_v23  ;;  %v900_v16 = vmul.f32 %v896_v25, %v885_v47  ;;  %v877_v9 = vadd.f32 %v875_v46, %v853_v33  ;;  %v878_v48 = vadd.f32 %v876_v26, %v854_v61  ;;  %v3446_v26 = vld [vmem:[%s6646_s1 + $0x42] ss:$8 sm:$0x3] }
 0x235   : > { %v944_v38 = vrot.slane %v3443_v28, %v4313_v0  ;;  %v923_v32 = vmul.f32 %v916_v15, %v908_v37  ;;  %v924_v6 = vmul.f32 %v920_v11, %v909_v5  ;;  %vm7167_vm9 = vcmp.lt.s32.totalorder %v4305_v29, 102  ;;  %v7173_v33 = vld [vmem:[#allocation67_spill] sm:$0xff]  ;;  %v7174_v61 = vld [vmem:[#allocation68_spill] sm:$0xff] }
 0x236   : > { %v5904_v49 = vpop.permute.xlu0 %2710  ;;  %v932_v59 = vsel %vm7167_vm9, %v7166_v30, %v7165_v44  ;;  %vm7168_vm2 = vmmov %vm7167_vm9  ;;  %v964_v39 = vrot.slane %v3444_v54, %v4311_v1  ;;  %v968_v27 = vrot.slane %v3444_v54, %v4313_v0  ;;  %v901_v8 = vadd.f32 %v899_v17, %v877_v9  ;;  %v5927_v7 = vpop.permute.xlu1 %2735  ;;  %v3447_v17 = vld [vmem:[%s6646_s1 + $0x43] ss:$8 sm:$0x3] }
 0x237   : > { %v933_v18 = vsel %vm7168_vm2, %v7165_v44, %v7166_v30  ;;  %v902_v10 = vadd.f32 %v900_v16, %v878_v48  ;;  %vm7171_vm10 = vcmp.lt.s32.totalorder %v4305_v29, 101  ;;  %v947_v25 = vmul.f32 %v940_v50, %v932_v59  ;;  %v7177_v48 = vld [vmem:[#allocation69_spill] sm:$0xff]  ;;  %v7178_v50 = vld [vmem:[#allocation70_spill] sm:$0xff]  ;;  %v3448_v59 = vld [vmem:[%s6646_s1 + $0x44] ss:$8 sm:$0x3] }
 0x238   : > { %v956_v14 = vsel %vm7171_vm10, %v7170_v35, %v7169_v41  ;;  %vm7172_vm7 = vmmov %vm7171_vm10  ;;  %v948_v46 = vmul.f32 %v944_v38, %v933_v18  ;;  %v925_v56 = vadd.f32 %v923_v32, %v901_v8  ;;  %v988_v47 = vrot.slane %v3445_v52, %v4311_v1 }
 0x239   : > { %v957_v22 = vsel %vm7172_vm7, %v7169_v41, %v7170_v35  ;;  %v926_v40 = vadd.f32 %v924_v6, %v902_v10  ;;  %v992_v15 = vrot.slane %v3445_v52, %v4313_v0  ;;  %v971_v11 = vmul.f32 %v964_v39, %v956_v14  ;;  %v7179_v41 = vld [vmem:[#allocation71_spill] sm:$0xff]  ;;  %v7180_v35 = vld [vmem:[#allocation72_spill] sm:$0xff] }
 0x23a   : > { %v5932_v2 = vpop.permute.xlu0 %2733  ;;  %v972_v28 = vmul.f32 %v968_v27, %v957_v22  ;;  %vm7175_vm11 = vcmp.lt.s32.totalorder %v4305_v29, 100  ;;  %v1012_v37 = vrot.slane %v3446_v26, %v4311_v1  ;;  %v1016_v5 = vrot.slane %v3446_v26, %v4313_v0  ;;  %v5949_v16 = vpop.permute.xlu1 %2758 }
 0x23b   : > { %v980_v43 = vsel %vm7175_vm11, %v7174_v61, %v7173_v33  ;;  %vm7176_vm3 = vmmov %vm7175_vm11  ;;  %v949_v54 = vadd.f32 %v947_v25, %v925_v56  ;;  %v950_v9 = vadd.f32 %v948_v46, %v926_v40  ;;  %v1004_v38 = vsel %vm1003_vm0, %v7178_v50, %v7177_v48  ;;  %v3449_v56 = vld [vmem:[%s6646_s1 + $0x45] ss:$8 sm:$0x3] }
 0x23c   : > { %v981_v23 = vsel %vm7176_vm3, %v7173_v33, %v7174_v61  ;;  %v1005_v32 = vsel %vm1003_vm0, %v7177_v48, %v7178_v50  ;;  %v995_v44 = vmul.f32 %v988_v47, %v980_v43  ;;  %v1036_v27 = vrot.slane %v3447_v17, %v4311_v1 }
 0x23d   : > { %v996_v30 = vmul.f32 %v992_v15, %v981_v23  ;;  %v973_v18 = vadd.f32 %v971_v11, %v949_v54  ;;  %v974_v39 = vadd.f32 %v972_v28, %v950_v9  ;;  %v1040_v52 = vrot.slane %v3447_v17, %v4313_v0  ;;  %v7181_v11 = vld [vmem:[#allocation73_spill] sm:$0xff]  ;;  %v7182_v28 = vld [vmem:[#allocation74_spill] sm:$0xff] }
 0x23e   : > { %v5959_v6 = vpop.permute.xlu0 %2756  ;;  %v1019_v8 = vmul.f32 %v1012_v37, %v1004_v38  ;;  %v1020_v10 = vmul.f32 %v1016_v5, %v1005_v32  ;;  %v1028_v14 = vsel %vm1027_vm1, %v7180_v35, %v7179_v41  ;;  %v1029_v22 = vsel %vm1027_vm1, %v7179_v41, %v7180_v35  ;;  %v5974_v25 = vpop.permute.xlu1 %2781  ;;  %v3450_v37 = vld [vmem:[%s6646_s1 + $0x46] ss:$8 sm:$0x3]  ;;  %v7185_v41 = vld [vmem:[#allocation77_spill] sm:$0xff]  ;;  %v7186_v35 = vld [vmem:[#allocation78_spill] sm:$0xff] }
 0x23f   : > { %v1060_v46 = vrot.slane %v3448_v59, %v4311_v1  ;;  %v1064_v26 = vrot.slane %v3448_v59, %v4313_v0  ;;  %v997_v47 = vadd.f32 %v995_v44, %v973_v18  ;;  %v998_v15 = vadd.f32 %v996_v30, %v974_v39  ;;  %v7183_v32 = vld [vmem:[#allocation75_spill] sm:$0xff]  ;;  %v7184_v44 = vld [vmem:[#allocation76_spill] sm:$0xff] }
 0x240   : > { %v1052_v33 = vsel %vm1051_vm12, %v7182_v28, %v7181_v11  ;;  %v1053_v61 = vsel %vm1051_vm12, %v7181_v11, %v7182_v28  ;;  %v1043_v43 = vmul.f32 %v1036_v27, %v1028_v14  ;;  %v1044_v23 = vmul.f32 %v1040_v52, %v1029_v22  ;;  %v3451_v52 = vld [vmem:[%s6646_s1 + $0x47] ss:$8 sm:$0x3] }
 0x241   : > { %v1021_v5 = vadd.f32 %v1019_v8, %v997_v47  ;;  %v1022_v17 = vadd.f32 %v1020_v10, %v998_v15  ;;  %v1084_v54 = vrot.slane %v3449_v56, %v4311_v1  ;;  %v1088_v9 = vrot.slane %v3449_v56, %v4313_v0 }
 0x242   : > { %v5981_v40 = vpop.permute.xlu0 %2779  ;;  %v5996_v48 = vpop.permute.xlu1 %2821  ;;  %v1067_v50 = vmul.f32 %v1060_v46, %v1052_v33  ;;  %v1068_v38 = vmul.f32 %v1064_v26, %v1053_v61  ;;  %v1076_v30 = vsel %vm1075_vm15, %v7184_v44, %v7183_v32  ;;  %v1077_v59 = vsel %vm1075_vm15, %v7183_v32, %v7184_v44  ;;  %v3452_v33 = vld [vmem:[%s6646_s1 + $0x50] ss:$8 sm:$0x3] }
 0x243   : > { %v1108_v39 = vrot.slane %v3450_v37, %v4311_v1  ;;  %v1112_v27 = vrot.slane %v3450_v37, %v4313_v0  ;;  %v1045_v8 = vadd.f32 %v1043_v43, %v1021_v5  ;;  %v1046_v10 = vadd.f32 %v1044_v23, %v1022_v17  ;;  %v7187_v37 = vld [vmem:[#allocation79_spill] sm:$0xff]  ;;  %v7188_v5 = vld [vmem:[#allocation80_spill] sm:$0xff] }
 0x244   : > { %v1100_v14 = vsel %vm1099_vm14, %v7186_v35, %v7185_v41  ;;  %v1101_v22 = vsel %vm1099_vm14, %v7185_v41, %v7186_v35  ;;  %v1091_v46 = vmul.f32 %v1084_v54, %v1076_v30  ;;  %v1092_v26 = vmul.f32 %v1088_v9, %v1077_v59  ;;  %v6041_v9 = vld [vmem:[%s6646_s1 + $0x51] ss:$8 sm:$0x3]  ;;  %v3513_v59 = vld [vmem:[%s6646_s1 + $0xc5] ss:$8 sm:$0x3] }
 0x245   : > { %v1069_v47 = vadd.f32 %v1067_v50, %v1045_v8  ;;  %v1070_v15 = vadd.f32 %v1068_v38, %v1046_v10  ;;  %v1132_v11 = vrot.slane %v3451_v52, %v4311_v1  ;;  %v1136_v28 = vrot.slane %v3451_v52, %v4313_v0  ;;  %v6046_v50 = vld [vmem:[%s6646_s1 + $0x52] ss:$8 sm:$0x3]  ;;  %v6062_v41 = vld [vmem:[%s6646_s1 + $0x53] ss:$8 sm:$0x3] }
 0x246   : > { %v6006_v18 = vpop.permute.xlu0 %2819  ;;  %v6021_v56 = vpop.permute.xlu1 %2844  ;;  %v1115_v43 = vmul.f32 %v1108_v39, %v1100_v14  ;;  %v1116_v23 = vmul.f32 %v1112_v27, %v1101_v22  ;;  %vm7189_vm8 = vcmp.lt.s32.totalorder %v4305_v29, 94  ;;  %v1156_v44 = vrot.slane %v3452_v33, %v4311_v1 }
 0x247   : > { %v1124_v17 = vsel %vm7189_vm8, %v7188_v5, %v7187_v37  ;;  %vm7190_vm4 = vmmov %vm7189_vm8  ;;  %v1093_v38 = vadd.f32 %v1091_v46, %v1069_v47  ;;  %v1094_v32 = vadd.f32 %v1092_v26, %v1070_v15  ;;  %v1160_v30 = vrot.slane %v3452_v33, %v4313_v0  ;;  %v3514_v47 = vld [vmem:[%s6646_s1 + $0xc6] ss:$8 sm:$0x3]  ;;  %v7191_v15 = vld [vmem:[#allocation81_spill] sm:$0xff] }
 0x248   : > { %v1125_v54 = vsel %vm7190_vm4, %v7187_v37, %v7188_v5  ;;  %v1139_v27 = vmul.f32 %v1132_v11, %v1124_v17  ;;  %v7192_v11 = vld [vmem:[#allocation82_spill] sm:$0xff]  ;;  %vm7193_vm5 = vcmp.lt.s32.totalorder %v4305_v29, 93  ;;  %vm7195_vm9 = vcmp.lt.s32.totalorder %v4305_v29, 28 }
 0x249   : > { %v1140_v52 = vmul.f32 %v1136_v28, %v1125_v54  ;;  %v1117_v14 = vadd.f32 %v1115_v43, %v1093_v38  ;;  %v1118_v22 = vadd.f32 %v1116_v23, %v1094_v32  ;;  %v1148_v28 = vsel %vm7193_vm5, %v7192_v11, %v7191_v15  ;;  %vm7194_vm6 = vmmov %vm7193_vm5  ;;  %v3515_v38 = vld [vmem:[%s6646_s1 + $0xc7] ss:$8 sm:$0x3] }
 0x24a   : > { %v6028_v61 = vpop.permute.xlu0 %2842  ;;  %v6053_v39 = vpop.permute.xlu1 %2867  ;;  %v1149_v33 = vsel %vm7194_vm6, %v7191_v15, %v7192_v11  ;;  %v2561_v43 = vrot.slane %v3513_v59, %v4311_v1  ;;  %v2565_v23 = vrot.slane %v3513_v59, %v4313_v0  ;;  %v2553_v17 = vsel %vm7195_vm9, %v5724_v42, %v5709_v60  ;;  %vm7196_vm2 = vmmov %vm7195_vm9 }
 0x24b   : > { %v2554_v54 = vsel %vm7196_vm2, %v5709_v60, %v5724_v42  ;;  %v6100_v59 = vadd.f32 %v1139_v27, %v1117_v14  ;;  %v6102_v15 = vadd.f32 %v1140_v52, %v1118_v22  ;;  %v2584_v11 = vrot.slane %v3514_v47, %v4311_v1  ;;  %v3516_v27 = vld [vmem:[%s6646_s1 + $0xd0] ss:$8 sm:$0x3]  ;;  %v3517_v22 = vld [vmem:[%s6646_s1 + $0xd1] ss:$8 sm:$0x3] }
 0x24c   : > { %v2588_v5 = vrot.slane %v3514_v47, %v4313_v0  ;;  %v6108_v26 = vmul.f32 %v1156_v44, %v1148_v28  ;;  %v6110_v46 = vmul.f32 %v1160_v30, %v1149_v33  ;;  %vm7197_vm10 = vcmp.lt.s32.totalorder %v4305_v29, 27  ;;  %v7199_v47 = vld [vmem:[#allocation83_spill] sm:$0xff]  ;;  %v7200_v28 = vld [vmem:[#allocation84_spill] sm:$0xff] }
 0x24d   : > { %v2576_v60 = vsel %vm7197_vm10, %v5757_v24, %v5746_v58  ;;  %vm7198_vm7 = vmmov %vm7197_vm10  ;;  %v2568_v52 = vmul.f32 %v2561_v43, %v2554_v54  ;;  %v2569_v14 = vmul.f32 %v2565_v23, %v2553_v17  ;;  %v2607_v44 = vrot.slane %v3515_v38, %v4311_v1 }
 0x24e   : > { %v6064_v35 = vpop.permute.xlu0 %2865  ;;  %v6098_v32 = vpop.permute.xlu1 %2890  ;;  %v2577_v42 = vsel %vm7198_vm7, %v5746_v58, %v5757_v24  ;;  %v2611_v30 = vrot.slane %v3515_v38, %v4313_v0  ;;  %vm7201_vm11 = vcmp.lt.s32.totalorder %v4305_v29, 92  ;;  %vm7203_vm8 = vcmp.lt.s32.totalorder %v4305_v29, 26 }
 0x24f   : > { %v6132_v33 = vsel %vm7201_vm11, %v7200_v28, %v7199_v47  ;;  %vm7202_vm3 = vmmov %vm7201_vm11  ;;  %v2599_v24 = vsel %vm7203_vm8, %v5772_v53, %v5768_v3  ;;  %v2591_v17 = vmul.f32 %v2584_v11, %v2577_v42  ;;  %v2592_v54 = vmul.f32 %v2588_v5, %v2576_v60 }
 0x250   : > { %v6138_v58 = vsel %vm7202_vm3, %v7199_v47, %v7200_v28  ;;  %vm7204_vm4 = vmmov %vm7203_vm8  ;;  %v2630_v38 = vrot.slane %v3516_v27, %v4311_v1  ;;  %v2634_v10 = vrot.slane %v3516_v27, %v4313_v0  ;;  %v3518_v47 = vld [vmem:[%s6646_s1 + $0xd2] ss:$8 sm:$0x3]  ;;  %vm7205_vm5 = vcmp.lt.s32.totalorder %v4305_v29, 25 }
 0x251   : > { %v2600_v43 = vsel %vm7204_vm4, %v5768_v3, %v5772_v53  ;;  %v2622_v8 = vsel %vm7205_vm5, %v5804_v63, %v5799_v4  ;;  %vm7206_vm6 = vmmov %vm7205_vm5  ;;  %v2653_v53 = vrot.slane %v3517_v22, %v4311_v1  ;;  %v2657_v5 = vrot.slane %v3517_v22, %v4313_v0  ;;  %v3520_v22 = vld [vmem:[%s6646_s1 + $0xd4] ss:$8 sm:$0x3] }
 0x252   : > { %v6106_v37 = vpop.permute.xlu0 %2888  ;;  %v6148_v23 = vpop.permute.xlu1 %2913  ;;  %v2623_v3 = vsel %vm7206_vm6, %v5799_v4, %v5804_v63  ;;  %v2570_v11 = vadd.f32 %v2568_v52, %v5720_v55  ;;  %v2571_v60 = vadd.f32 %v2569_v14, %v5722_v12  ;;  %v2614_v42 = vmul.f32 %v2607_v44, %v2600_v43 }
 0x253   : > { %v2615_v27 = vmul.f32 %v2611_v30, %v2599_v24  ;;  %vm7207_vm9 = vcmp.lt.s32.totalorder %v4305_v29, 7  ;;  %v2676_v55 = vrot.slane %v3518_v47, %v4311_v1  ;;  %v2680_v12 = vrot.slane %v3518_v47, %v4313_v0  ;;  %v3521_v47 = vld [vmem:[%s6646_s1 + $0xd5] ss:$8 sm:$0x3] }
 0x254   : > { %v2645_v45 = vsel %vm7207_vm9, %v5835_v36, %v5825_v62  ;;  %vm7208_vm2 = vmmov %vm7207_vm9  ;;  %v2593_v52 = vadd.f32 %v2591_v17, %v2570_v11  ;;  %v2594_v14 = vadd.f32 %v2592_v54, %v2571_v60  ;;  %v2637_v44 = vmul.f32 %v2630_v38, %v2623_v3 }
 0x255   : > { %v2646_v4 = vsel %vm7208_vm2, %v5825_v62, %v5835_v36  ;;  %v2638_v30 = vmul.f32 %v2634_v10, %v2622_v8  ;;  %vm7209_vm10 = vcmp.lt.s32.totalorder %v4305_v29, 6  ;;  %v2699_v43 = vrot.slane %v3519_v13, %v4311_v1 }
 0x256   : > { %v6155_v28 = vpop.permute.xlu0 %2911  ;;  %v6182_v63 = vpop.permute.xlu1 %2936  ;;  %v2668_v62 = vsel %vm7209_vm10, %v5857_v20, %v5850_v19  ;;  %vm7210_vm7 = vmmov %vm7209_vm10  ;;  %v2703_v8 = vrot.slane %v3519_v13, %v4313_v0  ;;  %v2616_v10 = vadd.f32 %v2614_v42, %v2593_v52  ;;  %v2617_v17 = vadd.f32 %v2615_v27, %v2594_v14  ;;  %v3522_v42 = vld [vmem:[%s6646_s1 + $0xd6] ss:$8 sm:$0x3] }
 0x257   : > { %v2669_v36 = vsel %vm7210_vm7, %v5850_v19, %v5857_v20  ;;  %v2660_v54 = vmul.f32 %v2653_v53, %v2646_v4  ;;  %v2661_v38 = vmul.f32 %v2657_v5, %v2645_v45  ;;  %vm7211_vm11 = vcmp.lt.s32.totalorder %v4305_v29, 5 }
 0x258   : > { %v2691_v3 = vsel %vm7211_vm11, %v5882_v21, %v5872_v57  ;;  %vm7212_vm3 = vmmov %vm7211_vm11  ;;  %v2722_v13 = vrot.slane %v3520_v22, %v4311_v1  ;;  %v2726_v20 = vrot.slane %v3520_v22, %v4313_v0  ;;  %v2639_v45 = vadd.f32 %v2637_v44, %v2616_v10 }
 0x259   : > { %v2692_v19 = vsel %vm7212_vm3, %v5872_v57, %v5882_v21  ;;  %v2640_v5 = vadd.f32 %v2638_v30, %v2617_v17  ;;  %v2683_v11 = vmul.f32 %v2676_v55, %v2669_v36  ;;  %v2684_v60 = vmul.f32 %v2680_v12, %v2668_v62  ;;  %v3523_v30 = vld [vmem:[%s6646_s1 + $0xd7] ss:$8 sm:$0x3] }
 0x25a   : > { %v6187_v24 = vpop.permute.xlu0 %2934  ;;  %v6212_v53 = vpop.permute.xlu1 %2959  ;;  %vm7213_vm8 = vcmp.lt.s32.totalorder %v4305_v29, 4  ;;  %v2745_v4 = vrot.slane %v3521_v47, %v4311_v1  ;;  %v2749_v55 = vrot.slane %v3521_v47, %v4313_v0  ;;  %v2662_v12 = vadd.f32 %v2660_v54, %v2639_v45  ;;  %v3524_v45 = vld [vmem:[%s6646_s1 + $0xe0] ss:$8 sm:$0x3] }
 0x25b   : > { %v2714_v57 = vsel %vm7213_vm8, %v5904_v49, %v5900_v51  ;;  %vm7214_vm4 = vmmov %vm7213_vm8  ;;  %v2663_v52 = vadd.f32 %v2661_v38, %v2640_v5  ;;  %v2706_v14 = vmul.f32 %v2699_v43, %v2692_v19  ;;  %v2707_v44 = vmul.f32 %v2703_v8, %v2691_v3  ;;  %v7219_v5 = vld [vmem:[#allocation85_spill] sm:$0xff] }
 0x25c   : > { %v2715_v21 = vsel %vm7214_vm4, %v5900_v51, %v5904_v49  ;;  %vm7215_vm5 = vcmp.lt.s32.totalorder %v4305_v29, 3  ;;  %v2768_v49 = vrot.slane %v3522_v42, %v4311_v1  ;;  %v2772_v62 = vrot.slane %v3522_v42, %v4313_v0 }
 0x25d   : > { %v2737_v22 = vsel %vm7215_vm5, %v5932_v2, %v5927_v7  ;;  %vm7216_vm6 = vmmov %vm7215_vm5  ;;  %v2685_v43 = vadd.f32 %v2683_v11, %v2662_v12  ;;  %v2686_v8 = vadd.f32 %v2684_v60, %v2663_v52  ;;  %v2729_v10 = vmul.f32 %v2722_v13, %v2715_v21  ;;  %v7220_v11 = vld [vmem:[#allocation86_spill] sm:$0xff] }
 0x25e   : > { %v6217_v27 = vpop.permute.xlu0 %2957  ;;  %v2738_v51 = vsel %vm7216_vm6, %v5927_v7, %v5932_v2  ;;  %v6242_v36 = vpop.permute.xlu1 %2982  ;;  %v2730_v17 = vmul.f32 %v2726_v20, %v2714_v57  ;;  %vm7217_vm9 = vcmp.lt.s32.totalorder %v4305_v29, 2  ;;  %v2791_v2 = vrot.slane %v3523_v30, %v4311_v1 }
 0x25f   : > { %v2760_v38 = vsel %vm7217_vm9, %v5959_v6, %v5949_v16  ;;  %vm7218_vm2 = vmmov %vm7217_vm9  ;;  %v2795_v47 = vrot.slane %v3523_v30, %v4313_v0  ;;  %v2708_v3 = vadd.f32 %v2706_v14, %v2685_v43  ;;  %v2709_v19 = vadd.f32 %v2707_v44, %v2686_v8 }
 0x260   : > { %v2761_v7 = vsel %vm7218_vm2, %v5949_v16, %v5959_v6  ;;  %v2752_v13 = vmul.f32 %v2745_v4, %v2738_v51  ;;  %v2753_v20 = vmul.f32 %v2749_v55, %v2737_v22  ;;  %vm7221_vm10 = vcmp.lt.s32.totalorder %v4305_v29, 91 }
 0x261   : > { %v1196_v60 = vsel %vm7221_vm10, %v7220_v11, %v7219_v5  ;;  %vm7222_vm7 = vmmov %vm7221_vm10  ;;  %vm7223_vm11 = vcmp.lt.s32.totalorder %v4305_v29, 1  ;;  %v2731_v21 = vadd.f32 %v2729_v10, %v2708_v3  ;;  %v2732_v4 = vadd.f32 %v2730_v17, %v2709_v19 }
 0x262   : > { %v6244_v54 = vpop.permute.xlu0 %2980  ;;  %v1197_v16 = vsel %vm7222_vm7, %v7219_v5, %v7220_v11  ;;  %v2783_v6 = vsel %vm7223_vm11, %v5981_v40, %v5974_v25  ;;  %vm7224_vm3 = vmmov %vm7223_vm11  ;;  %v6275_v57 = vpop.permute.xlu1 %3005  ;;  %v2775_v55 = vmul.f32 %v2768_v49, %v2761_v7  ;;  %v2776_v12 = vmul.f32 %v2772_v62, %v2760_v38  ;;  %v3525_v7 = vld [vmem:[%s6646_s1 + $0xe1] ss:$8 sm:$0x3] }
 0x263   : > { %v2784_v42 = vsel %vm7224_vm3, %v5974_v25, %v5981_v40  ;;  %v7225_v14 = vrot.slane %v6041_v9, %v4311_v1  ;;  %v7226_v30 = vrot.slane %v6041_v9, %v4313_v0  ;;  %v6290_v25 = vld [vmem:[%s6646_s1 + $0x54] ss:$8 sm:$0x3]  ;;  %v2808_v40 = vrot.slane %v3524_v45, %v4311_v1 }
 0x264   : > { %v2812_v51 = vrot.slane %v3524_v45, %v4313_v0  ;;  %v2754_v49 = vadd.f32 %v2752_v13, %v2731_v21  ;;  %v2755_v62 = vadd.f32 %v2753_v20, %v2732_v4  ;;  %v2798_v43 = vmul.f32 %v2791_v2, %v2784_v42  ;;  %v3526_v20 = vld [vmem:[%s6646_s1 + $0xe2] ss:$8 sm:$0x3] }
 0x265   : > { %v1187_v44 = vmul.f32 %v7225_v14, %v6132_v33  ;;  %v1188_v22 = vmul.f32 %v7226_v30, %v6138_v58  ;;  %v2799_v8 = vmul.f32 %v2795_v47, %v2783_v6  ;;  %v1165_v33 = vadd.f32 %v6108_v26, %v6100_v59  ;;  %v7231_v4 = vld [vmem:[#allocation87_spill] sm:$0xff] }
 0x266   : > { %v6277_v52 = vpop.permute.xlu0 %3003  ;;  %v1166_v9 = vadd.f32 %v6110_v46, %v6102_v15  ;;  %v7227_v58 = vrot.slane %v6046_v50, %v4311_v1  ;;  %v7228_v17 = vrot.slane %v6046_v50, %v4313_v0  ;;  %v6307_v2 = vpop.permute.xlu1 %3028  ;;  %v1252_v26 = vrot.slane %v6290_v25, %v4311_v1 }
 0x267   : > { %v1256_v46 = vrot.slane %v6290_v25, %v4313_v0  ;;  %v2777_v59 = vadd.f32 %v2775_v55, %v2754_v49  ;;  %v2778_v15 = vadd.f32 %v2776_v12, %v2755_v62  ;;  %v1189_v3 = vadd.f32 %v1187_v44, %v1165_v33  ;;  %v7232_v55 = vld [vmem:[#allocation88_spill] sm:$0xff] }
 0x268   : > { %v1211_v10 = vmul.f32 %v7227_v58, %v1196_v60  ;;  %v1212_v38 = vmul.f32 %v7228_v17, %v1197_v16  ;;  %v1190_v19 = vadd.f32 %v1188_v22, %v1166_v9  ;;  %v2815_v50 = vmul.f32 %v2808_v40, %v4301_v31  ;;  %v3527_v16 = vld [vmem:[%s6646_s1 + $0xe3] ss:$8 sm:$0x3]  ;;  %v3528_v49 = vld [vmem:[%s6646_s1 + $0xe4] ss:$8 sm:$0x3] }
 0x269   : > { %v2816_v13 = vmul.f32 %v2812_v51, %v4297_v34  ;;  %v2800_v45 = vadd.f32 %v2798_v43, %v2777_v59  ;;  %v2801_v5 = vadd.f32 %v2799_v8, %v2778_v15  ;;  %v2831_v11 = vrot.slane %v3525_v7, %v4311_v1  ;;  %v3529_v9 = vld [vmem:[%s6646_s1 + $0xe5] ss:$8 sm:$0x3]  ;;  %v7237_v58 = vld [vmem:[#allocation89_spill] sm:$0xff] }
 0x26a   : > { %v6313_v47 = vpop.permute.xlu0 %3026  ;;  %v2835_v60 = vrot.slane %v3525_v7, %v4313_v0  ;;  %v6325_v6 = vadd.f32 %v1211_v10, %v1189_v3  ;;  %v6327_v42 = vadd.f32 %v1212_v38, %v1190_v19  ;;  %vm7229_vm8 = vcmp.lt.s32.totalorder %v4305_v29, 127  ;;  %v6337_v21 = vpop.permute.xlu1 %3051  ;;  %v7238_v10 = vld [vmem:[#allocation90_spill] sm:$0xff] }
 0x26b   : > { %v2823_v31 = vsel %vm7229_vm8, %v6006_v18, %v5996_v48  ;;  %vm7230_vm4 = vmmov %vm7229_vm8  ;;  %vm7233_vm5 = vcmp.lt.s32.totalorder %v4305_v29, 90  ;;  %v2854_v44 = vrot.slane %v3526_v20, %v4311_v1  ;;  %v2858_v30 = vrot.slane %v3526_v20, %v4313_v0 }
 0x26c   : > { %v2824_v34 = vsel %vm7230_vm4, %v5996_v48, %v6006_v18  ;;  %v6343_v12 = vsel %vm7233_vm5, %v7232_v55, %v7231_v4  ;;  %vm7234_vm6 = vmmov %vm7233_vm5  ;;  %vm7235_vm9 = vcmp.lt.s32.totalorder %v4305_v29, 126  ;;  %v2877_v40 = vrot.slane %v3527_v16, %v4311_v1 }
 0x26d   : > { %v6349_v14 = vsel %vm7234_vm6, %v7231_v4, %v7232_v55  ;;  %v2846_v48 = vsel %vm7235_vm9, %v6028_v61, %v6021_v56  ;;  %vm7236_vm2 = vmmov %vm7235_vm9  ;;  %v2881_v51 = vrot.slane %v3527_v16, %v4313_v0  ;;  %v2817_v62 = vadd.f32 %v2815_v50, %v2800_v45  ;;  %v3530_v50 = vld [vmem:[%s6646_s1 + $0xe6] ss:$8 sm:$0x3] }
 0x26e   : > { %v6353_v22 = vpop.permute.xlu0 %3049  ;;  %v2847_v18 = vsel %vm7236_vm2, %v6021_v56, %v6028_v61  ;;  %v2818_v43 = vadd.f32 %v2816_v13, %v2801_v5  ;;  %v2838_v8 = vmul.f32 %v2831_v11, %v2823_v31  ;;  %v2839_v33 = vmul.f32 %v2835_v60, %v2824_v34  ;;  %v6391_v7 = vpop.permute.xlu1 %3074  ;;  %v3531_v31 = vld [vmem:[%s6646_s1 + $0xe7] ss:$8 sm:$0x3] }
 0x26f   : > { %v6375_v56 = vsel %vm1243_vm13, %v7238_v10, %v7237_v58  ;;  %v6381_v61 = vsel %vm1243_vm13, %v7237_v58, %v7238_v10  ;;  %vm7239_vm10 = vcmp.lt.s32.totalorder %v4305_v29, 125  ;;  %v2861_v59 = vmul.f32 %v2854_v44, %v2846_v48  ;;  %v3533_v58 = vld [vmem:[%s6646_s1 + $0xf1] ss:$8 sm:$0x3] }
 0x270   : > { %v2869_v17 = vsel %vm7239_vm10, %v6064_v35, %v6053_v39  ;;  %vm7240_vm7 = vmmov %vm7239_vm10  ;;  %v2862_v15 = vmul.f32 %v2858_v30, %v2847_v18  ;;  %v2900_v3 = vrot.slane %v3528_v49, %v4311_v1  ;;  %v2904_v19 = vrot.slane %v3528_v49, %v4313_v0 }
 0x271   : > { %v2870_v38 = vsel %vm7240_vm7, %v6053_v39, %v6064_v35  ;;  %vm7241_vm11 = vcmp.lt.s32.totalorder %v4305_v29, 124  ;;  %v2923_v35 = vrot.slane %v3529_v9, %v4311_v1  ;;  %v2927_v45 = vrot.slane %v3529_v9, %v4313_v0 }
 0x272   : > { %v6398_v13 = vpop.permute.xlu0 %3072  ;;  %v2892_v20 = vsel %vm7241_vm11, %v6106_v37, %v6098_v32  ;;  %vm7242_vm3 = vmmov %vm7241_vm11  ;;  %v2840_v5 = vadd.f32 %v2838_v8, %v2817_v62  ;;  %v2841_v11 = vadd.f32 %v2839_v33, %v2818_v43  ;;  %v2884_v60 = vmul.f32 %v2877_v40, %v2869_v17  ;;  %v6423_v55 = vpop.permute.xlu1 %3097  ;;  %v3532_v40 = vld [vmem:[%s6646_s1 + $0xf0] ss:$8 sm:$0x3] }
 0x273   : > { %v2893_v39 = vsel %vm7242_vm3, %v6098_v32, %v6106_v37  ;;  %v2885_v16 = vmul.f32 %v2881_v51, %v2870_v38  ;;  %vm7243_vm8 = vcmp.lt.s32.totalorder %v4305_v29, 123  ;;  %v2946_v32 = vrot.slane %v3530_v50, %v4311_v1 }
 0x274   : > { %v2915_v34 = vsel %vm7243_vm8, %v6155_v28, %v6148_v23  ;;  %vm7244_vm4 = vmmov %vm7243_vm8  ;;  %v2950_v4 = vrot.slane %v3530_v50, %v4313_v0  ;;  %v2863_v44 = vadd.f32 %v2861_v59, %v2840_v5  ;;  %v2864_v30 = vadd.f32 %v2862_v15, %v2841_v11  ;;  %v3534_v50 = vld [vmem:[%s6646_s1 + $0xf2] ss:$8 sm:$0x3] }
 0x275   : > { %v2916_v37 = vsel %vm7244_vm4, %v6148_v23, %v6155_v28  ;;  %v2907_v48 = vmul.f32 %v2900_v3, %v2892_v20  ;;  %v2908_v18 = vmul.f32 %v2904_v19, %v2893_v39  ;;  %vm7245_vm5 = vcmp.lt.s32.totalorder %v4305_v29, 122 }
 0x276   : > { %v6428_v51 = vpop.permute.xlu0 %3095  ;;  %v2938_v23 = vsel %vm7245_vm5, %v6187_v24, %v6182_v63  ;;  %vm7246_vm6 = vmmov %vm7245_vm5  ;;  %v2969_v49 = vrot.slane %v3531_v31, %v4311_v1  ;;  %v2973_v62 = vrot.slane %v3531_v31, %v4313_v0  ;;  %v2886_v43 = vadd.f32 %v2884_v60, %v2863_v44  ;;  %v6453_v38 = vpop.permute.xlu1 %3120 }
 0x277   : > { %v2939_v28 = vsel %vm7246_vm6, %v6182_v63, %v6187_v24  ;;  %v2887_v8 = vadd.f32 %v2885_v16, %v2864_v30  ;;  %v2930_v33 = vmul.f32 %v2923_v35, %v2915_v34  ;;  %v2931_v9 = vmul.f32 %v2927_v45, %v2916_v37  ;;  %v3535_v16 = vld [vmem:[%s6646_s1 + $0xf3] ss:$8 sm:$0x3] }
 0x278   : > { %vm7247_vm9 = vcmp.lt.s32.totalorder %v4305_v29, 121  ;;  %v2992_v24 = vrot.slane %v3532_v40, %v4311_v1  ;;  %v2996_v17 = vrot.slane %v3532_v40, %v4313_v0  ;;  %v2909_v59 = vadd.f32 %v2907_v48, %v2886_v43  ;;  %v3536_v48 = vld [vmem:[%s6646_s1 + $0xf4] ss:$8 sm:$0x3] }
 0x279   : > { %v2961_v10 = vsel %vm7247_vm9, %v6217_v27, %v6212_v53  ;;  %vm7248_vm2 = vmmov %vm7247_vm9  ;;  %v2910_v15 = vadd.f32 %v2908_v18, %v2887_v8  ;;  %v2953_v3 = vmul.f32 %v2946_v32, %v2938_v23  ;;  %v2954_v19 = vmul.f32 %v2950_v4, %v2939_v28  ;;  %v3537_v8 = vld [vmem:[%s6646_s1 + $0xf5] ss:$8 sm:$0x3] }
 0x27a   : > { %v2962_v63 = vsel %vm7248_vm2, %v6212_v53, %v6217_v27  ;;  %v6458_v20 = vpop.permute.xlu0 %3118  ;;  %vm7249_vm10 = vcmp.lt.s32.totalorder %v4305_v29, 103  ;;  %v3015_v39 = vrot.slane %v3533_v58, %v4311_v1  ;;  %v3019_v35 = vrot.slane %v3533_v58, %v4313_v0  ;;  %v3144_v37 = vpop.permute.xlu1 %3143 }
 0x27b   : > { %v2984_v53 = vsel %vm7249_vm10, %v6244_v54, %v6242_v36  ;;  %vm7250_vm7 = vmmov %vm7249_vm10  ;;  %v2932_v45 = vadd.f32 %v2930_v33, %v2909_v59  ;;  %v2933_v5 = vadd.f32 %v2931_v9, %v2910_v15  ;;  %v2976_v11 = vmul.f32 %v2969_v49, %v2961_v10  ;;  %v3538_v59 = vld [vmem:[%s6646_s1 + $0xf6] ss:$8 sm:$0x3] }
 0x27c   : > { %v2985_v27 = vsel %vm7250_vm7, %v6242_v36, %v6244_v54  ;;  %v2977_v60 = vmul.f32 %v2973_v62, %v2962_v63  ;;  %vm7251_vm11 = vcmp.lt.s32.totalorder %v4305_v29, 102  ;;  %v3038_v54 = vrot.slane %v3534_v50, %v4311_v1 }
 0x27d   : > { %v3007_v31 = vsel %vm7251_vm11, %v6277_v52, %v6275_v57  ;;  %vm7252_vm3 = vmmov %vm7251_vm11  ;;  %v3042_v34 = vrot.slane %v3534_v50, %v4313_v0  ;;  %v2955_v32 = vadd.f32 %v2953_v3, %v2932_v45  ;;  %v2956_v4 = vadd.f32 %v2954_v19, %v2933_v5 }
 0x27e   : > { %v3008_v36 = vsel %vm7252_vm3, %v6275_v57, %v6277_v52  ;;  %v2999_v44 = vmul.f32 %v2992_v24, %v2984_v53  ;;  %v3000_v30 = vmul.f32 %v2996_v17, %v2985_v27  ;;  %v3142_v18 = vpop.permute.xlu0 %3141  ;;  %vm7253_vm8 = vcmp.lt.s32.totalorder %v4305_v29, 101  ;;  %v3167_v58 = vpop.permute.xlu1 %3166 }
 0x27f   : > { %v3030_v40 = vsel %vm7253_vm8, %v6313_v47, %v6307_v2  ;;  %vm7254_vm4 = vmmov %vm7253_vm8  ;;  %v3061_v52 = vrot.slane %v3535_v16, %v4311_v1  ;;  %v3065_v23 = vrot.slane %v3535_v16, %v4313_v0  ;;  %v2978_v28 = vadd.f32 %v2976_v11, %v2955_v32 }
 0x280   : > { %v3031_v57 = vsel %vm7254_vm4, %v6307_v2, %v6313_v47  ;;  %v2979_v49 = vadd.f32 %v2977_v60, %v2956_v4  ;;  %v3022_v62 = vmul.f32 %v3015_v39, %v3007_v31  ;;  %v3023_v43 = vmul.f32 %v3019_v35, %v3008_v36  ;;  %v3539_v35 = vld [vmem:[%s6646_s1 + $0xf7] ss:$8 sm:$0x3] }
 0x281   : > { %vm7255_vm5 = vcmp.lt.s32.totalorder %v4305_v29, 100  ;;  %v3084_v47 = vrot.slane %v3536_v48, %v4311_v1  ;;  %v3088_v9 = vrot.slane %v3536_v48, %v4313_v0  ;;  %v3001_v10 = vadd.f32 %v2999_v44, %v2978_v28 }
 0x282   : > { %v3053_v33 = vsel %vm7255_vm5, %v6353_v22, %v6337_v21  ;;  %vm7256_vm6 = vmmov %vm7255_vm5  ;;  %v3002_v63 = vadd.f32 %v3000_v30, %v2979_v49  ;;  %v3045_v24 = vmul.f32 %v3038_v54, %v3030_v40  ;;  %v3046_v17 = vmul.f32 %v3042_v34, %v3031_v57  ;;  %v3165_v15 = vpop.permute.xlu0 %3164  ;;  %v3190_v11 = vpop.permute.xlu1 %3189  ;;  %v3540_v54 = vld [vmem:[%s6646_s1 + $0x100] ss:$8 sm:$0x3]  ;;  %v3541_v57 = vld [vmem:[%s6646_s1 + $0x101] ss:$8 sm:$0x3] }
 0x283   : > { %v3054_v2 = vsel %vm7256_vm6, %v6337_v21, %v6353_v22  ;;  %v3076_v3 = vsel %vm1003_vm0, %v6398_v13, %v6391_v7  ;;  %v3077_v21 = vsel %vm1003_vm0, %v6391_v7, %v6398_v13  ;;  %v3107_v22 = vrot.slane %v3537_v8, %v4311_v1 }
 0x284   : > { %v3111_v19 = vrot.slane %v3537_v8, %v4313_v0  ;;  %v3024_v50 = vadd.f32 %v3022_v62, %v3001_v10  ;;  %v3025_v53 = vadd.f32 %v3023_v43, %v3002_v63  ;;  %v3068_v27 = vmul.f32 %v3061_v52, %v3053_v33  ;;  %v3542_v33 = vld [vmem:[%s6646_s1 + $0x102] ss:$8 sm:$0x3] }
 0x285   : > { %v3069_v39 = vmul.f32 %v3065_v23, %v3054_v2  ;;  %v3099_v45 = vsel %vm1027_vm1, %v6428_v51, %v6423_v55  ;;  %v3100_v7 = vsel %vm1027_vm1, %v6423_v55, %v6428_v51  ;;  %v3130_v13 = vrot.slane %v3538_v59, %v4311_v1 }
 0x286   : > { %v3134_v5 = vrot.slane %v3538_v59, %v4313_v0  ;;  %v3047_v60 = vadd.f32 %v3045_v24, %v3024_v50  ;;  %v3048_v16 = vadd.f32 %v3046_v17, %v3025_v53  ;;  %v3091_v31 = vmul.f32 %v3084_v47, %v3076_v3  ;;  %v3188_v34 = vpop.permute.xlu0 %3187  ;;  %v3213_v28 = vpop.permute.xlu1 %3212  ;;  %v3543_v59 = vld [vmem:[%s6646_s1 + $0x103] ss:$8 sm:$0x3] }
 0x287   : > { %v3092_v36 = vmul.f32 %v3088_v9, %v3077_v21  ;;  %v3122_v32 = vsel %vm1051_vm12, %v6458_v20, %v6453_v38  ;;  %v3123_v55 = vsel %vm1051_vm12, %v6453_v38, %v6458_v20  ;;  %v3153_v51 = vrot.slane %v3539_v35, %v4311_v1 }
 0x288   : > { %v3157_v4 = vrot.slane %v3539_v35, %v4313_v0  ;;  %v3070_v44 = vadd.f32 %v3068_v27, %v3047_v60  ;;  %v3071_v30 = vadd.f32 %v3069_v39, %v3048_v16  ;;  %v3114_v48 = vmul.f32 %v3107_v22, %v3099_v45  ;;  %v3544_v35 = vld [vmem:[%s6646_s1 + $0x104] ss:$8 sm:$0x3] }
 0x289   : > { %v3115_v40 = vmul.f32 %v3111_v19, %v3100_v7  ;;  %v3145_v52 = vsel %vm1075_vm15, %v3142_v18, %v3144_v37  ;;  %v3146_v23 = vsel %vm1075_vm15, %v3144_v37, %v3142_v18  ;;  %v3176_v38 = vrot.slane %v3540_v54, %v4311_v1 }
 0x28a   : > { %v3180_v20 = vrot.slane %v3540_v54, %v4313_v0  ;;  %v3093_v49 = vadd.f32 %v3091_v31, %v3070_v44  ;;  %v3094_v62 = vadd.f32 %v3092_v36, %v3071_v30  ;;  %v3137_v43 = vmul.f32 %v3130_v13, %v3122_v32  ;;  %v3211_v2 = vpop.permute.xlu0 %3210  ;;  %v3236_v22 = vpop.permute.xlu1 %3235  ;;  %v3545_v36 = vld [vmem:[%s6646_s1 + $0x105] ss:$8 sm:$0x3] }
 0x28b   : > { %v3138_v8 = vmul.f32 %v3134_v5, %v3123_v55  ;;  %v3168_v47 = vsel %vm1099_vm14, %v3165_v15, %v3167_v58  ;;  %v3169_v37 = vsel %vm1099_vm14, %v3167_v58, %v3165_v15  ;;  %v3199_v18 = vrot.slane %v3541_v57, %v4311_v1 }
 0x28c   : > { %v3203_v9 = vrot.slane %v3541_v57, %v4313_v0  ;;  %v3116_v10 = vadd.f32 %v3114_v48, %v3093_v49  ;;  %v3117_v63 = vadd.f32 %v3115_v40, %v3094_v62  ;;  %v3160_v24 = vmul.f32 %v3153_v51, %v3145_v52 }
 0x28d   : > { %v3161_v17 = vmul.f32 %v3157_v4, %v3146_v23  ;;  %vm7257_vm12 = vcmp.lt.s32.totalorder %v4305_v29, 94  ;;  %v3222_v58 = vrot.slane %v3542_v33, %v4311_v1  ;;  %v3226_v15 = vrot.slane %v3542_v33, %v4313_v0 }
 0x28e   : > { %v3191_v3 = vsel %vm7257_vm12, %v3188_v34, %v3190_v11  ;;  %vm7258_vm15 = vmmov %vm7257_vm12  ;;  %v3139_v19 = vadd.f32 %v3137_v43, %v3116_v10  ;;  %v3140_v50 = vadd.f32 %v3138_v8, %v3117_v63  ;;  %v3183_v53 = vmul.f32 %v3176_v38, %v3168_v47  ;;  %v3234_v39 = vpop.permute.xlu0 %3233  ;;  %v3259_v32 = vpop.permute.xlu1 %3258  ;;  %v3546_v43 = vld [vmem:[%s6646_s1 + $0x106] ss:$8 sm:$0x3] }
 0x28f   : > { %v3192_v21 = vsel %vm7258_vm15, %v3190_v11, %v3188_v34  ;;  %v3184_v27 = vmul.f32 %v3180_v20, %v3169_v37  ;;  %vm7259_vm14 = vcmp.lt.s32.totalorder %v4305_v29, 93  ;;  %v3245_v13 = vrot.slane %v3543_v59, %v4311_v1 }
 0x290   : > { %v3214_v45 = vsel %vm7259_vm14, %v3211_v2, %v3213_v28  ;;  %vm7260_vm0 = vmmov %vm7259_vm14  ;;  %v3249_v5 = vrot.slane %v3543_v59, %v4313_v0  ;;  %v3162_v11 = vadd.f32 %v3160_v24, %v3139_v19  ;;  %v3163_v60 = vadd.f32 %v3161_v17, %v3140_v50 }
 0x291   : > { %v3215_v7 = vsel %vm7260_vm0, %v3213_v28, %v3211_v2  ;;  %v3206_v16 = vmul.f32 %v3199_v18, %v3191_v3  ;;  %v3207_v31 = vmul.f32 %v3203_v9, %v3192_v21  ;;  %vm7261_vm1 = vcmp.lt.s32.totalorder %v4305_v29, 92 }
 0x292   : > { %v3237_v54 = vsel %vm7261_vm1, %v3234_v39, %v3236_v22  ;;  %vm7262_vm9 = vmmov %vm7261_vm1  ;;  %v3268_v55 = vrot.slane %v3544_v35, %v4311_v1  ;;  %v3272_v51 = vrot.slane %v3544_v35, %v4313_v0  ;;  %v3185_v4 = vadd.f32 %v3183_v53, %v3162_v11  ;;  %v3257_v40 = vpop.permute.xlu0 %3256  ;;  %v3282_v9 = vpop.permute.xlu1 %3281  ;;  %v7270_v11 = vld [vmem:[#allocation6_spill] sm:$0xff] }
 0x293   : > { %v3238_v34 = vsel %vm7262_vm9, %v3236_v22, %v3234_v39  ;;  %v3186_v44 = vadd.f32 %v3184_v27, %v3163_v60  ;;  %v3229_v30 = vmul.f32 %v3222_v58, %v3214_v45  ;;  %v3230_v48 = vmul.f32 %v3226_v15, %v3215_v7  ;;  %v3327_v27 = vld [vmem:[%s6647_s2] sm:$0x3] }
 0x294   : > { %vm7263_vm2 = vcmp.lt.s32.totalorder %v4305_v29, 91  ;;  %v3291_v23 = vrot.slane %v3545_v36, %v4311_v1  ;;  %v3295_v38 = vrot.slane %v3545_v36, %v4313_v0  ;;  %v3208_v20 = vadd.f32 %v3206_v16, %v3185_v4 }
 0x295   : > { %v3260_v57 = vsel %vm7263_vm2, %v3257_v40, %v3259_v32  ;;  %vm7264_vm10 = vmmov %vm7263_vm2  ;;  %v3209_v28 = vadd.f32 %v3207_v31, %v3186_v44  ;;  %v3252_v49 = vmul.f32 %v3245_v13, %v3237_v54  ;;  %v3253_v62 = vmul.f32 %v3249_v5, %v3238_v34  ;;  %v7269_v13 = vld [vmem:[#allocation5_spill] sm:$0xff] }
 0x296   : > { %v3261_v52 = vsel %vm7264_vm10, %v3259_v32, %v3257_v40  ;;  %v7265_v8 = vrot.slane %v6062_v41, %v4311_v1  ;;  %v7266_v2 = vrot.slane %v6062_v41, %v4313_v0  ;;  %v1259_v37 = vmul.f32 %v1252_v26, %v6375_v56  ;;  %v3280_v17 = vpop.permute.xlu0 %3279  ;;  %v3305_v58 = vpop.permute.xlu1 %3304 }
 0x297   : > { %v1260_v18 = vmul.f32 %v1256_v46, %v6381_v61  ;;  %v3231_v10 = vadd.f32 %v3229_v30, %v3208_v20  ;;  %v3232_v63 = vadd.f32 %v3230_v48, %v3209_v28  ;;  %v3275_v24 = vmul.f32 %v3268_v55, %v3260_v57 }
 0x298   : > { %v1235_v33 = vmul.f32 %v7265_v8, %v6343_v12  ;;  %v1236_v47 = vmul.f32 %v7266_v2, %v6349_v14  ;;  %v3276_v12 = vmul.f32 %v3272_v51, %v3261_v52  ;;  %vm7267_vm7 = vcmp.lt.s32.totalorder %v4305_v29, 90 }
 0x299   : > { %v3283_v41 = vsel %vm7267_vm7, %v3280_v17, %v3282_v9  ;;  %vm7268_vm11 = vmmov %vm7267_vm7  ;;  %v3314_v59 = vrot.slane %v3546_v43, %v4311_v1  ;;  %v3318_v26 = vrot.slane %v3546_v43, %v4313_v0  ;;  %v3254_v56 = vadd.f32 %v3252_v49, %v3231_v10 }
 0x29a   : > { %v3284_v14 = vsel %vm7268_vm11, %v3282_v9, %v3280_v17  ;;  %v3255_v3 = vadd.f32 %v3253_v62, %v3232_v63  ;;  %v3298_v25 = vmul.f32 %v3291_v23, %v3283_v41  ;;  %v1237_v61 = vadd.f32 %v1235_v33, %v6325_v6  ;;  %v3303_v19 = vpop.permute.xlu0 %3302 }
 0x29b   : > { %v3299_v46 = vmul.f32 %v3295_v38, %v3284_v14  ;;  %v1238_v21 = vadd.f32 %v1236_v47, %v6327_v42  ;;  %v3277_v15 = vadd.f32 %v3275_v24, %v3254_v56  ;;  %v3306_v39 = vsel %vm1243_vm13, %v3303_v19, %v3305_v58 }
 0x29c   : > { %v3278_v22 = vadd.f32 %v3276_v12, %v3255_v3  ;;  %v1261_v50 = vadd.f32 %v1259_v37, %v1237_v61  ;;  %v3307_v35 = vsel %vm1243_vm13, %v3305_v58, %v3303_v19  ;;  %v3321_v42 = vmul.f32 %v3314_v59, %v3306_v39 }
 0x29d   : > { %v1262_v53 = vadd.f32 %v1260_v18, %v1238_v21  ;;  %v3300_v6 = vadd.f32 %v3298_v25, %v3277_v15  ;;  %v3322_v7 = vmul.f32 %v3318_v26, %v3307_v35  ;;  %v3332_v16 = vrot.slane %v3327_v27, %v4311_v1 }
 0x29e   : > { %v3301_v45 = vadd.f32 %v3299_v46, %v3278_v22  ;;  %v2294_v5 = vadd.f32 %v7269_v13, %v1261_v50  ;;  %v3336_v31 = vrot.slane %v3327_v27, %v4313_v0 }
 0x29f   : > { %v2295_v60 = vadd.f32 %v7270_v11, %v1262_v53  ;;  %v3323_v36 = vadd.f32 %v3321_v42, %v3300_v6 }
 0x2a0   : > { %v3324_v54 = vadd.f32 %v3322_v7, %v3301_v45 }
 0x2a1   : > { %v3325_v34 = vadd.f32 %v3323_v36, %v2294_v5 }
 0x2a2   : > { %v3326_v32 = vadd.f32 %v3324_v54, %v2295_v60 }
 0x2a3   : > { %v3339_v55 = vadd.f32 %v3332_v16, %v3325_v34 }
 0x2a4   : > { %v3340_v29 = vadd.f32 %v3336_v31, %v3326_v32 }
 0x2a5   : > { %vm3341_vm13 = vcmp.ge.f32.partialorder %v3339_v55, 0.0  ;;  %v3343_v51 = vmul.f32 0.01, %v3339_v55 }
 0x2a6   : > { %vm3342_vm3 = vcmp.ge.f32.partialorder %v3340_v29, 0.0  ;;  %v3344_v4 = vmul.f32 0.01, %v3340_v29 }
 0x2a7   : > { %v3345_v44 = vsel %vm3341_vm13, %v3339_v55, %v3343_v51 }
 0x2a8   : > { %v3346_v30 = vsel %vm3342_vm3, %v3340_v29, %v3344_v4  ;;  %3347 = vst [vmem:[%s170_s9] sm:$0xff] %v3345_v44 }
 0x2a9   : > { %3348 = vst [vmem:[%s170_s9 + $0x8] sm:$0xff] %v3346_v30 }
 0x2aa PF: > { %s7273_s16 = sld [smem:[#allocation2_spill]] }
 0x2b0   : > { %s13_s12 = sadd.s32 1, %s7273_s16  }
 0x2b1   : > { %p10_p4 = scmp.ge.s32.totalorder %s13_s12, 4  }
 0x2b3   :  { %12 = sbr.rel (!%p10_p4) target bundleno = 3 (0x3), region = 196 }

</bundles_post_ra>
